<compile_context>
chip_gen: v7x
topology: tpu7x:2x2x1
jax: 0.10.0
libtpu: 0.0.40
codegen_flags: <defaults>
</compile_context>

<pallas_src>
import math

import jax
import jax.numpy as jnp
from jax.experimental import pallas as pl
from jax.experimental.pallas import tpu as pltpu


def _round_up(v, m):
    return ((v + m - 1) // m) * m


# --------------------------------------------------------------------------
# layout helpers (cheap zero-pads + free reshapes, NO transposes)
# --------------------------------------------------------------------------
def flat_width(height, width, kernel_size=3):
    """Padded row length Wp: >= width + 2*pad and H*Wp % 128 == 0."""
    pad = kernel_size // 2
    align = 128 // math.gcd(height, 128)
    return _round_up(width + 2 * pad, align)


def input_to_flat(x, kernel_size=3):
    """NCHW input -> channel-padded, lane-dense flat layout (B, Cx, H*Wp)."""
    B, Cin, H, W = x.shape
    pad = kernel_size // 2
    Wp = flat_width(H, W, kernel_size)
    Cx = _round_up(Cin, 8)
    xp = jnp.pad(x, ((0, 0), (0, Cx - Cin), (0, 0), (pad, Wp - W - pad)))
    return xp.reshape(B, Cx, H * Wp)


def state_to_flat(s, kernel_size=3):
    """NCHW state (h or c) -> flat layout (B, C, H*Wp), zero halo columns."""
    B, C, H, W = s.shape
    pad = kernel_size // 2
    Wp = flat_width(H, W, kernel_size)
    sp = jnp.pad(s, ((0, 0), (0, 0), (0, 0), (pad, Wp - W - pad)))
    return sp.reshape(B, C, H * Wp)


def state_from_flat(s_flat, height, width, kernel_size=3):
    """Flat (B, C, H*Wp) -> NCHW (B, C, H, W)."""
    B, C, HWp = s_flat.shape
    pad = kernel_size // 2
    Wp = HWp // height
    return s_flat.reshape(B, C, height, Wp)[..., pad:pad + width]


def pack_conv_lstm_params(weight_oihw, bias, input_channels, hidden_channels,
                          kernel_size=3):
    """Hoisted once-per-layer repack: OIHW -> (4Ch, K*K*Cp), bias -> (4Ch,1).

    Contraction order is (dy, dx, c) with the x-channel block zero-padded
    Cin -> Cx so it matches the kernel's im2col sublane order."""
    Cin, Ch, K = input_channels, hidden_channels, kernel_size
    Cx = _round_up(Cin, 8)
    Cp = Cx + Ch
    w_x = weight_oihw[:, :Cin]
    w_h = weight_oihw[:, Cin:]
    w_pad = jnp.concatenate(
        [w_x, jnp.zeros((4 * Ch, Cx - Cin, K, K), weight_oihw.dtype), w_h],
        axis=1)                                                  # (4Ch,Cp,K,K)
    w2d = jnp.transpose(w_pad, (0, 2, 3, 1)).reshape(4 * Ch, K * K * Cp)
    b2d = bias.reshape(4 * Ch, 1)
    return w2d, b2d


def _slab_geometry(Wp, HWp, K):
    """Per-batch padded-slab geometry for the in-kernel im2col."""
    pad = K // 2
    halo = pad * Wp + pad                 # flat distance of the top-left tap
    D = _round_up(halo, 128)              # data offset (lane-aligned stores)
    L = _round_up(D + HWp + halo, 128)    # per-batch slab length
    return halo, D, L


# --------------------------------------------------------------------------
# kernel
# --------------------------------------------------------------------------
def _make_conv_lstm_kernel(B, H, W, Wp, Cx, Ch, K, dtype):
    pad = K // 2
    HWp = H * Wp
    Cp = Cx + Ch
    halo, D, L = _slab_geometry(Wp, HWp, K)

    def kernel(x_ref, h_ref, c_ref, w_ref, b_ref, h_out_ref, c_out_ref,
               comb_scr, patch_scr):
        # x_ref : (B, Cx, HWp)  flat, W/channel-padded input
        # h_ref : (B, Ch, HWp)  flat previous hidden state (zero halos)
        # c_ref : (B, Ch, HWp)  flat previous cell state
        # w_ref : (4Ch, K*K*Cp) gate conv weight, contraction order (dy,dx,c)
        # b_ref : (4Ch, 1)      gate conv bias
        # outs  : (B, Ch, HWp)  flat h_next / c_next (halo columns zeroed)
        zeros_head = jnp.zeros((Cp, D), dtype)
        zeros_tail = jnp.zeros((Cp, L - D - HWp), dtype)

        # Build the zero-halo-padded combined slab by direct stores (sublane
        # channel-concat + H "SAME" padding); no materialized concatenates.
        for b in range(B):
            base = b * L
            comb_scr[:, base:base + D] = zeros_head
            comb_scr[:, base + D + HWp:base + L] = zeros_tail
            comb_scr[0:Cx, base + D:base + D + HWp] = x_ref[b]
            comb_scr[Cx:Cp, base + D:base + D + HWp] = h_ref[b]

        # im2col: conv tap (dy,dx) of batch b is a static lane window of the
        # padded slab, stored at sublane offset k*Cp (Cp % 8 == 0 -> aligned)
        # and lane offset b*HWp (multiple of 128 -> lane-dense).
        # TODO(synk): for real widths pick Wp % 128 == 0 and build this from
        # 3 pltpu.roll'd copies instead of 9 unaligned lane windows.
        for k in range(K * K):
            dy, dx = divmod(k, K)
            off = dy * Wp + dx
            for b in range(B):
                src = b * L + D - halo + off
                patch_scr[k * Cp:(k + 1) * Cp, b * HWp:(b + 1) * HWp] = \
                    comb_scr[:, src:src + HWp]

        # ONE fused MXU matmul over all taps / channels / batches.
        gates = jnp.dot(w_ref[...], patch_scr[...],
                        preferred_element_type=jnp.float32)     # (4Ch, B*HWp)
        gates = gates + b_ref[...]                              # (4Ch,1) bcast

        # lane mask: image column x of row y lives at flat column y*Wp+x+pad.
        col = jax.lax.broadcasted_iota(jnp.int32, (Ch, HWp), 1) % Wp
        valid = (col >= pad) & (col < pad + W)

        for b in range(B):
            g = gates[:, b * HWp:(b + 1) * HWp]          # lane-aligned slice
            i_g = jax.nn.sigmoid(g[0 * Ch:1 * Ch])       # sublane-aligned
            f_g = jax.nn.sigmoid(g[1 * Ch:2 * Ch])
            g_g = jnp.tanh(g[2 * Ch:3 * Ch])
            o_g = jax.nn.sigmoid(g[3 * Ch:4 * Ch])
            c_prev = c_ref[b].astype(jnp.float32)
            c_next = f_g * c_prev + i_g * g_g
            h_next = o_g * jnp.tanh(c_next)
            # Zero the invalid halo columns so the flat state can be fed
            # straight back into the next timestep (the conv reads h's halos
            # and must see zeros; c must not accumulate row-wrapped garbage).
            c_next = jnp.where(valid, c_next, 0.0)
            h_next = jnp.where(valid, h_next, 0.0)
            c_out_ref[b] = c_next.astype(c_out_ref.dtype)
            h_out_ref[b] = h_next.astype(h_out_ref.dtype)

    return kernel


# --------------------------------------------------------------------------
# wrappers
# --------------------------------------------------------------------------
def conv_lstm_cell_flat(x_flat, h_flat, c_flat, w2d, b2d, *,
                        height, width, kernel_size=3):
    """One ConvLSTM step entirely in the flat layout (state carried flat)."""
    B, Cx, HWp = x_flat.shape
    _, Ch, _ = h_flat.shape
    K = kernel_size
    assert HWp % height == 0
    Wp = HWp // height
    Cp = Cx + Ch
    assert Cx % 8 == 0 and Ch % 8 == 0, "channel blocks must be multiples of 8"
    assert w2d.shape == (4 * Ch, K * K * Cp)
    dtype = x_flat.dtype

    halo, D, L = _slab_geometry(Wp, HWp, K)
    kernel = _make_conv_lstm_kernel(B, height, width, Wp, Cx, Ch, K, dtype)

    out_shape = (
        jax.ShapeDtypeStruct((B, Ch, HWp), dtype),   # h_next (flat)
        jax.ShapeDtypeStruct((B, Ch, HWp), dtype),   # c_next (flat)
    )

    h_next, c_next = pl.pallas_call(
        kernel,
        out_shape=out_shape,
        grid_spec=pltpu.PrefetchScalarGridSpec(
            num_scalar_prefetch=0,
            grid=(1,),                       # batch folded into the lane axis
            in_specs=[
                pl.BlockSpec((B, Cx, HWp), lambda i: (0, 0, 0)),
                pl.BlockSpec((B, Ch, HWp), lambda i: (0, 0, 0)),
                pl.BlockSpec((B, Ch, HWp), lambda i: (0, 0, 0)),
                pl.BlockSpec((4 * Ch, K * K * Cp), lambda i: (0, 0)),
                pl.BlockSpec((4 * Ch, 1), lambda i: (0, 0)),
            ],
            out_specs=[
                pl.BlockSpec((B, Ch, HWp), lambda i: (0, 0, 0)),
                pl.BlockSpec((B, Ch, HWp), lambda i: (0, 0, 0)),
            ],
            scratch_shapes=[
                pltpu.VMEM((Cp, B * L), dtype),              # padded slab
                pltpu.VMEM((K * K * Cp, B * HWp), dtype),    # im2col patches
            ],
        ),
        # cell state updated in place (flat-carry keeps shapes/dtypes stable).
        input_output_aliases={2: 1},
        compiler_params=pltpu.CompilerParams(
            dimension_semantics=("arbitrary",),
            vmem_limit_bytes=32 * 1024 * 1024,
        ),
    )(x_flat, h_flat, c_flat, w2d, b2d)
    return h_next, c_next


def conv_lstm_cell(x, weight_oihw, bias, hidden_channels,
                   h_prev=None, c_prev=None, kernel_size=3):
    """Drop-in ConvLSTMCell.forward: NCHW in / NCHW out.

    NOTE: repacks the weights on every call for convenience; recurrent
    callers should call pack_conv_lstm_params once and drive
    conv_lstm_cell_flat directly (see __main__ for the pattern)."""
    B, Cin, H, W = x.shape
    Ch = hidden_channels
    K = kernel_size
    assert K % 2 == 1, "only odd kernel_size matches PyTorch SAME padding"
    assert Ch % 8 == 0, "hidden_channels must be a multiple of 8 here"
    dtype = x.dtype

    if h_prev is None:
        h_prev = jnp.zeros((B, Ch, H, W), dtype)
    if c_prev is None:
        c_prev = jnp.zeros((B, Ch, H, W), dtype)

    w2d, b2d = pack_conv_lstm_params(weight_oihw, bias, Cin, Ch, K)
    x_f = input_to_flat(x, K)
    h_f = state_to_flat(h_prev, K)
    c_f = state_to_flat(c_prev, K)
    h_f, c_f = conv_lstm_cell_flat(x_f, h_f, c_f, w2d, b2d,
                                   height=H, width=W, kernel_size=K)
    return (state_from_flat(h_f, H, W, K), state_from_flat(c_f, H, W, K))


# --------------------------------------------------------------------------
# pure-JAX reference (mirrors the PyTorch module, NCHW throughout)
# --------------------------------------------------------------------------
def _reference_conv_lstm(x, weight_oihw, bias, Ch, h_prev=None, c_prev=None):
    B, Cin, H, W = x.shape
    if h_prev is None:
        h_prev = jnp.zeros((B, Ch, H, W), x.dtype)
    if c_prev is None:
        c_prev = jnp.zeros((B, Ch, H, W), x.dtype)
    combined = jnp.concatenate([x, h_prev], axis=1)
    gates = jax.lax.conv_general_dilated(
        combined, weight_oihw, window_strides=(1, 1), padding="SAME",
        dimension_numbers=("NCHW", "OIHW", "NCHW"),
    ) + bias.reshape(1, -1, 1, 1)
    i_g, f_g, g_g, o_g = jnp.split(gates, 4, axis=1)
    i_g = jax.nn.sigmoid(i_g)
    f_g = jax.nn.sigmoid(f_g)
    g_g = jnp.tanh(g_g)
    o_g = jax.nn.sigmoid(o_g)
    c_next = f_g * c_prev + i_g * g_g
    h_next = o_g * jnp.tanh(c_next)
    return h_next, c_next


if __name__ == "__main__":
    B, Cin, H, W = 2, 4, 16, 16
    Ch = 32
    K = 3
    T = 4
    C_tot = Cin + Ch

    key = jax.random.PRNGKey(0)
    kw, kb, kx, kh, kc, ks = jax.random.split(key, 6)

    # kaiming_normal_(mode='fan_in', nonlinearity='sigmoid'): gain = 1.
    fan_in = C_tot * K * K
    std = 1.0 / math.sqrt(fan_in)
    weight = jax.random.normal(kw, (4 * Ch, C_tot, K, K), jnp.float32) * std
    # PyTorch Conv2d default bias init: U(-1/sqrt(fan_in), 1/sqrt(fan_in)).
    bound = 1.0 / math.sqrt(fan_in)
    bias = jax.random.uniform(kb, (4 * Ch,), jnp.float32, -bound, bound)

    x = jax.random.normal(kx, (B, Cin, H, W), jnp.float32)

    # 1) single step, zero initial state (the module's default path)
    h1, c1 = conv_lstm_cell(x, weight, bias, hidden_channels=Ch, kernel_size=K)
    jax.block_until_ready((h1, c1))
    h1_ref, c1_ref = _reference_conv_lstm(x, weight, bias, Ch)
    assert h1.shape == (B, Ch, H, W) and c1.shape == (B, Ch, H, W)
    assert jnp.allclose(h1, h1_ref, atol=2e-5, rtol=2e-5)
    assert jnp.allclose(c1, c1_ref, atol=2e-5, rtol=2e-5)

    # 2) single step, nonzero recurrent state
    h_prev = jax.random.normal(kh, (B, Ch, H, W), jnp.float32) * 0.5
    c_prev = jax.random.normal(kc, (B, Ch, H, W), jnp.float32) * 0.5
    h2, c2 = conv_lstm_cell(x, weight, bias, Ch, h_prev, c_prev, K)
    jax.block_until_ready((h2, c2))
    h2_ref, c2_ref = _reference_conv_lstm(x, weight, bias, Ch, h_prev, c_prev)
    assert jnp.allclose(h2, h2_ref, atol=2e-5, rtol=2e-5)
    assert jnp.allclose(c2, c2_ref, atol=2e-5, rtol=2e-5)

    # 3) T-step recurrence on the flat-carry path: weights repacked ONCE,
    #    state carried in the flat padded layout (no per-step glue).
    x_seq = jax.random.normal(ks, (T, B, Cin, H, W), jnp.float32) * 0.5
    w2d, b2d = pack_conv_lstm_params(weight, bias, Cin, Ch, K)
    h_f = state_to_flat(jnp.zeros((B, Ch, H, W), jnp.float32), K)
    c_f = state_to_flat(jnp.zeros((B, Ch, H, W), jnp.float32), K)
    for t in range(T):
        x_f = input_to_flat(x_seq[t], K)
        h_f, c_f = conv_lstm_cell_flat(x_f, h_f, c_f, w2d, b2d,
                                       height=H, width=W, kernel_size=K)
    jax.block_until_ready((h_f, c_f))
    h_seq = state_from_flat(h_f, H, W, K)
    c_seq = state_from_flat(c_f, H, W, K)

    hr = cr = None
    for t in range(T):
        hr, cr = _reference_conv_lstm(x_seq[t], weight, bias, Ch, hr, cr)
    assert jnp.allclose(h_seq, hr, atol=1e-4, rtol=1e-4)
    assert jnp.allclose(c_seq, cr, atol=1e-4, rtol=1e-4)

    print("KERNEL_OK")
</pallas_src>

<mosaic_0001>
module attributes {stable_mosaic.version = 11 : i64} {
  func.func @kernel(%arg0: i32, %arg1: memref<2x8x384xf32, #tpu.memory_space<vmem>>, %arg2: memref<2x32x384xf32, #tpu.memory_space<vmem>>, %arg3: memref<2x32x384xf32, #tpu.memory_space<vmem>>, %arg4: memref<128x360xf32, #tpu.memory_space<vmem>>, %arg5: memref<128x1xf32, #tpu.memory_space<vmem>>, %arg6: memref<2x32x384xf32, #tpu.memory_space<vmem>>, %arg7: memref<2x32x384xf32, #tpu.memory_space<vmem>>, %arg8: memref<40x1280xf32, #tpu.memory_space<vmem>>, %arg9: memref<360x768xf32, #tpu.memory_space<vmem>>) attributes {dimension_semantics = [#tpu.dimension_semantics<arbitrary>], iteration_bounds = array<i64: 1>, scalar_prefetch = 0 : i64, scratch_operands = 2 : i64, tpu.core_type = #tpu.core_type<tc>, window_params = [{pipeline_mode = #tpu.pipeline_mode<synchronous>, transform_indices = @transform_0, window_bounds = array<i64: 2, 8, 384>}, {pipeline_mode = #tpu.pipeline_mode<synchronous>, transform_indices = @transform_1, window_bounds = array<i64: 2, 32, 384>}, {pipeline_mode = #tpu.pipeline_mode<synchronous>, transform_indices = @transform_2, window_bounds = array<i64: 2, 32, 384>}, {pipeline_mode = #tpu.pipeline_mode<synchronous>, transform_indices = @transform_3, window_bounds = array<i64: 128, 360>}, {pipeline_mode = #tpu.pipeline_mode<synchronous>, transform_indices = @transform_4, window_bounds = array<i64: 128, 1>}, {pipeline_mode = #tpu.pipeline_mode<synchronous>, transform_indices = @transform_5, window_bounds = array<i64: 2, 32, 384>}, {pipeline_mode = #tpu.pipeline_mode<synchronous>, transform_indices = @transform_6, window_bounds = array<i64: 2, 32, 384>}]} {
    %cst = arith.constant 0.000000e+00 : f32
    %0 = vector.broadcast %cst : f32 to vector<40x128xf32>
    %cst_0 = arith.constant 0.000000e+00 : f32
    %1 = vector.broadcast %cst_0 : f32 to vector<40x128xf32>
    %c0 = arith.constant 0 : index
    %c0_1 = arith.constant 0 : index
    %2 = vector.load %arg8[%c0, %c0_1] : memref<40x1280xf32, #tpu.memory_space<vmem>>, vector<40x128xf32>
    tpu.vector_store %arg8[%c0, %c0_1], %0 {strides = array<i32>} : memref<40x1280xf32, #tpu.memory_space<vmem>>, vector<40x128xf32>,
    %c0_2 = arith.constant 0 : index
    %c512 = arith.constant 512 : index
    %3 = vector.load %arg8[%c0_2, %c512] : memref<40x1280xf32, #tpu.memory_space<vmem>>, vector<40x128xf32>
    tpu.vector_store %arg8[%c0_2, %c512], %1 {strides = array<i32>} : memref<40x1280xf32, #tpu.memory_space<vmem>>, vector<40x128xf32>,
    %c0_3 = arith.constant 0 : index
    %c0_4 = arith.constant 0 : index
    %c0_5 = arith.constant 0 : index
    %4 = vector.load %arg1[%c0_3, %c0_4, %c0_5] : memref<2x8x384xf32, #tpu.memory_space<vmem>>, vector<1x8x384xf32>
    %5 = vector.shape_cast %4 : vector<1x8x384xf32> to vector<8x384xf32>
    %c0_6 = arith.constant 0 : index
    %c128 = arith.constant 128 : index
    %6 = vector.load %arg8[%c0_6, %c128] : memref<40x1280xf32, #tpu.memory_space<vmem>>, vector<8x384xf32>
    tpu.vector_store %arg8[%c0_6, %c128], %5 {strides = array<i32>} : memref<40x1280xf32, #tpu.memory_space<vmem>>, vector<8x384xf32>,
    %c0_7 = arith.constant 0 : index
    %c0_8 = arith.constant 0 : index
    %c0_9 = arith.constant 0 : index
    %7 = vector.load %arg2[%c0_7, %c0_8, %c0_9] : memref<2x32x384xf32, #tpu.memory_space<vmem>>, vector<1x32x384xf32>
    %8 = vector.shape_cast %7 : vector<1x32x384xf32> to vector<32x384xf32>
    %c8 = arith.constant 8 : index
    %c128_10 = arith.constant 128 : index
    %9 = vector.load %arg8[%c8, %c128_10] : memref<40x1280xf32, #tpu.memory_space<vmem>>, vector<32x384xf32>
    tpu.vector_store %arg8[%c8, %c128_10], %8 {strides = array<i32>} : memref<40x1280xf32, #tpu.memory_space<vmem>>, vector<32x384xf32>,
    %c0_11 = arith.constant 0 : index
    %c640 = arith.constant 640 : index
    %10 = vector.load %arg8[%c0_11, %c640] : memref<40x1280xf32, #tpu.memory_space<vmem>>, vector<40x128xf32>
    tpu.vector_store %arg8[%c0_11, %c640], %0 {strides = array<i32>} : memref<40x1280xf32, #tpu.memory_space<vmem>>, vector<40x128xf32>,
    %c0_12 = arith.constant 0 : index
    %c1152 = arith.constant 1152 : index
    %11 = vector.load %arg8[%c0_12, %c1152] : memref<40x1280xf32, #tpu.memory_space<vmem>>, vector<40x128xf32>
    tpu.vector_store %arg8[%c0_12, %c1152], %1 {strides = array<i32>} : memref<40x1280xf32, #tpu.memory_space<vmem>>, vector<40x128xf32>,
    %c1 = arith.constant 1 : index
    %c0_13 = arith.constant 0 : index
    %c0_14 = arith.constant 0 : index
    %12 = vector.load %arg1[%c1, %c0_13, %c0_14] : memref<2x8x384xf32, #tpu.memory_space<vmem>>, vector<1x8x384xf32>
    %13 = vector.shape_cast %12 : vector<1x8x384xf32> to vector<8x384xf32>
    %c0_15 = arith.constant 0 : index
    %c768 = arith.constant 768 : index
    %14 = vector.load %arg8[%c0_15, %c768] : memref<40x1280xf32, #tpu.memory_space<vmem>>, vector<8x384xf32>
    tpu.vector_store %arg8[%c0_15, %c768], %13 {strides = array<i32>} : memref<40x1280xf32, #tpu.memory_space<vmem>>, vector<8x384xf32>,
    %c1_16 = arith.constant 1 : index
    %c0_17 = arith.constant 0 : index
    %c0_18 = arith.constant 0 : index
    %15 = vector.load %arg2[%c1_16, %c0_17, %c0_18] : memref<2x32x384xf32, #tpu.memory_space<vmem>>, vector<1x32x384xf32>
    %16 = vector.shape_cast %15 : vector<1x32x384xf32> to vector<32x384xf32>
    %c8_19 = arith.constant 8 : index
    %c768_20 = arith.constant 768 : index
    %17 = vector.load %arg8[%c8_19, %c768_20] : memref<40x1280xf32, #tpu.memory_space<vmem>>, vector<32x384xf32>
    tpu.vector_store %arg8[%c8_19, %c768_20], %16 {strides = array<i32>} : memref<40x1280xf32, #tpu.memory_space<vmem>>, vector<32x384xf32>,
    %c0_21 = arith.constant 0 : index
    %c103 = arith.constant 103 : index
    %18 = vector.load %arg8[%c0_21, %c103] : memref<40x1280xf32, #tpu.memory_space<vmem>>, vector<40x384xf32>
    %c0_22 = arith.constant 0 : index
    %c0_23 = arith.constant 0 : index
    %19 = vector.load %arg9[%c0_22, %c0_23] : memref<360x768xf32, #tpu.memory_space<vmem>>, vector<40x384xf32>
    tpu.vector_store %arg9[%c0_22, %c0_23], %18 {strides = array<i32>} : memref<360x768xf32, #tpu.memory_space<vmem>>, vector<40x384xf32>,
    %c0_24 = arith.constant 0 : index
    %c743 = arith.constant 743 : index
    %20 = vector.load %arg8[%c0_24, %c743] : memref<40x1280xf32, #tpu.memory_space<vmem>>, vector<40x384xf32>
    %c0_25 = arith.constant 0 : index
    %c384 = arith.constant 384 : index
    %21 = vector.load %arg9[%c0_25, %c384] : memref<360x768xf32, #tpu.memory_space<vmem>>, vector<40x384xf32>
    tpu.vector_store %arg9[%c0_25, %c384], %20 {strides = array<i32>} : memref<360x768xf32, #tpu.memory_space<vmem>>, vector<40x384xf32>,
    %c0_26 = arith.constant 0 : index
    %c104 = arith.constant 104 : index
    %22 = vector.load %arg8[%c0_26, %c104] : memref<40x1280xf32, #tpu.memory_space<vmem>>, vector<40x384xf32>
    %c40 = arith.constant 40 : index
    %c0_27 = arith.constant 0 : index
    %23 = vector.load %arg9[%c40, %c0_27] : memref<360x768xf32, #tpu.memory_space<vmem>>, vector<40x384xf32>
    tpu.vector_store %arg9[%c40, %c0_27], %22 {strides = array<i32>} : memref<360x768xf32, #tpu.memory_space<vmem>>, vector<40x384xf32>,
    %c0_28 = arith.constant 0 : index
    %c744 = arith.constant 744 : index
    %24 = vector.load %arg8[%c0_28, %c744] : memref<40x1280xf32, #tpu.memory_space<vmem>>, vector<40x384xf32>
    %c40_29 = arith.constant 40 : index
    %c384_30 = arith.constant 384 : index
    %25 = vector.load %arg9[%c40_29, %c384_30] : memref<360x768xf32, #tpu.memory_space<vmem>>, vector<40x384xf32>
    tpu.vector_store %arg9[%c40_29, %c384_30], %24 {strides = array<i32>} : memref<360x768xf32, #tpu.memory_space<vmem>>, vector<40x384xf32>,
    %c0_31 = arith.constant 0 : index
    %c105 = arith.constant 105 : index
    %26 = vector.load %arg8[%c0_31, %c105] : memref<40x1280xf32, #tpu.memory_space<vmem>>, vector<40x384xf32>
    %c80 = arith.constant 80 : index
    %c0_32 = arith.constant 0 : index
    %27 = vector.load %arg9[%c80, %c0_32] : memref<360x768xf32, #tpu.memory_space<vmem>>, vector<40x384xf32>
    tpu.vector_store %arg9[%c80, %c0_32], %26 {strides = array<i32>} : memref<360x768xf32, #tpu.memory_space<vmem>>, vector<40x384xf32>,
    %c0_33 = arith.constant 0 : index
    %c745 = arith.constant 745 : index
    %28 = vector.load %arg8[%c0_33, %c745] : memref<40x1280xf32, #tpu.memory_space<vmem>>, vector<40x384xf32>
    %c80_34 = arith.constant 80 : index
    %c384_35 = arith.constant 384 : index
    %29 = vector.load %arg9[%c80_34, %c384_35] : memref<360x768xf32, #tpu.memory_space<vmem>>, vector<40x384xf32>
    tpu.vector_store %arg9[%c80_34, %c384_35], %28 {strides = array<i32>} : memref<360x768xf32, #tpu.memory_space<vmem>>, vector<40x384xf32>,
    %c0_36 = arith.constant 0 : index
    %c127 = arith.constant 127 : index
    %30 = vector.load %arg8[%c0_36, %c127] : memref<40x1280xf32, #tpu.memory_space<vmem>>, vector<40x384xf32>
    %c120 = arith.constant 120 : index
    %c0_37 = arith.constant 0 : index
    %31 = vector.load %arg9[%c120, %c0_37] : memref<360x768xf32, #tpu.memory_space<vmem>>, vector<40x384xf32>
    tpu.vector_store %arg9[%c120, %c0_37], %30 {strides = array<i32>} : memref<360x768xf32, #tpu.memory_space<vmem>>, vector<40x384xf32>,
    %c0_38 = arith.constant 0 : index
    %c767 = arith.constant 767 : index
    %32 = vector.load %arg8[%c0_38, %c767] : memref<40x1280xf32, #tpu.memory_space<vmem>>, vector<40x384xf32>
    %c120_39 = arith.constant 120 : index
    %c384_40 = arith.constant 384 : index
    %33 = vector.load %arg9[%c120_39, %c384_40] : memref<360x768xf32, #tpu.memory_space<vmem>>, vector<40x384xf32>
    tpu.vector_store %arg9[%c120_39, %c384_40], %32 {strides = array<i32>} : memref<360x768xf32, #tpu.memory_space<vmem>>, vector<40x384xf32>,
    %c0_41 = arith.constant 0 : index
    %c128_42 = arith.constant 128 : index
    %34 = vector.load %arg8[%c0_41, %c128_42] : memref<40x1280xf32, #tpu.memory_space<vmem>>, vector<40x384xf32>
    %c160 = arith.constant 160 : index
    %c0_43 = arith.constant 0 : index
    %35 = vector.load %arg9[%c160, %c0_43] : memref<360x768xf32, #tpu.memory_space<vmem>>, vector<40x384xf32>
    tpu.vector_store %arg9[%c160, %c0_43], %34 {strides = array<i32>} : memref<360x768xf32, #tpu.memory_space<vmem>>, vector<40x384xf32>,
    %c0_44 = arith.constant 0 : index
    %c768_45 = arith.constant 768 : index
    %36 = vector.load %arg8[%c0_44, %c768_45] : memref<40x1280xf32, #tpu.memory_space<vmem>>, vector<40x384xf32>
    %c160_46 = arith.constant 160 : index
    %c384_47 = arith.constant 384 : index
    %37 = vector.load %arg9[%c160_46, %c384_47] : memref<360x768xf32, #tpu.memory_space<vmem>>, vector<40x384xf32>
    tpu.vector_store %arg9[%c160_46, %c384_47], %36 {strides = array<i32>} : memref<360x768xf32, #tpu.memory_space<vmem>>, vector<40x384xf32>,
    %c0_48 = arith.constant 0 : index
    %c129 = arith.constant 129 : index
    %38 = vector.load %arg8[%c0_48, %c129] : memref<40x1280xf32, #tpu.memory_space<vmem>>, vector<40x384xf32>
    %c200 = arith.constant 200 : index
    %c0_49 = arith.constant 0 : index
    %39 = vector.load %arg9[%c200, %c0_49] : memref<360x768xf32, #tpu.memory_space<vmem>>, vector<40x384xf32>
    tpu.vector_store %arg9[%c200, %c0_49], %38 {strides = array<i32>} : memref<360x768xf32, #tpu.memory_space<vmem>>, vector<40x384xf32>,
    %c0_50 = arith.constant 0 : index
    %c769 = arith.constant 769 : index
    %40 = vector.load %arg8[%c0_50, %c769] : memref<40x1280xf32, #tpu.memory_space<vmem>>, vector<40x384xf32>
    %c200_51 = arith.constant 200 : index
    %c384_52 = arith.constant 384 : index
    %41 = vector.load %arg9[%c200_51, %c384_52] : memref<360x768xf32, #tpu.memory_space<vmem>>, vector<40x384xf32>
    tpu.vector_store %arg9[%c200_51, %c384_52], %40 {strides = array<i32>} : memref<360x768xf32, #tpu.memory_space<vmem>>, vector<40x384xf32>,
    %c0_53 = arith.constant 0 : index
    %c151 = arith.constant 151 : index
    %42 = vector.load %arg8[%c0_53, %c151] : memref<40x1280xf32, #tpu.memory_space<vmem>>, vector<40x384xf32>
    %c240 = arith.constant 240 : index
    %c0_54 = arith.constant 0 : index
    %43 = vector.load %arg9[%c240, %c0_54] : memref<360x768xf32, #tpu.memory_space<vmem>>, vector<40x384xf32>
    tpu.vector_store %arg9[%c240, %c0_54], %42 {strides = array<i32>} : memref<360x768xf32, #tpu.memory_space<vmem>>, vector<40x384xf32>,
    %c0_55 = arith.constant 0 : index
    %c791 = arith.constant 791 : index
    %44 = vector.load %arg8[%c0_55, %c791] : memref<40x1280xf32, #tpu.memory_space<vmem>>, vector<40x384xf32>
    %c240_56 = arith.constant 240 : index
    %c384_57 = arith.constant 384 : index
    %45 = vector.load %arg9[%c240_56, %c384_57] : memref<360x768xf32, #tpu.memory_space<vmem>>, vector<40x384xf32>
    tpu.vector_store %arg9[%c240_56, %c384_57], %44 {strides = array<i32>} : memref<360x768xf32, #tpu.memory_space<vmem>>, vector<40x384xf32>,
    %c0_58 = arith.constant 0 : index
    %c152 = arith.constant 152 : index
    %46 = vector.load %arg8[%c0_58, %c152] : memref<40x1280xf32, #tpu.memory_space<vmem>>, vector<40x384xf32>
    %c280 = arith.constant 280 : index
    %c0_59 = arith.constant 0 : index
    %47 = vector.load %arg9[%c280, %c0_59] : memref<360x768xf32, #tpu.memory_space<vmem>>, vector<40x384xf32>
    tpu.vector_store %arg9[%c280, %c0_59], %46 {strides = array<i32>} : memref<360x768xf32, #tpu.memory_space<vmem>>, vector<40x384xf32>,
    %c0_60 = arith.constant 0 : index
    %c792 = arith.constant 792 : index
    %48 = vector.load %arg8[%c0_60, %c792] : memref<40x1280xf32, #tpu.memory_space<vmem>>, vector<40x384xf32>
    %c280_61 = arith.constant 280 : index
    %c384_62 = arith.constant 384 : index
    %49 = vector.load %arg9[%c280_61, %c384_62] : memref<360x768xf32, #tpu.memory_space<vmem>>, vector<40x384xf32>
    tpu.vector_store %arg9[%c280_61, %c384_62], %48 {strides = array<i32>} : memref<360x768xf32, #tpu.memory_space<vmem>>, vector<40x384xf32>,
    %c0_63 = arith.constant 0 : index
    %c153 = arith.constant 153 : index
    %50 = vector.load %arg8[%c0_63, %c153] : memref<40x1280xf32, #tpu.memory_space<vmem>>, vector<40x384xf32>
    %c320 = arith.constant 320 : index
    %c0_64 = arith.constant 0 : index
    %51 = vector.load %arg9[%c320, %c0_64] : memref<360x768xf32, #tpu.memory_space<vmem>>, vector<40x384xf32>
    tpu.vector_store %arg9[%c320, %c0_64], %50 {strides = array<i32>} : memref<360x768xf32, #tpu.memory_space<vmem>>, vector<40x384xf32>,
    %c0_65 = arith.constant 0 : index
    %c793 = arith.constant 793 : index
    %52 = vector.load %arg8[%c0_65, %c793] : memref<40x1280xf32, #tpu.memory_space<vmem>>, vector<40x384xf32>
    %c320_66 = arith.constant 320 : index
    %c384_67 = arith.constant 384 : index
    %53 = vector.load %arg9[%c320_66, %c384_67] : memref<360x768xf32, #tpu.memory_space<vmem>>, vector<40x384xf32>
    tpu.vector_store %arg9[%c320_66, %c384_67], %52 {strides = array<i32>} : memref<360x768xf32, #tpu.memory_space<vmem>>, vector<40x384xf32>,
    %c0_68 = arith.constant 0 : index
    %c0_69 = arith.constant 0 : index
    %54 = vector.load %arg4[%c0_68, %c0_69] : memref<128x360xf32, #tpu.memory_space<vmem>>, vector<128x360xf32>
    %c0_70 = arith.constant 0 : index
    %c0_71 = arith.constant 0 : index
    %55 = vector.load %arg9[%c0_70, %c0_71] : memref<360x768xf32, #tpu.memory_space<vmem>>, vector<360x768xf32>
    %cst_72 = arith.constant dense<0.000000e+00> : vector<128x768xf32>
    %56 = tpu.matmul %54, %55, %cst_72 {dimension_numbers = #tpu.dot_dimension_numbers<[1], [0], [0], [1], [0, 0, 1, 1], [], []>} : vector<128x360xf32>, vector<360x768xf32>, vector<128x768xf32> -> vector<128x768xf32>
    %c0_73 = arith.constant 0 : index
    %c0_74 = arith.constant 0 : index
    %57 = vector.load %arg5[%c0_73, %c0_74] : memref<128x1xf32, #tpu.memory_space<vmem>>, vector<128x1xf32>
    %58 = vector.broadcast %57 : vector<128x1xf32> to vector<128x768xf32>
    %59 = arith.addf %56, %58 : vector<128x768xf32>
    %60 = tpu.iota {dimensions = array<i32: 1>} : vector<32x384xi32>
    %c24_i32 = arith.constant 24 : i32
    %c0_i32 = arith.constant 0 : i32
    %61 = arith.cmpi eq, %c24_i32, %c0_i32 : i32
    %c1_i32 = arith.constant 1 : i32
    %62 = arith.select %61, %c1_i32, %c24_i32 : i32
    %63 = vector.broadcast %62 : i32 to vector<32x384xi32>
    %64 = arith.remsi %60, %63 : vector<32x384xi32>
    %c0_i32_75 = arith.constant 0 : i32
    %65 = vector.broadcast %c0_i32_75 : i32 to vector<32x384xi32>
    %66 = arith.cmpi ne, %64, %65 : vector<32x384xi32>
    %c0_i32_76 = arith.constant 0 : i32
    %67 = vector.broadcast %c0_i32_76 : i32 to vector<32x384xi32>
    %68 = arith.cmpi slt, %64, %67 : vector<32x384xi32>
    %c0_i32_77 = arith.constant 0 : i32
    %69 = arith.cmpi slt, %62, %c0_i32_77 : i32
    %70 = vector.broadcast %69 : i1 to vector<32x384xi1>
    %71 = vector.broadcast %70 : vector<32x384xi1> to vector<32x384xi1>
    %72 = arith.xori %68, %71 : vector<32x384xi1>
    %73 = arith.andi %72, %66 : vector<32x384xi1>
    %74 = vector.broadcast %62 : i32 to vector<32x384xi32>
    %75 = arith.addi %64, %74 : vector<32x384xi32>
    %76 = arith.select %73, %75, %64 : vector<32x384xi1>, vector<32x384xi32>
    %c1_i32_78 = arith.constant 1 : i32
    %77 = vector.broadcast %c1_i32_78 : i32 to vector<32x384xi32>
    %78 = arith.cmpi sge, %76, %77 : vector<32x384xi32>
    %c17_i32 = arith.constant 17 : i32
    %79 = vector.broadcast %c17_i32 : i32 to vector<32x384xi32>
    %80 = arith.cmpi slt, %76, %79 : vector<32x384xi32>
    %81 = arith.andi %78, %80 : vector<32x384xi1>
    %82 = vector.extract_strided_slice %59 {offsets = [0, 0], sizes = [128, 384], strides = [1, 1]} : vector<128x768xf32> to vector<128x384xf32>
    %83 = vector.extract_strided_slice %82 {offsets = [0, 0], sizes = [32, 384], strides = [1, 1]} : vector<128x384xf32> to vector<32x384xf32>
    %84 = arith.negf %83 : vector<32x384xf32>
    %85 = math.exp %84 : vector<32x384xf32>
    %cst_79 = arith.constant 1.000000e+00 : f32
    %86 = vector.broadcast %cst_79 : f32 to vector<32x384xf32>
    %87 = arith.addf %86, %85 : vector<32x384xf32>
    %88 = arith.divf %86, %87 : vector<32x384xf32>
    %89 = vector.extract_strided_slice %82 {offsets = [32, 0], sizes = [32, 384], strides = [1, 1]} : vector<128x384xf32> to vector<32x384xf32>
    %90 = arith.negf %89 : vector<32x384xf32>
    %91 = math.exp %90 : vector<32x384xf32>
    %cst_80 = arith.constant 1.000000e+00 : f32
    %92 = vector.broadcast %cst_80 : f32 to vector<32x384xf32>
    %93 = arith.addf %92, %91 : vector<32x384xf32>
    %94 = arith.divf %92, %93 : vector<32x384xf32>
    %95 = vector.extract_strided_slice %82 {offsets = [64, 0], sizes = [32, 384], strides = [1, 1]} : vector<128x384xf32> to vector<32x384xf32>
    %96 = math.tanh %95 : vector<32x384xf32>
    %97 = vector.extract_strided_slice %82 {offsets = [96, 0], sizes = [32, 384], strides = [1, 1]} : vector<128x384xf32> to vector<32x384xf32>
    %98 = arith.negf %97 : vector<32x384xf32>
    %99 = math.exp %98 : vector<32x384xf32>
    %cst_81 = arith.constant 1.000000e+00 : f32
    %100 = vector.broadcast %cst_81 : f32 to vector<32x384xf32>
    %101 = arith.addf %100, %99 : vector<32x384xf32>
    %102 = arith.divf %100, %101 : vector<32x384xf32>
    %c0_82 = arith.constant 0 : index
    %c0_83 = arith.constant 0 : index
    %c0_84 = arith.constant 0 : index
    %103 = vector.load %arg3[%c0_82, %c0_83, %c0_84] : memref<2x32x384xf32, #tpu.memory_space<vmem>>, vector<1x32x384xf32>
    %104 = vector.shape_cast %103 : vector<1x32x384xf32> to vector<32x384xf32>
    %105 = arith.mulf %94, %104 : vector<32x384xf32>
    %106 = arith.mulf %88, %96 : vector<32x384xf32>
    %107 = arith.addf %105, %106 : vector<32x384xf32>
    %108 = math.tanh %107 : vector<32x384xf32>
    %109 = arith.mulf %102, %108 : vector<32x384xf32>
    %cst_85 = arith.constant 0.000000e+00 : f32
    %110 = vector.broadcast %cst_85 : f32 to vector<32x384xf32>
    %111 = arith.select %81, %107, %110 : vector<32x384xi1>, vector<32x384xf32>
    %cst_86 = arith.constant 0.000000e+00 : f32
    %112 = vector.broadcast %cst_86 : f32 to vector<32x384xf32>
    %113 = arith.select %81, %109, %112 : vector<32x384xi1>, vector<32x384xf32>
    %c0_87 = arith.constant 0 : index
    %c0_88 = arith.constant 0 : index
    %c0_89 = arith.constant 0 : index
    %114 = vector.load %arg7[%c0_87, %c0_88, %c0_89] : memref<2x32x384xf32, #tpu.memory_space<vmem>>, vector<1x32x384xf32>
    %115 = vector.shape_cast %114 : vector<1x32x384xf32> to vector<32x384xf32>
    %116 = vector.shape_cast %111 : vector<32x384xf32> to vector<1x32x384xf32>
    tpu.vector_store %arg7[%c0_87, %c0_88, %c0_89], %116 {strides = array<i32>} : memref<2x32x384xf32, #tpu.memory_space<vmem>>, vector<1x32x384xf32>,
    %c0_90 = arith.constant 0 : index
    %c0_91 = arith.constant 0 : index
    %c0_92 = arith.constant 0 : index
    %117 = vector.load %arg6[%c0_90, %c0_91, %c0_92] : memref<2x32x384xf32, #tpu.memory_space<vmem>>, vector<1x32x384xf32>
    %118 = vector.shape_cast %117 : vector<1x32x384xf32> to vector<32x384xf32>
    %119 = vector.shape_cast %113 : vector<32x384xf32> to vector<1x32x384xf32>
    tpu.vector_store %arg6[%c0_90, %c0_91, %c0_92], %119 {strides = array<i32>} : memref<2x32x384xf32, #tpu.memory_space<vmem>>, vector<1x32x384xf32>,
    %120 = vector.extract_strided_slice %59 {offsets = [0, 384], sizes = [128, 384], strides = [1, 1]} : vector<128x768xf32> to vector<128x384xf32>
    %121 = vector.extract_strided_slice %120 {offsets = [0, 0], sizes = [32, 384], strides = [1, 1]} : vector<128x384xf32> to vector<32x384xf32>
    %122 = arith.negf %121 : vector<32x384xf32>
    %123 = math.exp %122 : vector<32x384xf32>
    %cst_93 = arith.constant 1.000000e+00 : f32
    %124 = vector.broadcast %cst_93 : f32 to vector<32x384xf32>
    %125 = arith.addf %124, %123 : vector<32x384xf32>
    %126 = arith.divf %124, %125 : vector<32x384xf32>
    %127 = vector.extract_strided_slice %120 {offsets = [32, 0], sizes = [32, 384], strides = [1, 1]} : vector<128x384xf32> to vector<32x384xf32>
    %128 = arith.negf %127 : vector<32x384xf32>
    %129 = math.exp %128 : vector<32x384xf32>
    %cst_94 = arith.constant 1.000000e+00 : f32
    %130 = vector.broadcast %cst_94 : f32 to vector<32x384xf32>
    %131 = arith.addf %130, %129 : vector<32x384xf32>
    %132 = arith.divf %130, %131 : vector<32x384xf32>
    %133 = vector.extract_strided_slice %120 {offsets = [64, 0], sizes = [32, 384], strides = [1, 1]} : vector<128x384xf32> to vector<32x384xf32>
    %134 = math.tanh %133 : vector<32x384xf32>
    %135 = vector.extract_strided_slice %120 {offsets = [96, 0], sizes = [32, 384], strides = [1, 1]} : vector<128x384xf32> to vector<32x384xf32>
    %136 = arith.negf %135 : vector<32x384xf32>
    %137 = math.exp %136 : vector<32x384xf32>
    %cst_95 = arith.constant 1.000000e+00 : f32
    %138 = vector.broadcast %cst_95 : f32 to vector<32x384xf32>
    %139 = arith.addf %138, %137 : vector<32x384xf32>
    %140 = arith.divf %138, %139 : vector<32x384xf32>
    %c1_96 = arith.constant 1 : index
    %c0_97 = arith.constant 0 : index
    %c0_98 = arith.constant 0 : index
    %141 = vector.load %arg3[%c1_96, %c0_97, %c0_98] : memref<2x32x384xf32, #tpu.memory_space<vmem>>, vector<1x32x384xf32>
    %142 = vector.shape_cast %141 : vector<1x32x384xf32> to vector<32x384xf32>
    %143 = arith.mulf %132, %142 : vector<32x384xf32>
    %144 = arith.mulf %126, %134 : vector<32x384xf32>
    %145 = arith.addf %143, %144 : vector<32x384xf32>
    %146 = math.tanh %145 : vector<32x384xf32>
    %147 = arith.mulf %140, %146 : vector<32x384xf32>
    %cst_99 = arith.constant 0.000000e+00 : f32
    %148 = vector.broadcast %cst_99 : f32 to vector<32x384xf32>
    %149 = arith.select %81, %145, %148 : vector<32x384xi1>, vector<32x384xf32>
    %cst_100 = arith.constant 0.000000e+00 : f32
    %150 = vector.broadcast %cst_100 : f32 to vector<32x384xf32>
    %151 = arith.select %81, %147, %150 : vector<32x384xi1>, vector<32x384xf32>
    %c1_101 = arith.constant 1 : index
    %c0_102 = arith.constant 0 : index
    %c0_103 = arith.constant 0 : index
    %152 = vector.load %arg7[%c1_101, %c0_102, %c0_103] : memref<2x32x384xf32, #tpu.memory_space<vmem>>, vector<1x32x384xf32>
    %153 = vector.shape_cast %152 : vector<1x32x384xf32> to vector<32x384xf32>
    %154 = vector.shape_cast %149 : vector<32x384xf32> to vector<1x32x384xf32>
    tpu.vector_store %arg7[%c1_101, %c0_102, %c0_103], %154 {strides = array<i32>} : memref<2x32x384xf32, #tpu.memory_space<vmem>>, vector<1x32x384xf32>,
    %c1_104 = arith.constant 1 : index
    %c0_105 = arith.constant 0 : index
    %c0_106 = arith.constant 0 : index
    %155 = vector.load %arg6[%c1_104, %c0_105, %c0_106] : memref<2x32x384xf32, #tpu.memory_space<vmem>>, vector<1x32x384xf32>
    %156 = vector.shape_cast %155 : vector<1x32x384xf32> to vector<32x384xf32>
    %157 = vector.shape_cast %151 : vector<32x384xf32> to vector<1x32x384xf32>
    tpu.vector_store %arg6[%c1_104, %c0_105, %c0_106], %157 {strides = array<i32>} : memref<2x32x384xf32, #tpu.memory_space<vmem>>, vector<1x32x384xf32>,
    return
  }
  func.func @transform_0(%arg0: i32) -> (i32, i32, i32) {
    %c0_i32 = arith.constant 0 : i32
    %c0_i32_0 = arith.constant 0 : i32
    %c0_i32_1 = arith.constant 0 : i32
    %c0_i32_2 = arith.constant 0 : i32
    return %c0_i32, %c0_i32_0, %c0_i32_1 : i32, i32, i32
  }
  func.func @transform_1(%arg0: i32) -> (i32, i32, i32) {
    %c0_i32 = arith.constant 0 : i32
    %c0_i32_0 = arith.constant 0 : i32
    %c0_i32_1 = arith.constant 0 : i32
    %c0_i32_2 = arith.constant 0 : i32
    return %c0_i32, %c0_i32_0, %c0_i32_1 : i32, i32, i32
  }
  func.func @transform_2(%arg0: i32) -> (i32, i32, i32) {
    %c0_i32 = arith.constant 0 : i32
    %c0_i32_0 = arith.constant 0 : i32
    %c0_i32_1 = arith.constant 0 : i32
    %c0_i32_2 = arith.constant 0 : i32
    return %c0_i32, %c0_i32_0, %c0_i32_1 : i32, i32, i32
  }
  func.func @transform_3(%arg0: i32) -> (i32, i32) {
    %c0_i32 = arith.constant 0 : i32
    %c0_i32_0 = arith.constant 0 : i32
    %c0_i32_1 = arith.constant 0 : i32
    return %c0_i32, %c0_i32_0 : i32, i32
  }
  func.func @transform_4(%arg0: i32) -> (i32, i32) {
    %c0_i32 = arith.constant 0 : i32
    %c0_i32_0 = arith.constant 0 : i32
    %c0_i32_1 = arith.constant 0 : i32
    return %c0_i32, %c0_i32_0 : i32, i32
  }
  func.func @transform_5(%arg0: i32) -> (i32, i32, i32) {
    %c0_i32 = arith.constant 0 : i32
    %c0_i32_0 = arith.constant 0 : i32
    %c0_i32_1 = arith.constant 0 : i32
    %c0_i32_2 = arith.constant 0 : i32
    return %c0_i32, %c0_i32_0, %c0_i32_1 : i32, i32, i32
  }
  func.func @transform_6(%arg0: i32) -> (i32, i32, i32) {
    %c0_i32 = arith.constant 0 : i32
    %c0_i32_0 = arith.constant 0 : i32
    %c0_i32_1 = arith.constant 0 : i32
    %c0_i32_2 = arith.constant 0 : i32
    return %c0_i32, %c0_i32_0, %c0_i32_1 : i32, i32, i32
  }
}

</mosaic_0001>

<bundles_post_ra>
// kernel: tpu_custom_call.1
= control target key start
LH: loop header
LB: loop body
LE: loop exit
PB: predicated region body
PF: predicated region fallthrough
CT: control target
= control target key end

     0   :  { %12 = vsyncpa [#allocation5], 0  ;;  %s9036_s0 = inlined_call_operand.vmem [shape: f32[2,8,384], index: 0, kind: input, shape index: {}]   ;;  %s9037_s1 = inlined_call_operand.vmem [shape: f32[2,32,384], index: 1, kind: input, shape index: {}]   ;;  %s9038_s2 = inlined_call_operand.hbm [shape: f32[2,32,384], index: 2, kind: input, shape index: {}, may-alias: {2,6}]   ;;  %s9039_s3 = inlined_call_operand.vmem [shape: f32[128,360], index: 3, kind: input, shape index: {}]   ;;  %s9040_s4 = inlined_call_operand.vmem [shape: f32[128,1], index: 4, kind: input, shape index: {}]   ;;  %s9041_s5 = inlined_call_operand.hbm [shape: f32[2,32,384], index: 5, kind: output, shape index: {0}]   ;;  %s9042_s6 = inlined_call_operand.hbm [shape: f32[2,32,384], index: 6, kind: output, shape index: {1}, may-alias: {2,6}]  }
   0x1   :  { %13 = vsyncpa [#allocation6], 0 }
   0x2   :  { %14 = vsyncpa [#allocation9], 0  ;;  %s6310_s21 = smov [#allocation4]   ;;  %s6238_s25 = scalar_lea.hbm %s9038_s2, 3072 }
   0x3   :  { %s24_s22 = sshll.u32 %s6310_s21, 4  ;;  %p6239_p0 = scmp.ne.s32.totalorder %s9038_s2, %s6238_s25  ;;  %s25_s22 = int_to_ptr.vmem [resolvable:$true] %s24_s22 }
   0x4   :  { %p6242_p1 = scmp.lt.u32.totalorder %s6238_s25, %s9038_s2 }
   0x6   :  { %p6244_p2 = pnand %p6242_p1, %p6239_p0 }
   0x8   :  { %6247 = shalt.err (!%p6244_p2)
}
   0x9   :  { %s6248_s30 = scalar_lea.vmem %s25_s22, 3072  ;;  %p6253_p4 = scmp.lt.s32.totalorder %s25_s22, %s25_s22 }
   0xa   :  { %p6249_p3 = scmp.ne.s32.totalorder %s25_s22, %s6248_s30  ;;  %p6254_p5 = scmp.lt.s32.totalorder %s6248_s30, %s6248_s30 }
   0xc   :  { %p6255_p6 = por %p6254_p5, %p6253_p4 }
   0xe   :  { %p6256_p7 = pnand %p6255_p6, %p6249_p3 }
  0x10   :  { %6259 = shalt.err (!%p6256_p7)
}
  0x11   :  { %s6311_s7 = smov 384   ;;  %s6312_s8 = smov 24  }
  0x12   :  { %30 = dma.hbm_to_vmem [thread:$0]  %s9038_s2, 3072, %s25_s22, [#allocation5], %s6311_s7, %s6311_s7, %s6312_s8  }
  0x13   :  { %6304 = dma.done.wait [#allocation5], 3072  }
  0x14   :  { %6305 = vsyncadd [#allocation5], 4294964224  ;;  %v9043_v0 = vmov 0.0   ;;  %v6378_v1 = vld [vmem:[%s9037_s1] sm:$0xff]  ;;  %v6388_v3 = vld [vmem:[%s9037_s1 + $0x8] sm:$0xff]  ;;  %s6314_s22 = smov 25  }
  0x15   :  { %2875 = vmatprep.mubr.f32.mxu0 %v9043_v0  ;;  %v6383_v2 = vld [vmem:[%s9036_s0] sm:$0xff]  ;;  %v6392_v4 = vpack.i.bf16 %v6378_v1, %v9043_v0  ;;  %v6401_v6 = vld [vmem:[%s9037_s1 + $0x10] sm:$0xff]  ;;  %v6406_v7 = vld [vmem:[%s9036_s0 + $0x8] sm:$0xff]  ;;  %v5230_v53 = vpack.i.bf16 %v9043_v0, %v6388_v3  ;;  %s6316_s27 = smov 1   ;;  %s6317_s28 = smov 105   ;;  %vm200_vm0 = vcmask 203776  }
  0x16   :  { %v6396_v5 = vpack.i.bf16 %v6383_v2, %v9043_v0  ;;  %9123 = vst [vmem:[#allocation13_spill] sm:$0xff] %v6406_v7  ;;  %v6411_v8 = vld [vmem:[%s9036_s0 + $0x10] sm:$0xff]  ;;  %v6419_v9 = vpack.i.bf16 %v6401_v6, %v6388_v3  ;;  %v6428_v11 = vld [vmem:[%s9037_s1 + $0x20] sm:$0xff]  ;;  %v6433_v12 = vld [vmem:[%s9037_s1 + $0x28] sm:$0xff]  ;;  %v5225_v51 = vpack.i.bf16 %v6378_v1, %v6406_v7  ;;  %v5255_v55 = vpack.i.bf16 %v6406_v7, %v6383_v2  ;;  %s6318_s29 = smov 104   ;;  %s6319_s30 = smov 127  }
  0x17   :  { %5031 = vrot.lane.b32.xlu1 %v6392_v4, %s6314_s22  ;;  %v6423_v10 = vpack.i.bf16 %v6411_v8, %v6406_v7  ;;  %v6438_v13 = vld [vmem:[%s9037_s1 + $0x18] sm:$0xff]  ;;  %v6446_v14 = vpack.i.bf16 %v6433_v12, %v6428_v11  ;;  %v6458_v17 = vld [vmem:[%s9037_s1 + $0x40] sm:$0xff]  ;;  %v6463_v18 = vld [vmem:[%s9037_s1 + $0x30] sm:$0xff]  ;;  %v5275_v57 = vpack.i.bf16 %v9043_v0, %v6428_v11  ;;  %s6320_s9 = smov 103   ;;  %vm451_vm1 = vcmask 195584  }
  0x18   :  { %5021 = vrot.lane.b32.xlu0 %v6396_v5, %s6314_s22  ;;  %v5040_v15 = vpack.i.bf16 %v6438_v13, %v9043_v0  ;;  %v6453_v16 = vld [vmem:[%s9037_s1 + $0x38] sm:$0xff]  ;;  %v6474_v20 = vpack.i.bf16 %v6463_v18, %v9043_v0  ;;  %v6479_v21 = vld [vmem:[%s9037_s1 + $0x50] sm:$0xff]  ;;  %v6489_v23 = vld [vmem:[%s9037_s1 + $0x48] sm:$0xff]  ;;  %v5235_v52 = vpack.i.bf16 %v6428_v11, %v6438_v13  ;;  %v5270_v58 = vpack.i.bf16 %v6438_v13, %v6388_v3 }
  0x19   :  { %9124 = vst [vmem:[#allocation14_spill] sm:$0xff] %v6453_v16  ;;  %v6470_v19 = vpack.i.bf16 %v6458_v17, %v6453_v16  ;;  %v6484_v22 = vld [vmem:[%s9037_s1 + $0x58] sm:$0xff]  ;;  %v5060_v25 = vpack.i.bf16 %v6489_v23, %v9043_v0  ;;  %v6504_v26 = vld [vmem:[%s9036_s0 + $0x20] sm:$0xff]  ;;  %v6509_v27 = vld [vmem:[%s9036_s0 + $0x28] sm:$0xff]  ;;  %v5240_v54 = vpack.i.bf16 %v6453_v16, %v6463_v18  ;;  %v5250_v56 = vpack.i.bf16 %v6479_v21, %v6489_v23 }
  0x1a   :  { %v6497_v24 = vpack.i.bf16 %v6484_v22, %v6479_v21  ;;  %v6514_v28 = vld [vmem:[%s9036_s0 + $0x18] sm:$0xff]  ;;  %v6521_v29 = vpack.i.bf16 %v6509_v27, %v6504_v26  ;;  %v6528_v31 = vld [vmem:[%s9037_s1 + $0x68] sm:$0xff]  ;;  %v6533_v32 = vld [vmem:[%s9037_s1 + $0x70] sm:$0xff]  ;;  %v5285_v59 = vpack.i.bf16 %v6489_v23, %v6453_v16  ;;  %v5290_v60 = vpack.i.bf16 %v9043_v0, %v6479_v21 }
  0x1b   :  { %5036 = vrot.lane.b32.xlu1 %v6419_v9, %s6314_s22  ;;  %v5070_v30 = vpack.i.bf16 %v6514_v28, %v9043_v0  ;;  %v6538_v33 = vld [vmem:[%s9037_s1 + $0x60] sm:$0xff]  ;;  %v6545_v34 = vpack.i.bf16 %v6533_v32, %v6528_v31  ;;  %v6559_v37 = vld [vmem:[%s9037_s1 + $0x88] sm:$0xff]  ;;  %v6564_v38 = vld [vmem:[%s9037_s1 + $0x78] sm:$0xff]  ;;  %v6721_v61 = vpack.i.bf16 %v6463_v18, %v6438_v13  ;;  %vm702_vm2 = vcmask 187392  }
  0x1c   :  { %5026 = vrot.lane.b32.xlu0 %v6423_v10, %s6314_s22  ;;  %v6549_v35 = vpack.i.bf16 %v6538_v33, %v9043_v0  ;;  %v6554_v36 = vld [vmem:[%s9037_s1 + $0x80] sm:$0xff]  ;;  %v6576_v40 = vpack.i.bf16 %v6564_v38, %v9043_v0  ;;  %v6581_v41 = vld [vmem:[%s9037_s1 + $0x98] sm:$0xff]  ;;  %v6591_v43 = vld [vmem:[%s9037_s1 + $0x90] sm:$0xff]  ;;  %vm953_vm3 = vcmask 7168   ;;  %vm1515_vm4 = vcmask 859136  }
  0x1d   :  { %v6572_v39 = vpack.i.bf16 %v6559_v37, %v6554_v36  ;;  %v6586_v42 = vld [vmem:[%s9037_s1 + $0xa0] sm:$0xff]  ;;  %v6603_v45 = vpack.i.bf16 %v6591_v43, %v9043_v0  ;;  %v6608_v46 = vld [vmem:[%s9037_s1 + $0xb0] sm:$0xff]  ;;  %v6613_v47 = vld [vmem:[%s9037_s1 + $0xb8] sm:$0xff]  ;;  %vm1766_vm5 = vcmask 850944   ;;  %vm1264_vm6 = vcmask 1039360  }
  0x1e   :  { %v6599_v44 = vpack.i.bf16 %v6586_v42, %v6581_v41  ;;  %v6618_v48 = vld [vmem:[%s9037_s1 + $0xa8] sm:$0xff]  ;;  %v6626_v49 = vpack.i.bf16 %v6613_v47, %v6608_v46  ;;  %vm2017_vm7 = vcmask 842752  }
  0x1f   :  { %5046 = vrot.lane.b32.xlu1 %v6446_v14, %s6314_s22  ;;  %v6630_v50 = vpack.i.bf16 %v6618_v48, %v9043_v0 }
  0x20   :  { %5041 = vrot.lane.b32.xlu0 %v5040_v15, %s6314_s22 }
  0x23   :  { %5056 = vrot.lane.b32.xlu1 %v6470_v19, %s6314_s22 }
  0x24   :  { %5051 = vrot.lane.b32.xlu0 %v6474_v20, %s6314_s22 }
  0x27   :  { %5066 = vrot.lane.b32.xlu1 %v6497_v24, %s6314_s22 }
  0x28   :  { %5061 = vrot.lane.b32.xlu0 %v5060_v25, %s6314_s22 }
  0x2b   :  { %5076 = vrot.lane.b32.xlu1 %v6521_v29, %s6314_s22 }
  0x2c   :  { %5071 = vrot.lane.b32.xlu0 %v5070_v30, %s6314_s22 }
  0x2f   :  { %5086 = vrot.lane.b32.xlu1 %v6545_v34, %s6314_s22 }
  0x30   :  { %5081 = vrot.lane.b32.xlu0 %v6549_v35, %s6314_s22 }
  0x33   :  { %5096 = vrot.lane.b32.xlu1 %v6572_v39, %s6314_s22 }
  0x34   :  { %5091 = vrot.lane.b32.xlu0 %v6576_v40, %s6314_s22 }
  0x37   :  { %5106 = vrot.lane.b32.xlu1 %v6599_v44, %s6314_s22 }
  0x38   :  { %5101 = vrot.lane.b32.xlu0 %v6603_v45, %s6314_s22 }
  0x3b   :  { %5116 = vrot.lane.b32.xlu1 %v6626_v49, %s6314_s22 }
  0x3c   :  { %5111 = vrot.lane.b32.xlu0 %v6630_v50, %s6314_s22  ;;  %s6315_s22 = smov 23  }
  0x3f   :  { %5126 = vrot.lane.b32.xlu1 %v6423_v10, %s6312_s8 }
  0x40   :  { %5121 = vrot.lane.b32.xlu0 %v6396_v5, %s6312_s8 }
  0x43   :  { %5136 = vrot.lane.b32.xlu1 %v6419_v9, %s6312_s8 }
  0x44   :  { %5131 = vrot.lane.b32.xlu0 %v6392_v4, %s6312_s8 }
  0x47   :  { %5146 = vrot.lane.b32.xlu1 %v6446_v14, %s6312_s8 }
  0x48   :  { %5141 = vrot.lane.b32.xlu0 %v5040_v15, %s6312_s8 }
  0x4b   :  { %5156 = vrot.lane.b32.xlu1 %v6470_v19, %s6312_s8 }
  0x4c   :  { %5151 = vrot.lane.b32.xlu0 %v6474_v20, %s6312_s8 }
  0x4f   :  { %5166 = vrot.lane.b32.xlu1 %v6497_v24, %s6312_s8 }
  0x50   :  { %5161 = vrot.lane.b32.xlu0 %v5060_v25, %s6312_s8 }
  0x53   :  { %5176 = vrot.lane.b32.xlu1 %v6521_v29, %s6312_s8 }
  0x54   :  { %5171 = vrot.lane.b32.xlu0 %v5070_v30, %s6312_s8 }
  0x57   :  { %5186 = vrot.lane.b32.xlu1 %v6545_v34, %s6312_s8 }
  0x58   :  { %5181 = vrot.lane.b32.xlu0 %v6549_v35, %s6312_s8 }
  0x5b   :  { %5196 = vrot.lane.b32.xlu1 %v6572_v39, %s6312_s8 }
  0x5c   :  { %5191 = vrot.lane.b32.xlu0 %v6576_v40, %s6312_s8 }
  0x5f   :  { %5206 = vrot.lane.b32.xlu1 %v6599_v44, %s6312_s8 }
  0x60   :  { %5201 = vrot.lane.b32.xlu0 %v6603_v45, %s6312_s8 }
  0x63   :  { %5216 = vrot.lane.b32.xlu1 %v6626_v49, %s6312_s8 }
  0x64   :  { %5211 = vrot.lane.b32.xlu0 %v6630_v50, %s6312_s8 }
  0x67   :  { %5226 = vrot.lane.b32.xlu1 %v5225_v51, %s6315_s22 }
  0x68   :  { %5221 = vrot.lane.b32.xlu0 %v6396_v5, %s6315_s22 }
  0x6b   :  { %5236 = vrot.lane.b32.xlu1 %v5235_v52, %s6315_s22  ;;  %v6731_v52 = vpack.i.bf16 %v6428_v11, %v6401_v6 }
  0x6c   :  { %5231 = vrot.lane.b32.xlu0 %v5230_v53, %s6315_s22 }
  0x6f   :  { %5246 = vrot.lane.b32.xlu1 %v9043_v0, %s6315_s22 }
  0x70   :  { %5241 = vrot.lane.b32.xlu0 %v5240_v54, %s6315_s22 }
  0x73   :  { %5256 = vrot.lane.b32.xlu1 %v5255_v55, %s6316_s27 }
  0x74   :  { %5251 = vrot.lane.b32.xlu0 %v5250_v56, %s6315_s22 }
  0x77   :  { %5266 = vrot.lane.b32.xlu1 %v6392_v4, %s6316_s27  ;;  %v5325_v4 = vpack.i.bf16 %v6406_v7, %v6489_v23 }
  0x78   :  { %5261 = vrot.lane.b32.xlu0 %v9043_v0, %s6315_s22 }
  0x7b   :  { %5276 = vrot.lane.b32.xlu1 %v5275_v57, %s6316_s27 }
  0x7c   :  { %5271 = vrot.lane.b32.xlu0 %v5270_v58, %s6316_s27 }
  0x7f   :  { %5286 = vrot.lane.b32.xlu1 %v5285_v59, %s6316_s27 }
  0x80   :  { %5281 = vrot.lane.b32.xlu0 %v6474_v20, %s6316_s27 }
  0x83   :  { %5296 = vrot.lane.b32.xlu1 %v9043_v0, %s6316_s27 }
  0x84   :  { %5291 = vrot.lane.b32.xlu0 %v5290_v60, %s6316_s27 }
  0x87   :  { %5306 = vrot.lane.b32.xlu1 %v6470_v19, %s6317_s28 }
  0x88   :  { %5301 = vrot.lane.b32.xlu0 %v6446_v14, %s6317_s28 }
  0x89   :  { %v5032_v62 = vpop.permute.xlu1 %5031 }
  0x8a   :  { %v5022_v63 = vpop.permute.xlu0 %5021  ;;  %v5034_v5 = vunpack.i.h.bf16 %v5032_v62  ;;  %v5033_v15 = vunpack.i.l.bf16 %v5032_v62 }
  0x8b   :  { %v5024_v20 = vunpack.i.h.bf16 %v5022_v63  ;;  %v5023_v25 = vunpack.i.l.bf16 %v5022_v63  ;;  %5316 = vrot.lane.b32.xlu1 %v6497_v24, %s6317_s28  ;;  %v5330_v24 = vpack.i.bf16 %v6388_v3, %v6383_v2 }
  0x8c   :  { %5311 = vrot.lane.b32.xlu0 %v6721_v61, %s6317_s28  ;;  %v204_v58 = vsel %vm200_vm0, %v5033_v15, %v5034_v5 }
  0x8d   :  { %v5037_v30 = vpop.permute.xlu1 %5036  ;;  %v201_v57 = vsel %vm200_vm0, %v5023_v25, %v5024_v20 }
  0x8e   :  { %v5027_v51 = vpop.permute.xlu0 %5026  ;;  %v5039_v53 = vunpack.i.h.bf16 %v5037_v30  ;;  %v5038_v54 = vunpack.i.l.bf16 %v5037_v30  ;;  %v4546_v15 = vpack.c.bf16 %v204_v58, %v201_v57 }
  0x8f   :  { %v5029_v55 = vunpack.i.h.bf16 %v5027_v51  ;;  %v5028_v56 = vunpack.i.l.bf16 %v5027_v51  ;;  %5326 = vrot.lane.b32.xlu1 %v5325_v4, %s6317_s28 }
  0x90   :  { %5321 = vrot.lane.b32.xlu0 %v6423_v10, %s6318_s29  ;;  %v6741_v11 = vsel %vm200_vm0, %v5038_v54, %v5039_v53  ;;  %v205_v62 = vsel %vm200_vm0, %v5034_v5, %v5038_v54  ;;  %v5340_v5 = vpack.i.bf16 %v6378_v1, %v6433_v12 }
  0x91   :  { %9125 = vst [vmem:[#allocation15_spill] sm:$0xff] %v6741_v11  ;;  %v6744_v59 = vsel %vm200_vm0, %v5028_v56, %v5029_v55  ;;  %v202_v60 = vsel %vm200_vm0, %v5024_v20, %v5028_v56  ;;  %v5047_v63 = vpop.permute.xlu1 %5046  ;;  %v5345_v20 = vpack.i.bf16 %v6453_v16, %v6438_v13 }
  0x92   :  { %9126 = vst [vmem:[#allocation16_spill] sm:$0xff] %v6744_v59  ;;  %v5042_v4 = vpop.permute.xlu0 %5041  ;;  %v4544_v30 = vpack.c.bf16 %v205_v62, %v202_v60  ;;  %v5049_v0 = vunpack.i.h.bf16 %v5047_v63  ;;  %v5048_v25 = vunpack.i.l.bf16 %v5047_v63 }
  0x93   :  { %v5044_v7 = vunpack.i.h.bf16 %v5042_v4  ;;  %5336 = vrot.lane.b32.xlu1 %v6731_v52, %s6318_s29  ;;  %v5043_v54 = vunpack.i.l.bf16 %v5042_v4 }
  0x94   :  { %5331 = vrot.lane.b32.xlu0 %v5330_v24, %s6318_s29  ;;  %v6758_v53 = vsel %vm200_vm0, %v5048_v25, %v5049_v0  ;;  %4545 = vmatprep.subr.bf16.mxu1 %v4544_v30 }
  0x95   :  { %9127 = vst [vmem:[#allocation17_spill] sm:$0xff] %v6758_v53  ;;  %4547 = vmatpush1.bf16.msra.mxu1 %v4546_v15  ;;  %v5057_v55 = vpop.permute.xlu1 %5056  ;;  %v208_v13 = vsel %vm200_vm0, %v5044_v7, %v5048_v25  ;;  %v207_v58 = vsel %vm200_vm0, %v5043_v54, %v5044_v7  ;;  %v5365_v7 = vpack.i.bf16 %v6463_v18, %v6484_v22 }
  0x96   :  { %v5052_v56 = vpop.permute.xlu0 %5051  ;;  %v5059_v60 = vunpack.i.h.bf16 %v5057_v55  ;;  %v5058_v62 = vunpack.i.l.bf16 %v5057_v55 }
  0x97   :  { %v5054_v63 = vunpack.i.h.bf16 %v5052_v56  ;;  %v5053_v51 = vunpack.i.l.bf16 %v5052_v56  ;;  %5346 = vrot.lane.b32.xlu1 %v5345_v20, %s6318_s29 }
  0x98   :  { %5341 = vrot.lane.b32.xlu0 %v5340_v5, %s6318_s29  ;;  %v6764_v57 = vsel %vm200_vm0, %v5058_v62, %v5059_v60 }
  0x99   :  { %9128 = vst [vmem:[#allocation18_spill] sm:$0xff] %v6764_v57  ;;  %v211_v0 = vsel %vm200_vm0, %v5054_v63, %v5058_v62  ;;  %v210_v4 = vsel %vm200_vm0, %v5053_v51, %v5054_v63  ;;  %v5067_v30 = vpop.permute.xlu1 %5066  ;;  %v5360_v51 = vpack.i.bf16 %v6479_v21, %v6458_v17 }
  0x9a   :  { %v5062_v15 = vpop.permute.xlu0 %5061  ;;  %v4548_v55 = vpack.c.bf16 %v211_v0, %v208_v13  ;;  %v4550_v59 = vpack.c.bf16 %v210_v4, %v207_v58  ;;  %v5069_v11 = vunpack.i.h.bf16 %v5067_v30  ;;  %v5068_v16 = vunpack.i.l.bf16 %v5067_v30 }
  0x9b   :  { %5356 = vrot.lane.b32.xlu1 %v5330_v24, %s6319_s30  ;;  %v5063_v58 = vunpack.i.l.bf16 %v5062_v15 }
  0x9c   :  { %5351 = vrot.lane.b32.xlu0 %v6423_v10, %s6319_s30  ;;  %v6779_v25 = vsel %vm200_vm0, %v5068_v16, %v5069_v11  ;;  %4549 = vmatprep.subr.bf16.mxu1 %v4548_v55 }
  0x9d   :  { %4551 = vmatpush1.bf16.msra.mxu1 %v4550_v59  ;;  %v6781_v54 = vpop.permute.xlu1 %5076 }
  0x9e   :  { %v6783_v60 = vpop.permute.xlu0 %5071 }
  0x9f   :  { %5366 = vrot.lane.b32.xlu1 %v5365_v7, %s6318_s29 }
  0xa0   :  { %5361 = vrot.lane.b32.xlu0 %v5360_v51, %s6318_s29 }
  0xa1   :  { %v6787_v24 = vpop.permute.xlu1 %5086 }
  0xa2   :  { %v6789_v62 = vpop.permute.xlu0 %5081 }
  0xa3   :  { %5371 = vrot.lane.b32.xlu1 %v6731_v52, %s6319_s30  ;;  %v5395_v52 = vpack.i.bf16 %v6378_v1, %v6383_v2 }
  0xa4   :  { %1758 = vrot.lane.b32.xlu0 %v6489_v23, %s6318_s29 }
  0xa5   :  { %v6795_v18 = vpop.permute.xlu1 %5096 }
  0xa6   :  { %9129 = vst [vmem:[#allocation19_spill] sm:$0xff] %v6795_v18  ;;  %v6797_v11 = vpop.permute.xlu0 %5091 }
  0xa7   :  { %9130 = vst [vmem:[#allocation20_spill] sm:$0xff] %v6797_v11  ;;  %5381 = vrot.lane.b32.xlu1 %v5345_v20, %s6319_s30  ;;  %v5064_v20 = vunpack.i.h.bf16 %v5062_v15 }
  0xa8   :  { %5376 = vrot.lane.b32.xlu0 %v5340_v5, %s6319_s30  ;;  %v5410_v5 = vpack.i.bf16 %v6514_v28, %v6489_v23 }
  0xa9   :  { %v6801_v59 = vpop.permute.xlu1 %5106  ;;  %v214_v53 = vsel %vm200_vm0, %v5064_v20, %v5068_v16  ;;  %v213_v15 = vsel %vm200_vm0, %v5063_v58, %v5064_v20  ;;  %v5430_v16 = vpack.i.bf16 %v6388_v3, %v6411_v8 }
  0xaa   :  { %9131 = vst [vmem:[#allocation21_spill] sm:$0xff] %v6801_v59  ;;  %v6803_v63 = vpop.permute.xlu0 %5101 }
  0xab   :  { %9132 = vst [vmem:[#allocation22_spill] sm:$0xff] %v6803_v63  ;;  %5391 = vrot.lane.b32.xlu1 %v6419_v9, %s6320_s9 }
  0xac   :  { %5386 = vrot.lane.b32.xlu0 %v6423_v10, %s6320_s9 }
  0xad   :  { %v6811_v13 = vpop.permute.xlu1 %5116 }
  0xae   :  { %v6813_v0 = vpop.permute.xlu0 %5111 }
  0xaf   :  { %5401 = vrot.lane.b32.xlu1 %v5360_v51, %s6319_s30 }
  0xb0   :  { %5396 = vrot.lane.b32.xlu0 %v5395_v52, %s6320_s9 }
  0xb1   :  { %v5127_v9 = vpop.permute.xlu1 %5126 }
  0xb2   :  { %v5122_v4 = vpop.permute.xlu0 %5121  ;;  %v5129_v10 = vunpack.i.h.bf16 %v5127_v9  ;;  %v5128_v30 = vunpack.i.l.bf16 %v5127_v9 }
  0xb3   :  { %v5124_v55 = vunpack.i.h.bf16 %v5122_v4  ;;  %v5123_v56 = vunpack.i.l.bf16 %v5122_v4  ;;  %5411 = vrot.lane.b32.xlu1 %v5410_v5, %s6319_s30 }
  0xb4   :  { %5406 = vrot.lane.b32.xlu0 %v5365_v7, %s6319_s30  ;;  %v6823_v51 = vsel %vm451_vm1, %v5128_v30, %v5129_v10 }
  0xb5   :  { %v453_v52 = vsel %vm451_vm1, %v5124_v55, %v5128_v30  ;;  %v452_v57 = vsel %vm451_vm1, %v5123_v56, %v5124_v55  ;;  %v5137_v18 = vpop.permute.xlu1 %5136 }
  0xb6   :  { %v5132_v59 = vpop.permute.xlu0 %5131  ;;  %v4552_v9 = vpack.c.bf16 %v453_v52, %v214_v53  ;;  %v4554_v11 = vpack.c.bf16 %v452_v57, %v213_v15  ;;  %v5139_v4 = vunpack.i.h.bf16 %v5137_v18  ;;  %v5138_v7 = vunpack.i.l.bf16 %v5137_v18 }
  0xb7   :  { %v5134_v63 = vunpack.i.h.bf16 %v5132_v59  ;;  %5421 = vrot.lane.b32.xlu1 %v6470_v19, %s6320_s9  ;;  %v5133_v53 = vunpack.i.l.bf16 %v5132_v59  ;;  %v2189_v19 = vld [vmem:[%s9039_s3 + $0x8] sm:$0xff] }
  0xb8   :  { %5416 = vrot.lane.b32.xlu0 %v6446_v14, %s6320_s9  ;;  %v6837_v56 = vsel %vm451_vm1, %v5138_v7, %v5139_v4  ;;  %4553 = vmatprep.subr.bf16.mxu1 %v4552_v9  ;;  %v5440_v14 = vpack.i.bf16 %v6514_v28, %v6378_v1 }
  0xb9   :  { %9133 = vst [vmem:[#allocation23_spill] sm:$0xff] %v6837_v56  ;;  %4555 = vmatpush1.bf16.msra.mxu1 %v4554_v11  ;;  %v5147_v57 = vpop.permute.xlu1 %5146  ;;  %v5435_v11 = vpack.i.bf16 %v6383_v2, %v6401_v6  ;;  %v456_v59 = vsel %vm451_vm1, %v5134_v63, %v5138_v7  ;;  %v455_v15 = vsel %vm451_vm1, %v5133_v53, %v5134_v63  ;;  %v5119_v53 = vunpack.i.h.bf16 %v6811_v13 }
  0xba   :  { %v5142_v20 = vpop.permute.xlu0 %5141  ;;  %v5149_v58 = vunpack.i.h.bf16 %v5147_v57  ;;  %v5148_v18 = vunpack.i.l.bf16 %v5147_v57  ;;  %2714 = vmatprep.mubr.f32.mxu1 %v2189_v19 }
  0xbb   :  { %v5144_v10 = vunpack.i.h.bf16 %v5142_v20  ;;  %v5143_v30 = vunpack.i.l.bf16 %v5142_v20  ;;  %5431 = vrot.lane.b32.xlu1 %v5430_v16, %s6317_s28 }
  0xbc   :  { %5426 = vrot.lane.b32.xlu0 %v6721_v61, %s6320_s9  ;;  %v6851_v55 = vsel %vm451_vm1, %v5148_v18, %v5149_v58 }
  0xbd   :  { %9134 = vst [vmem:[#allocation24_spill] sm:$0xff] %v6851_v55  ;;  %v459_v52 = vsel %vm451_vm1, %v5144_v10, %v5148_v18  ;;  %v458_v9 = vsel %vm451_vm1, %v5143_v30, %v5144_v10  ;;  %v5157_v4 = vpop.permute.xlu1 %5156  ;;  %v6866_v30 = vpack.i.bf16 %v6504_v26, %v6514_v28 }
  0xbe   :  { %v5152_v61 = vpop.permute.xlu0 %5151  ;;  %v4556_v16 = vpack.c.bf16 %v459_v52, %v456_v59  ;;  %v4558_v57 = vpack.c.bf16 %v458_v9, %v455_v15  ;;  %v5159_v2 = vunpack.i.h.bf16 %v5157_v4  ;;  %v5158_v20 = vunpack.i.l.bf16 %v5157_v4 }
  0xbf   :  { %v5154_v7 = vunpack.i.h.bf16 %v5152_v61  ;;  %5441 = vrot.lane.b32.xlu1 %v5440_v14, %s6317_s28  ;;  %v5153_v63 = vunpack.i.l.bf16 %v5152_v61  ;;  %v5114_v15 = vunpack.i.h.bf16 %v6813_v0  ;;  %v5113_v9 = vunpack.i.l.bf16 %v6813_v0 }
  0xc0   :  { %5436 = vrot.lane.b32.xlu0 %v5435_v11, %s6317_s28  ;;  %v6861_v58 = vsel %vm451_vm1, %v5158_v20, %v5159_v2  ;;  %4557 = vmatprep.subr.bf16.mxu1 %v4556_v16  ;;  %v5118_v11 = vunpack.i.l.bf16 %v6811_v13 }
  0xc1   :  { %9135 = vst [vmem:[#allocation25_spill] sm:$0xff] %v6861_v58  ;;  %4559 = vmatpush1.bf16.msra.mxu1 %v4558_v57  ;;  %v5167_v18 = vpop.permute.xlu1 %5166  ;;  %v462_v4 = vsel %vm451_vm1, %v5154_v7, %v5158_v20  ;;  %v461_v61 = vsel %vm451_vm1, %v5153_v63, %v5154_v7  ;;  %v9137_v7 = vmov 0.0  }
  0xc2   :  { %v5162_v10 = vpop.permute.xlu0 %5161  ;;  %v5169_v19 = vunpack.i.h.bf16 %v5167_v18  ;;  %v5168_v59 = vunpack.i.l.bf16 %v5167_v18  ;;  %v6884_v18 = vpack.i.bf16 %v6528_v31, %v6538_v33  ;;  %v5450_v31 = vpack.i.bf16 %v9137_v7, %v6509_v27 }
  0xc3   :  { %v5164_v52 = vunpack.i.h.bf16 %v5162_v10  ;;  %v5163_v14 = vunpack.i.l.bf16 %v5162_v10  ;;  %2013 = vrot.lane.b32.xlu1 %v6484_v22, %s6320_s9  ;;  %v6898_v33 = vsel %vm200_vm0, %v5113_v9, %v5114_v15 }
  0xc4   :  { %2011 = vrot.lane.b32.xlu0 %v6479_v21, %s6320_s9  ;;  %v6877_v26 = vsel %vm451_vm1, %v5168_v59, %v5169_v19 }
  0xc5   :  { %9136 = vst [vmem:[#allocation26_spill] sm:$0xff] %v6877_v26  ;;  %v465_v28 = vsel %vm451_vm1, %v5164_v52, %v5168_v59  ;;  %v464_v13 = vsel %vm451_vm1, %v5163_v14, %v5164_v52  ;;  %v5177_v16 = vpop.permute.xlu1 %5176  ;;  %v6889_v59 = vsel %vm200_vm0, %v5114_v15, %v5118_v11  ;;  %v6907_v14 = vsel %vm200_vm0, %v5118_v11, %v5119_v53 }
  0xc6   :  { %v5172_v57 = vpop.permute.xlu0 %5171  ;;  %v4560_v0 = vpack.c.bf16 %v465_v28, %v462_v4  ;;  %v4562_v2 = vpack.c.bf16 %v464_v13, %v461_v61  ;;  %v5179_v20 = vunpack.i.h.bf16 %v5177_v16  ;;  %v5178_v10 = vunpack.i.l.bf16 %v5177_v16 }
  0xc7   :  { %v5174_v19 = vunpack.i.h.bf16 %v5172_v57  ;;  %v5173_v1 = vunpack.i.l.bf16 %v5172_v57  ;;  %5446 = vrot.lane.b32.xlu1 %v6866_v30, %s6315_s22  ;;  %v5465_v53 = vpack.i.bf16 %v9137_v7, %v6401_v6  ;;  %v5460_v11 = vpack.i.bf16 %v6411_v8, %v6533_v32 }
  0xc8   :  { %2009 = vrot.lane.b32.xlu0 %v6489_v23, %s6320_s9  ;;  %4561 = vmatprep.subr.bf16.mxu1 %v4560_v0  ;;  %v6910_v4 = vsel %vm451_vm1, %v5178_v10, %v5179_v20  ;;  %v6937_v16 = vpack.i.bf16 %v9137_v7, %v6559_v37  ;;  %v6941_v57 = vpack.i.bf16 %v6554_v36, %v6564_v38 }
  0xc9   :  { %v6901_v63 = vsel %vm451_vm1, %v5174_v19, %v5178_v10  ;;  %v6904_v52 = vsel %vm451_vm1, %v5173_v1, %v5174_v19  ;;  %4563 = vmatpush1.bf16.msra.mxu1 %v4562_v2  ;;  %v6912_v23 = vpop.permute.xlu1 %5186  ;;  %v5485_v20 = vpack.i.bf16 %v6433_v12, %v6586_v42  ;;  %v6955_v37 = vpack.i.bf16 %v6581_v41, %v6591_v43 }
  0xca   :  { %v6914_v28 = vpop.permute.xlu0 %5181  ;;  %v6966_v38 = vpack.i.bf16 %v6608_v46, %v6618_v48  ;;  %v5490_v19 = vpack.i.bf16 %v9137_v7, %v6458_v17 }
  0xcb   :  { %5456 = vrot.lane.b32.xlu1 %v6884_v18, %s6315_s22 }
  0xcc   :  { %5451 = vrot.lane.b32.xlu0 %v5450_v31, %s6315_s22 }
  0xcd   :  { %v6929_v61 = vpop.permute.xlu1 %5196 }
  0xce   :  { %v6931_v13 = vpop.permute.xlu0 %5191 }
  0xcf   :  { %5466 = vrot.lane.b32.xlu1 %v5465_v53, %s6315_s22 }
  0xd0   :  { %5461 = vrot.lane.b32.xlu0 %v5460_v11, %s6315_s22 }
  0xd1   :  { %v6943_v0 = vpop.permute.xlu1 %5206 }
  0xd2   :  { %v6945_v2 = vpop.permute.xlu0 %5201 }
  0xd3   :  { %5476 = vrot.lane.b32.xlu1 %v6937_v16, %s6315_s22 }
  0xd4   :  { %5471 = vrot.lane.b32.xlu0 %v6941_v57, %s6315_s22 }
  0xd5   :  { %v6957_v10 = vpop.permute.xlu1 %5216 }
  0xd6   :  { %v6959_v36 = vpop.permute.xlu0 %5211 }
  0xd7   :  { %5486 = vrot.lane.b32.xlu1 %v5485_v20, %s6315_s22  ;;  %v5500_v20 = vpack.i.bf16 %v6484_v22, %v6613_v47 }
  0xd8   :  { %5481 = vrot.lane.b32.xlu0 %v6955_v37, %s6315_s22 }
  0xd9   :  { %v6970_v31 = vpop.permute.xlu1 %5226 }
  0xda   :  { %9138 = vst [vmem:[#allocation27_spill] sm:$0xff] %v6970_v31  ;;  %v5222_v41 = vpop.permute.xlu0 %5221  ;;  %v9060_v43 = vunpack.i.l.bf16 %v6970_v31  ;;  %v5229_v21 = vunpack.i.h.bf16 %v6970_v31 }
  0xdb   :  { %v5224_v53 = vunpack.i.h.bf16 %v5222_v41  ;;  %v5223_v11 = vunpack.i.l.bf16 %v5222_v41  ;;  %5496 = vrot.lane.b32.xlu1 %v6966_v38, %s6315_s22 }
  0xdc   :  { %5491 = vrot.lane.b32.xlu0 %v5490_v19, %s6315_s22  ;;  %v5510_v19 = vpack.i.bf16 %v6411_v8, %v6509_v27 }
  0xdd   :  { %v6978_v46 = vpop.permute.xlu1 %5236  ;;  %v704_v41 = vsel %vm702_vm2, %v5224_v53, %v9060_v43  ;;  %v703_v9 = vsel %vm702_vm2, %v5223_v11, %v5224_v53 }
  0xde   :  { %9139 = vst [vmem:[#allocation28_spill] sm:$0xff] %v6978_v46  ;;  %v6980_v48 = vpop.permute.xlu0 %5231  ;;  %v9061_v15 = vunpack.i.h.bf16 %v6978_v46  ;;  %v5238_v58 = vunpack.i.l.bf16 %v6978_v46 }
  0xdf   :  { %v5234_v1 = vunpack.i.h.bf16 %v6980_v48  ;;  %v9076_v5 = vunpack.i.l.bf16 %v6980_v48  ;;  %5506 = vrot.lane.b32.xlu1 %v6866_v30, %s6316_s27 }
  0xe0   :  { %5501 = vrot.lane.b32.xlu0 %v5500_v20, %s6315_s22 }
  0xe1   :  { %v707_v26 = vsel %vm702_vm2, %v5229_v21, %v9076_v5  ;;  %v706_v30 = vsel %vm702_vm2, %v5234_v1, %v5229_v21  ;;  %v5247_v20 = vpop.permute.xlu1 %5246  ;;  %v710_v21 = vsel %vm702_vm2, %v5238_v58, %v9061_v15 }
  0xe2   :  { %v7000_v56 = vpop.permute.xlu0 %5241  ;;  %v4564_v8 = vpack.c.bf16 %v707_v26, %v704_v41  ;;  %v4566_v27 = vpack.c.bf16 %v706_v30, %v703_v9  ;;  %v5249_v31 = vunpack.i.h.bf16 %v5247_v20  ;;  %v5248_v55 = vunpack.i.l.bf16 %v5247_v20 }
  0xe3   :  { %v9075_v43 = vunpack.i.h.bf16 %v7000_v56  ;;  %v5243_v53 = vunpack.i.l.bf16 %v7000_v56  ;;  %5516 = vrot.lane.b32.xlu1 %v6549_v35, %s6316_s27 }
  0xe4   :  { %5511 = vrot.lane.b32.xlu0 %v5510_v19, %s6316_s27  ;;  %4565 = vmatprep.subr.bf16.mxu1 %v4564_v8  ;;  %v709_v9 = vsel %vm702_vm2, %v5248_v55, %v5238_v58  ;;  %v5535_v55 = vpack.i.bf16 %v6433_v12, %v6401_v6 }
  0xe5   :  { %v713_v26 = vsel %vm702_vm2, %v5243_v53, %v9075_v43  ;;  %v712_v1 = vsel %vm702_vm2, %v5249_v31, %v5243_v53  ;;  %4567 = vmatpush1.bf16.msra.mxu1 %v4566_v27  ;;  %v7015_v11 = vpop.permute.xlu1 %5256 }
  0xe6   :  { %9140 = vst [vmem:[#allocation29_spill] sm:$0xff] %v7015_v11  ;;  %v7017_v41 = vpop.permute.xlu0 %5251  ;;  %v4568_v35 = vpack.c.bf16 %v713_v26, %v710_v21  ;;  %v4570_v19 = vpack.c.bf16 %v712_v1, %v709_v9  ;;  %v9073_v30 = vunpack.i.h.bf16 %v7015_v11  ;;  %v5258_v20 = vunpack.i.l.bf16 %v7015_v11 }
  0xe7   :  { %9141 = vst [vmem:[#allocation30_spill] sm:$0xff] %v7017_v41  ;;  %v9072_v8 = vunpack.i.h.bf16 %v7017_v41  ;;  %v5253_v15 = vunpack.i.l.bf16 %v7017_v41  ;;  %5526 = vrot.lane.b32.xlu1 %v6576_v40, %s6316_s27 }
  0xe8   :  { %5521 = vrot.lane.b32.xlu0 %v6545_v34, %s6316_s27  ;;  %4569 = vmatprep.subr.bf16.mxu1 %v4568_v35  ;;  %v955_v31 = vsel %vm953_vm3, %v5258_v20, %v9073_v30 }
  0xe9   :  { %v716_v58 = vsel %vm702_vm2, %v5253_v15, %v9072_v8  ;;  %4571 = vmatpush1.bf16.msra.mxu1 %v4570_v19  ;;  %v5267_v27 = vpop.permute.xlu1 %5266 }
  0xea   :  { %v7035_v53 = vpop.permute.xlu0 %5261  ;;  %v4572_v40 = vpack.c.bf16 %v955_v31, %v716_v58  ;;  %v5268_v21 = vunpack.i.l.bf16 %v5267_v27  ;;  %v5269_v35 = vunpack.i.h.bf16 %v5267_v27 }
  0xeb   :  { %v5263_v34 = vunpack.i.l.bf16 %v7035_v53  ;;  %5536 = vrot.lane.b32.xlu1 %v5535_v55, %s6316_s27 }
  0xec   :  { %5531 = vrot.lane.b32.xlu0 %v6572_v39, %s6316_s27  ;;  %4573 = vmatprep.subr.bf16.mxu1 %v4572_v40  ;;  %v954_v12 = vsel %vm953_vm3, %v5268_v21, %v5258_v20 }
  0xed   :  { %v715_v6 = vsel %vm702_vm2, %v5263_v34, %v5253_v15  ;;  %v7043_v26 = vpop.permute.xlu1 %5276 }
  0xee   :  { %9142 = vst [vmem:[#allocation31_spill] sm:$0xff] %v7043_v26  ;;  %v7045_v9 = vpop.permute.xlu0 %5271  ;;  %v4574_v1 = vpack.c.bf16 %v954_v12, %v715_v6  ;;  %v9062_v19 = vunpack.i.l.bf16 %v7043_v26  ;;  %v5279_v39 = vunpack.i.h.bf16 %v7043_v26 }
  0xef   :  { %9143 = vst [vmem:[#allocation32_spill] sm:$0xff] %v7045_v9  ;;  %v5274_v58 = vunpack.i.h.bf16 %v7045_v9  ;;  %v9071_v55 = vunpack.i.l.bf16 %v7045_v9  ;;  %5546 = vrot.lane.b32.xlu1 %v6599_v44, %s6316_s27  ;;  %v5560_v44 = vpack.i.bf16 %v6484_v22, %v6458_v17 }
  0xf0   :  { %5541 = vrot.lane.b32.xlu0 %v6603_v45, %s6316_s27  ;;  %4575 = vmatpush1.bf16.msra.mxu1 %v4574_v1  ;;  %v957_v6 = vsel %vm953_vm3, %v5279_v39, %v5269_v35 }
  0xf1   :  { %v958_v15 = vsel %vm953_vm3, %v5269_v35, %v9071_v55  ;;  %v961_v20 = vsel %vm953_vm3, %v5274_v58, %v9062_v19  ;;  %v7061_v31 = vpop.permute.xlu1 %5286  ;;  %v6196_v55 = vld [vmem:[%s9037_s1 + $0x50] sm:$0xff] }
  0xf2   :  { %9144 = vst [vmem:[#allocation33_spill] sm:$0xff] %v7061_v31  ;;  %v5282_v27 = vpop.permute.xlu0 %5281  ;;  %v4576_v40 = vpack.c.bf16 %v961_v20, %v958_v15  ;;  %v9068_v45 = vunpack.i.l.bf16 %v7061_v31 }
  0xf3   :  { %v5283_v21 = vunpack.i.l.bf16 %v5282_v27  ;;  %5556 = vrot.lane.b32.xlu1 %v6626_v49, %s6316_s27  ;;  %v5284_v34 = vunpack.i.h.bf16 %v5282_v27  ;;  %v5289_v49 = vunpack.i.h.bf16 %v7061_v31 }
  0xf4   :  { %5551 = vrot.lane.b32.xlu0 %v6630_v50, %s6316_s27  ;;  %4577 = vmatprep.subr.bf16.mxu1 %v4576_v40 }
  0xf5   :  { %v960_v12 = vsel %vm953_vm3, %v5283_v21, %v5274_v58  ;;  %v7072_v1 = vpop.permute.xlu1 %5296  ;;  %v964_v22 = vsel %vm953_vm3, %v5284_v34, %v9068_v45 }
  0xf6   :  { %v7074_v15 = vpop.permute.xlu0 %5291  ;;  %v4578_v20 = vpack.c.bf16 %v960_v12, %v957_v6  ;;  %v5298_v50 = vunpack.i.l.bf16 %v7072_v1 }
  0xf7   :  { %9145 = vst [vmem:[#allocation34_spill] sm:$0xff] %v7074_v15  ;;  %v5294_v19 = vunpack.i.h.bf16 %v7074_v15  ;;  %v9063_v17 = vunpack.i.l.bf16 %v7074_v15  ;;  %5566 = vrot.lane.b32.xlu1 %v6521_v29, %s6319_s30 }
  0xf8   :  { %5561 = vrot.lane.b32.xlu0 %v5560_v44, %s6316_s27  ;;  %4579 = vmatpush1.bf16.msra.mxu1 %v4578_v20  ;;  %v966_v39 = vsel %vm953_vm3, %v5298_v50, %v5289_v49  ;;  %v9148_v44 = vld [vmem:[#allocation13_spill] sm:$0xff] }
  0xf9   :  { %v967_v35 = vsel %vm953_vm3, %v5289_v49, %v9063_v17  ;;  %v963_v58 = vsel %vm953_vm3, %v5294_v19, %v5284_v34  ;;  %v7091_v27 = vpop.permute.xlu1 %5306  ;;  %v4584_v6 = vpack.c.bf16 %v6388_v3, %v9148_v44  ;;  %v5580_v34 = vpack.i.bf16 %v9137_v7, %v6533_v32  ;;  %v6187_v32 = vld [vmem:[%s9036_s0] sm:$0xff]  ;;  %v9150_v44 = vld [vmem:[#allocation14_spill] sm:$0xff] }
  0xfa   :  { %9146 = vst [vmem:[#allocation35_spill] sm:$0xff] %v7091_v27  ;;  %v7093_v40 = vpop.permute.xlu0 %5301  ;;  %v4580_v29 = vpack.c.bf16 %v967_v35, %v964_v22  ;;  %v4582_v21 = vpack.c.bf16 %v966_v39, %v963_v58  ;;  %v9064_v12 = vunpack.i.h.bf16 %v7091_v27  ;;  %v5308_v20 = vunpack.i.l.bf16 %v7091_v27  ;;  %v6186_v35 = vld [vmem:[%s9037_s1] sm:$0xff] }
  0xfb   :  { %9147 = vst [vmem:[#allocation36_spill] sm:$0xff] %v7093_v40  ;;  %v9065_v17 = vunpack.i.h.bf16 %v7093_v40  ;;  %v5303_v19 = vunpack.i.l.bf16 %v7093_v40  ;;  %5576 = vrot.lane.b32.xlu1 %v6884_v18, %s6319_s30  ;;  %v4586_v58 = vpack.c.bf16 %v6186_v35, %v6187_v32 }
  0xfc   :  { %5571 = vrot.lane.b32.xlu0 %v9137_v7, %s6319_s30  ;;  %4581 = vmatprep.subr.bf16.mxu1 %v4580_v29  ;;  %v1526_v49 = vsel %vm1515_vm4, %v5308_v20, %v9064_v12 }
  0xfd   :  { %v1523_v3 = vsel %vm1515_vm4, %v5303_v19, %v9065_v17  ;;  %4583 = vmatpush1.bf16.msra.mxu1 %v4582_v21  ;;  %v7113_v50 = vpop.permute.xlu1 %5316  ;;  %v6188_v21 = vld [vmem:[%s9037_s1 + $0x20] sm:$0xff] }
  0xfe   :  { %9149 = vst [vmem:[#allocation13_spill] sm:$0xff] %v7113_v50  ;;  %v5312_v22 = vpop.permute.xlu0 %5311  ;;  %v4608_v18 = vpack.c.bf16 %v1526_v49, %v1523_v3  ;;  %4585 = vmatprep.subr.bf16.mxu1 %v4584_v6  ;;  %v4588_v12 = vpack.c.bf16 %v9150_v44, %v6188_v21  ;;  %v9067_v3 = vunpack.i.h.bf16 %v7113_v50  ;;  %v5318_v49 = vunpack.i.l.bf16 %v7113_v50 }
  0xff   :  { %v5314_v39 = vunpack.i.h.bf16 %v5312_v22  ;;  %v5313_v29 = vunpack.i.l.bf16 %v5312_v22  ;;  %5586 = vrot.lane.b32.xlu1 %v6941_v57, %s6319_s30  ;;  %v6189_v57 = vld [vmem:[%s9037_s1 + $0x18] sm:$0xff] }
 0x100   :  { %5581 = vrot.lane.b32.xlu0 %v5580_v34, %s6319_s30  ;;  %4609 = vmatprep.subr.bf16.mxu0 %v4608_v18  ;;  %v6190_v34 = vld [vmem:[%s9037_s1 + $0x30] sm:$0xff] }
 0x101   :  { %v1522_v35 = vsel %vm1515_vm4, %v5313_v29, %v5303_v19  ;;  %v1525_v6 = vsel %vm1515_vm4, %v5314_v39, %v5308_v20  ;;  %v7132_v22 = vpop.permute.xlu1 %5326  ;;  %4587 = vmatpush1.bf16.msra.mxu1 %v4586_v58  ;;  %v4590_v18 = vpack.c.bf16 %v6190_v34, %v6189_v57  ;;  %v5605_v58 = vpack.i.bf16 %v9137_v7, %v6586_v42 }
 0x102   :  { %v7134_v32 = vpop.permute.xlu0 %5321  ;;  %v4610_v17 = vpack.c.bf16 %v1525_v6, %v1522_v35  ;;  %4589 = vmatprep.subr.bf16.mxu1 %v4588_v12  ;;  %v5328_v39 = vunpack.i.l.bf16 %v7132_v22  ;;  %v1529_v29 = vsel %vm1515_vm4, %v5318_v49, %v9067_v3  ;;  %v5615_v42 = vpack.i.bf16 %v9137_v7, %v6613_v47  ;;  %v7178_v47 = vld [vmem:[%s9036_s0 + $0x20] sm:$0xff] }
 0x103   :  { %9151 = vst [vmem:[#allocation14_spill] sm:$0xff] %v7134_v32  ;;  %v9066_v19 = vunpack.i.h.bf16 %v7134_v32  ;;  %v5323_v20 = vunpack.i.l.bf16 %v7134_v32  ;;  %5596 = vrot.lane.b32.xlu1 %v9137_v7, %s6319_s30 }
 0x104   :  { %5591 = vrot.lane.b32.xlu0 %v6937_v16, %s6319_s30  ;;  %4611 = vmatpush1.bf16.msra.mxu0 %v4610_v17  ;;  %v1528_v57 = vsel %vm1515_vm4, %v5328_v39, %v5318_v49  ;;  %v7183_v49 = vld [vmem:[%s9036_s0 + $0x28] sm:$0xff] }
 0x105   :  { %v1768_v12 = vsel %vm1766_vm5, %v5323_v20, %v9066_v19  ;;  %v7157_v21 = vpop.permute.xlu1 %5336  ;;  %4591 = vmatpush1.bf16.msra.mxu1 %v4590_v18 }
 0x106   :  { %9152 = vst [vmem:[#allocation37_spill] sm:$0xff] %v7157_v21  ;;  %v5332_v44 = vpop.permute.xlu0 %5331  ;;  %v4612_v35 = vpack.c.bf16 %v1768_v12, %v1529_v29  ;;  %v9069_v17 = vunpack.i.l.bf16 %v7157_v21 }
 0x107   :  { %v5333_v16 = vunpack.i.l.bf16 %v5332_v44  ;;  %5606 = vrot.lane.b32.xlu1 %v5605_v58, %s6319_s30  ;;  %v5334_v6 = vunpack.i.h.bf16 %v5332_v44  ;;  %v5339_v58 = vunpack.i.h.bf16 %v7157_v21 }
 0x108   :  { %5601 = vrot.lane.b32.xlu0 %v6955_v37, %s6319_s30  ;;  %4613 = vmatprep.subr.bf16.mxu0 %v4612_v35 }
 0x109   :  { %v1767_v34 = vsel %vm1766_vm5, %v5333_v16, %v5323_v20  ;;  %v5347_v19 = vpop.permute.xlu1 %5346  ;;  %v5625_v20 = vpack.i.bf16 %v7183_v49, %v7178_v47  ;;  %v1771_v39 = vsel %vm1766_vm5, %v5334_v6, %v9069_v17 }
 0x10a   :  { %v7167_v29 = vpop.permute.xlu0 %5341  ;;  %v4614_v18 = vpack.c.bf16 %v1767_v34, %v1528_v57  ;;  %v5348_v12 = vunpack.i.l.bf16 %v5347_v19 }
 0x10b   :  { %9153 = vst [vmem:[#allocation38_spill] sm:$0xff] %v7167_v29  ;;  %v5344_v37 = vunpack.i.h.bf16 %v7167_v29  ;;  %v9070_v3 = vunpack.i.l.bf16 %v7167_v29  ;;  %5616 = vrot.lane.b32.xlu1 %v5615_v42, %s6319_s30 }
 0x10c   :  { %5611 = vrot.lane.b32.xlu0 %v6966_v38, %s6319_s30  ;;  %4615 = vmatpush1.bf16.msra.mxu0 %v4614_v18  ;;  %v1773_v35 = vsel %vm1766_vm5, %v5348_v12, %v5339_v58 }
 0x10d   :  { %v1774_v38 = vsel %vm1766_vm5, %v5339_v58, %v9070_v3  ;;  %v1770_v44 = vsel %vm1766_vm5, %v5344_v37, %v5334_v6  ;;  %v7195_v16 = vpop.permute.xlu1 %5356  ;;  %v7208_v6 = vld [vmem:[%s9037_s1 + $0x68] sm:$0xff]  ;;  %v7213_v58 = vld [vmem:[%s9037_s1 + $0x70] sm:$0xff]  ;;  %v7222_v37 = vld [vmem:[%s9037_s1 + $0x60] sm:$0xff] }
 0x10e   :  { %v7197_v42 = vpop.permute.xlu0 %5351  ;;  %v4616_v57 = vpack.c.bf16 %v1774_v38, %v1771_v39  ;;  %v4618_v34 = vpack.c.bf16 %v1773_v35, %v1770_v44  ;;  %v5358_v18 = vunpack.i.l.bf16 %v7195_v16  ;;  %v7217_v12 = vpack.i.bf16 %v7213_v58, %v7208_v6 }
 0x10f   :  { %9154 = vst [vmem:[#allocation39_spill] sm:$0xff] %v7197_v42  ;;  %v9074_v45 = vunpack.i.h.bf16 %v7197_v42  ;;  %v5353_v17 = vunpack.i.l.bf16 %v7197_v42  ;;  %5626 = vrot.lane.b32.xlu1 %v5625_v20, %s6317_s28  ;;  %v7226_v20 = vpack.i.bf16 %v7222_v37, %v9137_v7  ;;  %v5349_v44 = vunpack.i.h.bf16 %v5347_v19 }
 0x110   :  { %5621 = vrot.lane.b32.xlu0 %v9137_v7, %s6319_s30  ;;  %4617 = vmatprep.subr.bf16.mxu0 %v4616_v57  ;;  %v6197_v57 = vld [vmem:[%s9037_s1 + $0x48] sm:$0xff] }
 0x111   :  { %v1266_v39 = vsel %vm1264_vm6, %v5353_v17, %v9074_v45  ;;  %v1265_v38 = vsel %vm1264_vm6, %v5358_v18, %v5353_v17  ;;  %4619 = vmatpush1.bf16.msra.mxu0 %v4618_v34  ;;  %v7232_v35 = vpop.permute.xlu1 %5366 }
 0x112   :  { %9155 = vst [vmem:[#allocation40_spill] sm:$0xff] %v7232_v35  ;;  %v7234_v3 = vpop.permute.xlu0 %5361  ;;  %v4592_v8 = vpack.c.bf16 %v1266_v39, %v6196_v55  ;;  %v4594_v30 = vpack.c.bf16 %v1265_v38, %v6197_v57  ;;  %v5369_v45 = vunpack.i.h.bf16 %v7232_v35  ;;  %v9081_v17 = vunpack.i.l.bf16 %v7232_v35  ;;  %v7253_v55 = vld [vmem:[%s9037_s1 + $0x78] sm:$0xff] }
 0x113   :  { %9156 = vst [vmem:[#allocation41_spill] sm:$0xff] %v7234_v3  ;;  %v5364_v19 = vunpack.i.h.bf16 %v7234_v3  ;;  %v9080_v34 = vunpack.i.l.bf16 %v7234_v3  ;;  %5636 = vrot.lane.b32.xlu1 %v7217_v12, %s6317_s28  ;;  %v7257_v18 = vpack.i.bf16 %v7253_v55, %v9137_v7 }
 0x114   :  { %5631 = vrot.lane.b32.xlu0 %v7226_v20, %s6317_s28  ;;  %4593 = vmatprep.subr.bf16.mxu1 %v4592_v8  ;;  %v1776_v29 = vsel %vm1766_vm5, %v5369_v45, %v5349_v44  ;;  %v7276_v8 = vld [vmem:[%s9037_s1 + $0x90] sm:$0xff]  ;;  %v7290_v45 = vld [vmem:[%s9037_s1 + $0x88] sm:$0xff] }
 0x115   :  { %v1777_v39 = vsel %vm1766_vm5, %v5349_v44, %v9080_v34  ;;  %v1780_v38 = vsel %vm1766_vm5, %v5364_v19, %v9081_v17  ;;  %4595 = vmatpush1.bf16.msra.mxu1 %v4594_v30  ;;  %v7265_v57 = vpop.permute.xlu1 %5371  ;;  %v7280_v30 = vpack.i.bf16 %v7276_v8, %v9137_v7  ;;  %v5359_v44 = vunpack.i.h.bf16 %v7195_v16 }
 0x116   :  { %9157 = vst [vmem:[#allocation42_spill] sm:$0xff] %v7265_v57  ;;  %v1759_v43 = vpop.permute.xlu0 %1758  ;;  %v4620_v5 = vpack.c.bf16 %v1780_v38, %v1777_v39  ;;  %v5374_v38 = vunpack.i.h.bf16 %v7265_v57 }
 0x117   :  { %v1779_v21 = vsel %vm1766_vm5, %v1759_v43, %v5364_v19  ;;  %5646 = vrot.lane.b32.xlu1 %v7257_v18, %s6317_s28  ;;  %v7285_v43 = vld [vmem:[%s9037_s1 + $0x80] sm:$0xff] }
 0x118   :  { %v4622_v32 = vpack.c.bf16 %v1779_v21, %v1776_v29  ;;  %5641 = vrot.lane.b32.xlu0 %v9137_v7, %s6317_s28  ;;  %v7294_v21 = vpack.i.bf16 %v7290_v45, %v7285_v43  ;;  %v9093_v29 = vunpack.i.l.bf16 %v7265_v57  ;;  %4621 = vmatprep.subr.bf16.mxu0 %v4620_v5  ;;  %v7313_v5 = vld [vmem:[%s9037_s1 + $0x98] sm:$0xff] }
 0x119   :  { %v7298_v19 = vpop.permute.xlu1 %5381 }
 0x11a   :  { %v7300_v39 = vpop.permute.xlu0 %5376  ;;  %4623 = vmatpush1.bf16.msra.mxu0 %v4622_v32  ;;  %v5383_v34 = vunpack.i.l.bf16 %v7298_v19  ;;  %v7318_v32 = vld [vmem:[%s9037_s1 + $0xa0] sm:$0xff]  ;;  %v1269_v3 = vsel %vm1264_vm6, %v5359_v44, %v9093_v29 }
 0x11b   :  { %9158 = vst [vmem:[#allocation43_spill] sm:$0xff] %v7300_v39  ;;  %v5379_v17 = vunpack.i.h.bf16 %v7300_v39  ;;  %5656 = vrot.lane.b32.xlu1 %v7280_v30, %s6317_s28  ;;  %v7322_v16 = vpack.i.bf16 %v7318_v32, %v7313_v5  ;;  %v9159_v35 = vunpack.i.l.bf16 %v7300_v39 }
 0x11c   :  { %5651 = vrot.lane.b32.xlu0 %v7294_v21, %s6317_s28  ;;  %v1271_v40 = vsel %vm1264_vm6, %v5383_v34, %v5374_v38 }
 0x11d   :  { %v1272_v50 = vsel %vm1264_vm6, %v5374_v38, %v9159_v35  ;;  %v1268_v27 = vsel %vm1264_vm6, %v5379_v17, %v5359_v44  ;;  %v7332_v42 = vpop.permute.xlu1 %5391 }
 0x11e   :  { %9160 = vst [vmem:[#allocation44_spill] sm:$0xff] %v7332_v42  ;;  %v7334_v15 = vpop.permute.xlu0 %5386  ;;  %v4596_v31 = vpack.c.bf16 %v1272_v50, %v1269_v3  ;;  %v4598_v26 = vpack.c.bf16 %v1271_v40, %v1268_v27  ;;  %v9100_v9 = vunpack.i.h.bf16 %v7332_v42  ;;  %v5393_v57 = vunpack.i.l.bf16 %v7332_v42  ;;  %v7347_v50 = vld [vmem:[%s9037_s1 + $0xb0] sm:$0xff]  ;;  %v7352_v27 = vld [vmem:[%s9037_s1 + $0xb8] sm:$0xff]  ;;  %v7361_v3 = vld [vmem:[%s9037_s1 + $0xa8] sm:$0xff] }
 0x11f   :  { %9161 = vst [vmem:[#allocation45_spill] sm:$0xff] %v7334_v15  ;;  %v9099_v29 = vunpack.i.h.bf16 %v7334_v15  ;;  %v5388_v39 = vunpack.i.l.bf16 %v7334_v15  ;;  %5666 = vrot.lane.b32.xlu1 %v9137_v7, %s6317_s28  ;;  %9162 = vst [vmem:[#allocation46_spill] sm:$0xff] %v7347_v50  ;;  %v7356_v40 = vpack.i.bf16 %v7352_v27, %v7347_v50  ;;  %v7365_v35 = vpack.i.bf16 %v7361_v3, %v9137_v7 }
 0x120   :  { %5661 = vrot.lane.b32.xlu0 %v7322_v16, %s6317_s28  ;;  %9163 = vst [vmem:[#allocation47_spill] sm:$0xff] %v7352_v27  ;;  %9164 = vst [vmem:[#allocation48_spill] sm:$0xff] %v7361_v3  ;;  %4597 = vmatprep.subr.bf16.mxu1 %v4596_v31  ;;  %v2022_v34 = vsel %vm2017_vm7, %v5393_v57, %v9100_v9  ;;  %v7382_v31 = vld [vmem:[%s9036_s0 + $0x18] sm:$0xff]  ;;  %v5384_v9 = vunpack.i.h.bf16 %v7298_v19 }
 0x121   :  { %v2019_v17 = vsel %vm2017_vm7, %v5388_v39, %v9099_v29  ;;  %4599 = vmatpush1.bf16.msra.mxu1 %v4598_v26  ;;  %v7373_v44 = vpop.permute.xlu1 %5401  ;;  %9166 = vst [vmem:[#allocation50_spill] sm:$0xff] %v7382_v31  ;;  %v7386_v26 = vpack.i.bf16 %v7178_v47, %v7382_v31 }
 0x122   :  { %9165 = vst [vmem:[#allocation49_spill] sm:$0xff] %v7373_v44  ;;  %v5397_v38 = vpop.permute.xlu0 %5396  ;;  %v4624_v27 = vpack.c.bf16 %v2022_v34, %v2019_v17  ;;  %v9107_v29 = vunpack.i.l.bf16 %v7373_v44  ;;  %v5404_v47 = vunpack.i.h.bf16 %v7373_v44 }
 0x123   :  { %v5399_v50 = vunpack.i.h.bf16 %v5397_v38  ;;  %v5398_v41 = vunpack.i.l.bf16 %v5397_v38  ;;  %5676 = vrot.lane.b32.xlu1 %v7356_v40, %s6317_s28  ;;  %v6321_v38 = vmov 0  }
 0x124   :  { %5671 = vrot.lane.b32.xlu0 %v7365_v35, %s6317_s28  ;;  %4625 = vmatprep.subr.bf16.mxu0 %v4624_v27  ;;  %v1275_v19 = vsel %vm1264_vm6, %v5384_v9, %v9107_v29 }
 0x125   :  { %v2018_v17 = vsel %vm2017_vm7, %v5398_v41, %v5388_v39  ;;  %v2021_v34 = vsel %vm2017_vm7, %v5399_v50, %v5393_v57  ;;  %5801 = vset.pattern.permute.xlu1 %v6321_v38  ;;  %v7392_v15 = vpop.permute.xlu1 %5411  ;;  %5800 = vset.pattern.permute.xlu0 %v6321_v38  ;;  %v7406_v57 = vpack.i.bf16 %v9137_v7, %v7183_v49 }
 0x126   :  { %9167 = vst [vmem:[#allocation51_spill] sm:$0xff] %v7392_v15  ;;  %v7394_v42 = vpop.permute.xlu0 %5406  ;;  %v4626_v3 = vpack.c.bf16 %v2021_v34, %v2018_v17  ;;  %v5413_v31 = vunpack.i.l.bf16 %v7392_v15 }
 0x127   :  { %9168 = vst [vmem:[#allocation52_spill] sm:$0xff] %v7394_v42  ;;  %v5409_v27 = vunpack.i.h.bf16 %v7394_v42  ;;  %v9109_v41 = vunpack.i.l.bf16 %v7394_v42  ;;  %5686 = vrot.lane.b32.xlu1 %v7386_v26, %s6318_s29 }
 0x128   :  { %5681 = vrot.lane.b32.xlu0 %v9137_v7, %s6317_s28  ;;  %4627 = vmatpush1.bf16.msra.mxu0 %v4626_v3  ;;  %v1277_v17 = vsel %vm1264_vm6, %v5413_v31, %v5404_v47 }
 0x129   :  { %v1278_v39 = vsel %vm1264_vm6, %v5404_v47, %v9109_v41  ;;  %v1274_v50 = vsel %vm1264_vm6, %v5409_v27, %v5384_v9  ;;  %v7416_v34 = vpop.permute.xlu1 %5421  ;;  %v5083_v41 = vunpack.i.l.bf16 %v6789_v62 }
 0x12a   :  { %9169 = vst [vmem:[#allocation53_spill] sm:$0xff] %v7416_v34  ;;  %v7418_v38 = vpop.permute.xlu0 %5416  ;;  %v4600_v15 = vpack.c.bf16 %v1278_v39, %v1275_v19  ;;  %v4602_v49 = vpack.c.bf16 %v1277_v17, %v1274_v50  ;;  %v9110_v3 = vunpack.i.h.bf16 %v7416_v34  ;;  %v5423_v44 = vunpack.i.l.bf16 %v7416_v34 }
 0x12b   :  { %9170 = vst [vmem:[#allocation54_spill] sm:$0xff] %v7418_v38  ;;  %v9111_v29 = vunpack.i.h.bf16 %v7418_v38  ;;  %v5418_v42 = vunpack.i.l.bf16 %v7418_v38  ;;  %5696 = vrot.lane.b32.xlu1 %v7226_v20, %s6318_s29  ;;  %v5079_v39 = vunpack.i.h.bf16 %v6781_v54 }
 0x12c   :  { %5691 = vrot.lane.b32.xlu0 %v7406_v57, %s6318_s29  ;;  %4601 = vmatprep.subr.bf16.mxu1 %v4600_v15  ;;  %v2028_v31 = vsel %vm2017_vm7, %v5423_v44, %v9110_v3  ;;  %v5084_v15 = vunpack.i.h.bf16 %v6789_v62  ;;  %v5329_v62 = vunpack.i.h.bf16 %v7132_v22 }
 0x12d   :  { %v2025_v9 = vsel %vm2017_vm7, %v5418_v42, %v9111_v29  ;;  %4603 = vmatpush1.bf16.msra.mxu1 %v4602_v49  ;;  %v7434_v47 = vpop.permute.xlu1 %5431  ;;  %v5074_v49 = vunpack.i.h.bf16 %v6783_v60  ;;  %v5089_v29 = vunpack.i.h.bf16 %v6787_v24 }
 0x12e   :  { %9171 = vst [vmem:[#allocation55_spill] sm:$0xff] %v7434_v47  ;;  %v5427_v27 = vpop.permute.xlu0 %5426  ;;  %v4628_v19 = vpack.c.bf16 %v2028_v31, %v2025_v9  ;;  %v5434_v34 = vunpack.i.h.bf16 %v7434_v47  ;;  %v9173_v22 = vunpack.i.l.bf16 %v7434_v47  ;;  %v9175_v47 = vld [vmem:[#allocation20_spill] sm:$0xff] }
 0x12f   :  { %v5429_v50 = vunpack.i.h.bf16 %v5427_v27  ;;  %v5428_v17 = vunpack.i.l.bf16 %v5427_v27  ;;  %5706 = vrot.lane.b32.xlu1 %v7257_v18, %s6318_s29  ;;  %v5073_v27 = vunpack.i.l.bf16 %v6783_v60  ;;  %v329_v60 = vsel %vm200_vm0, %v5083_v41, %v5084_v15 }
 0x130   :  { %5701 = vrot.lane.b32.xlu0 %v7217_v12, %s6318_s29  ;;  %4629 = vmatprep.subr.bf16.mxu0 %v4628_v19  ;;  %v5094_v46 = vunpack.i.h.bf16 %v9175_v47 }
 0x131   :  { %v2024_v31 = vsel %vm2017_vm7, %v5428_v17, %v5418_v42  ;;  %v2027_v3 = vsel %vm2017_vm7, %v5429_v50, %v5423_v44  ;;  %v7451_v20 = vpop.permute.xlu1 %5441  ;;  %v5088_v44 = vunpack.i.l.bf16 %v6787_v24 }
 0x132   :  { %9172 = vst [vmem:[#allocation56_spill] sm:$0xff] %v7451_v20  ;;  %v7453_v18 = vpop.permute.xlu0 %5436  ;;  %v4630_v12 = vpack.c.bf16 %v2027_v3, %v2024_v31  ;;  %v5443_v9 = vunpack.i.l.bf16 %v7451_v20  ;;  %v1517_v3 = vsel %vm1515_vm4, %v5329_v62, %v9173_v22  ;;  %v9174_v31 = vld [vmem:[#allocation22_spill] sm:$0xff]  ;;  %v5093_v22 = vunpack.i.l.bf16 %v9175_v47 }
 0x133   :  { %v5439_v19 = vunpack.i.h.bf16 %v7453_v18  ;;  %v9118_v42 = vunpack.i.l.bf16 %v7453_v18  ;;  %5716 = vrot.lane.b32.xlu1 %v9137_v7, %s6318_s29  ;;  %v5104_v38 = vunpack.i.h.bf16 %v9174_v31  ;;  %v5103_v20 = vunpack.i.l.bf16 %v9174_v31 }
 0x134   :  { %5711 = vrot.lane.b32.xlu0 %v7294_v21, %s6318_s29  ;;  %4631 = vmatpush1.bf16.msra.mxu0 %v4630_v12  ;;  %v1519_v24 = vsel %vm1515_vm4, %v5443_v9, %v5434_v34  ;;  %v331_v47 = vsel %vm200_vm0, %v5088_v44, %v5089_v29  ;;  %v9178_v29 = vunpack.i.l.bf16 %v6781_v54 }
 0x135   :  { %v1520_v50 = vsel %vm1515_vm4, %v5434_v34, %v9118_v42  ;;  %v1516_v17 = vsel %vm1515_vm4, %v5439_v19, %v5329_v62  ;;  %v7475_v21 = vpop.permute.xlu1 %2013  ;;  %v326_v62 = vsel %vm200_vm0, %v5073_v27, %v5074_v49  ;;  %v9176_v19 = vld [vmem:[#allocation21_spill] sm:$0xff] }
 0x136   :  { %v2012_v41 = vpop.permute.xlu0 %2011  ;;  %v4604_v12 = vpack.c.bf16 %v1520_v50, %v1517_v3  ;;  %v4606_v11 = vpack.c.bf16 %v1519_v24, %v1516_v17  ;;  %v5109_v34 = vunpack.i.h.bf16 %v9176_v19  ;;  %v5108_v9 = vunpack.i.l.bf16 %v9176_v19  ;;  %v9177_v50 = vld [vmem:[#allocation19_spill] sm:$0xff] }
 0x137   :  { %v2031_v42 = vsel %vm2017_vm7, %v2012_v41, %v7475_v21  ;;  %5726 = vrot.lane.b32.xlu1 %v7322_v16, %s6318_s29  ;;  %v4632_v3 = vpack.c.bf16 %v329_v60, %v326_v62  ;;  %v5099_v17 = vunpack.i.h.bf16 %v9177_v50  ;;  %v5098_v24 = vunpack.i.l.bf16 %v9177_v50  ;;  %v2188_v16 = vld [vmem:[%s9039_s3] sm:$0xff]  ;;  %v9181_v62 = vld [vmem:[#allocation16_spill] sm:$0xff] }
 0x138   :  { %5721 = vrot.lane.b32.xlu0 %v7280_v30, %s6318_s29  ;;  %4605 = vmatprep.subr.bf16.mxu1 %v4604_v12  ;;  %v335_v19 = vsel %vm200_vm0, %v5103_v20, %v5104_v38  ;;  %v330_v30 = vsel %vm200_vm0, %v5084_v15, %v5088_v44  ;;  %v328_v60 = vsel %vm200_vm0, %v9178_v29, %v5079_v39  ;;  %v2190_v20 = vld [vmem:[%s9039_s3 + $0x10] sm:$0xff] }
 0x139   :  { %2835 = vmatprep.subr.mxu0 %v2031_v42  ;;  %4607 = vmatpush1.bf16.msra.mxu1 %v4606_v11  ;;  %v7491_v27 = vpop.permute.xlu1 %5446  ;;  %v4720_v11 = vpack.c.bf16 %v331_v47, %v328_v60  ;;  %v332_v15 = vsel %vm200_vm0, %v5093_v22, %v5094_v46  ;;  %v337_v44 = vsel %vm200_vm0, %v5108_v9, %v5109_v34 }
 0x13a   :  { %v2010_v31 = vpop.permute.xlu0 %2009  ;;  %4633 = vmatprep.subr.bf16.mxu1 %v4632_v3  ;;  %v4636_v39 = vpack.c.bf16 %v335_v19, %v332_v15  ;;  %v334_v54 = vsel %vm200_vm0, %v5098_v24, %v5099_v17  ;;  %v5184_v19 = vunpack.i.h.bf16 %v6914_v28  ;;  %v5198_v17 = vunpack.i.l.bf16 %v6929_v61  ;;  %v9184_v15 = vld [vmem:[#allocation17_spill] sm:$0xff] }
 0x13b   :  { %v2030_v42 = vsel %vm2017_vm7, %v2010_v31, %v2012_v41  ;;  %5736 = vrot.lane.b32.xlu1 %v7356_v40, %s6318_s29  ;;  %v9179_v41 = vmov %v9178_v29  ;;  %v2192_v40 = vld [vmem:[%s9039_s3 + $0x20] sm:$0xff]  ;;  %v4724_v50 = vpack.c.bf16 %v337_v44, %v334_v54  ;;  %v2191_v31 = vld [vmem:[%s9039_s3 + $0x18] sm:$0xff]  ;;  %v2193_v29 = vld [vmem:[%s9039_s3 + $0x28] sm:$0xff]  ;;  %v333_v60 = vsel %vm200_vm0, %v5094_v46, %v5098_v24 }
 0x13c   :  { %5731 = vrot.lane.b32.xlu0 %v7365_v35, %s6318_s29  ;;  %v327_v12 = vsel %vm200_vm0, %v5074_v49, %v9179_v41  ;;  %2715 = vmatmul.mubr.f32.vlgmr.msra.gmra.mrb[0].mxu1 %v2188_v16  ;;  %v9180_v35 = vld [vmem:[#allocation15_spill] sm:$0xff]  ;;  %v336_v49 = vsel %vm200_vm0, %v5104_v38, %v5108_v9  ;;  %v5188_v16 = vunpack.i.l.bf16 %v6912_v23  ;;  %v5183_v38 = vunpack.i.l.bf16 %v6914_v28 }
 0x13d   :  { %2836 = vmatpush1.msra.mxu0 %v2030_v42  ;;  %v9182_v3 = vpack.c.bf16 %v9180_v35, %v9181_v62  ;;  %v7520_v47 = vpop.permute.xlu1 %5456  ;;  %v4722_v34 = vpack.c.bf16 %v330_v30, %v327_v12  ;;  %v5194_v42 = vunpack.i.h.bf16 %v6931_v13  ;;  %v5193_v30 = vunpack.i.l.bf16 %v6931_v13  ;;  %2720 = vmatprep.mubr.f32.mxu1 %v2192_v40  ;;  %v7569_v12 = vld [vmem:[%s9039_s3 + $0x30] sm:$0xff] }
 0x13e   :  { %4721 = vmatprep.subr.bf16.mxu0 %v4720_v11  ;;  %v7522_v22 = vpop.permute.xlu0 %5451  ;;  %4424 = vmatmul.mubr.msk.f32.vlgmr.msra.gmra.mrb[0].mxu0 %vm1766_vm5, %v2190_v20  ;;  %v5199_v9 = vunpack.i.h.bf16 %v6929_v61  ;;  %v5189_v13 = vunpack.i.h.bf16 %v6912_v23  ;;  %v2195_v61 = vld [vmem:[%s9039_s3 + $0x38] sm:$0xff]  ;;  %v9183_v20 = vld [vmem:[#allocation18_spill] sm:$0xff]  ;;  %v4726_v46 = vpack.c.bf16 %v336_v49, %v333_v60  ;;  %v5760_v23 = vpack.i.bf16 %v9137_v7, %v7213_v58  ;;  %v2196_v49 = vld [vmem:[%s9039_s3 + $0x40] sm:$0xff] }
 0x13f   :  { %4635 = vmatpush1.bf16.msra.mxu1 %v9182_v3  ;;  %4723 = vmatpush1.bf16.msra.mxu0 %v4722_v34  ;;  %v9185_v44 = vpack.c.bf16 %v9183_v20, %v9184_v15  ;;  %v7560_v24 = vsel %vm451_vm1, %v5184_v19, %v5188_v16  ;;  %v9186_v41 = vpack.c.bf16 %v6904_v52, %v6898_v33  ;;  %v5214_v58 = vunpack.i.h.bf16 %v6959_v36 }
 0x140   :  { %4637 = vmatprep.subr.bf16.mxu1 %v4636_v39  ;;  %4725 = vmatprep.subr.bf16.mxu0 %v4724_v50  ;;  %v583_v39 = vsel %vm451_vm1, %v5193_v30, %v5194_v42  ;;  %v5755_v40 = vpack.i.bf16 %v7208_v6, %v7222_v37  ;;  %v5213_v35 = vunpack.i.l.bf16 %v6959_v36  ;;  %v580_v62 = vsel %vm451_vm1, %v5183_v38, %v5184_v19 }
 0x141   :  { %1764 = vrot.lane.b32.xlu1 %v9137_v7, %s6318_s29  ;;  %5741 = vrot.lane.b32.xlu0 %v9137_v7, %s6318_s29  ;;  %v7546_v28 = vpop.permute.xlu1 %5466  ;;  %v585_v33 = vsel %vm451_vm1, %v5198_v17, %v5199_v9  ;;  %v7579_v52 = vsel %vm451_vm1, %v5194_v42, %v5198_v17  ;;  %v5204_v3 = vunpack.i.h.bf16 %v6945_v2  ;;  %v5203_v34 = vunpack.i.l.bf16 %v6945_v2 }
 0x142   :  { %2721 = vmatmul.mubr.f32.gmra.mrb[2].mxu1 %v2191_v31  ;;  %v7548_v11 = vpop.permute.xlu0 %5461  ;;  %2881 = vmatprep.mubr.f32.mxu0 %v9137_v7  ;;  %v9187_v6 = vpack.c.bf16 %v6910_v4, %v6907_v14  ;;  %v582_v50 = vsel %vm451_vm1, %v5188_v16, %v5189_v13  ;;  %v5219_v31 = vunpack.i.h.bf16 %v6957_v10  ;;  %v5218_v2 = vunpack.i.l.bf16 %v6957_v10  ;;  %v7604_v4 = vld [vmem:[%s9039_s3 + $0x50] sm:$0xff]  ;;  %v2199_v13 = vld [vmem:[%s9039_s3 + $0x58] sm:$0xff] }
 0x143   :  { %4639 = vmatpush1.bf16.msra.mxu1 %v9185_v44  ;;  %4425 = vmatmul.mubr.msk.f32.gmra.mrb[2].mxu0 %vm1766_vm5, %v2193_v29  ;;  %v4644_v14 = vpack.c.bf16 %v583_v39, %v580_v62  ;;  %v5209_v16 = vunpack.i.h.bf16 %v6943_v0  ;;  %v5208_v19 = vunpack.i.l.bf16 %v6943_v0  ;;  %v9188_v10 = vpack.c.bf16 %v6823_v51, %v6779_v25  ;;  %v7657_v44 = vld [vmem:[%s9039_s3 + $0x68] sm:$0xff]  ;;  %v9191_v39 = vld [vmem:[#allocation23_spill] sm:$0xff] }
 0x144   :  { %4641 = vmatprep.subr.bf16.mxu1 %v9186_v41  ;;  %4727 = vmatpush1.bf16.msra.mxu0 %v4726_v46  ;;  %v5458_v42 = vunpack.i.l.bf16 %v7520_v47  ;;  %v5454_v30 = vunpack.i.h.bf16 %v7522_v22  ;;  %v589_v0 = vsel %vm451_vm1, %v5213_v35, %v5214_v58  ;;  %v4734_v25 = vpack.c.bf16 %v7579_v52, %v7560_v24  ;;  %v7678_v52 = vld [vmem:[%s9039_s3 + $0x60] sm:$0xff] }
 0x145   :  { %2726 = vmatprep.mubr.f32.mxu1 %v2195_v61  ;;  %4729 = vmatprep.subr.bf16.mxu0 %v9187_v6  ;;  %v7588_v37 = vpop.permute.xlu1 %5476  ;;  %v9189_v51 = vpack.c.bf16 %v6901_v63, %v6889_v59  ;;  %v586_v9 = vsel %vm451_vm1, %v5203_v34, %v5204_v3  ;;  %v5780_v17 = vpack.i.bf16 %v7313_v5, %v7276_v8  ;;  %v5448_v60 = vunpack.i.l.bf16 %v7491_v27 }
 0x146   :  { %5751 = vrot.lane.b32.xlu1 %v7406_v57, %s6320_s9  ;;  %v7590_v54 = vpop.permute.xlu0 %5471  ;;  %5746 = vrot.lane.b32.xlu0 %v7386_v26, %s6320_s9  ;;  %v5770_v57 = vpack.i.bf16 %v7285_v43, %v7253_v55  ;;  %v4732_v26 = vpack.c.bf16 %v585_v33, %v582_v50  ;;  %v7620_v55 = vld [vmem:[%s9039_s3 + $0x48] sm:$0xff]  ;;  %v7640_v29 = vpack.i.bf16 %v9137_v7, %v7290_v45  ;;  %v5453_v59 = vunpack.i.l.bf16 %v7522_v22 }
 0x147   :  { %2727 = vmatmul.mubr.f32.gmra.mrb[4].mxu1 %v7569_v12  ;;  %2887 = vmatprep.mubr.f32.mxu0 %v9137_v7  ;;  %v5463_v63 = vunpack.i.l.bf16 %v7548_v11  ;;  %v591_v61 = vsel %vm451_vm1, %v5218_v2, %v5219_v31  ;;  %v5468_v20 = vunpack.i.l.bf16 %v7546_v28  ;;  %v5464_v15 = vunpack.i.h.bf16 %v7548_v11  ;;  %v9190_v11 = vld [vmem:[#allocation24_spill] sm:$0xff] }
 0x148   :  { %4643 = vmatpush1.bf16.msra.mxu1 %v9188_v10  ;;  %4426 = vmatmul.mubr.msk.f32.gmra.mrb[4].mxu0 %vm1766_vm5, %v2196_v49  ;;  %v4648_v22 = vpack.c.bf16 %v589_v0, %v586_v9  ;;  %v588_v46 = vsel %vm451_vm1, %v5208_v19, %v5209_v16  ;;  %v5449_v24 = vunpack.i.h.bf16 %v7491_v27  ;;  %v5459_v41 = vunpack.i.h.bf16 %v7520_v47  ;;  %v2202_v10 = vld [vmem:[%s9039_s3 + $0x70] sm:$0xff]  ;;  %v9196_v9 = vld [vmem:[#allocation26_spill] sm:$0xff] }
 0x149   :  { %4645 = vmatprep.subr.bf16.mxu1 %v4644_v14  ;;  %4731 = vmatpush1.bf16.msra.mxu0 %v9189_v51  ;;  %v7631_v43 = vpop.permute.xlu1 %5486  ;;  %v831_v35 = vsel %vm702_vm2, %v5454_v30, %v5458_v42  ;;  %v587_v62 = vsel %vm451_vm1, %v5204_v3, %v5208_v19  ;;  %v4736_v33 = vpack.c.bf16 %v591_v61, %v588_v46  ;;  %v9193_v50 = vunpack.i.l.bf16 %v6980_v48  ;;  %v2205_v47 = vld [vmem:[%s9039_s3 + $0x88] sm:$0xff] }
 0x14a   :  { %2732 = vmatprep.mubr.f32.mxu1 %v7604_v4  ;;  %v7633_v38 = vpop.permute.xlu0 %5481  ;;  %4733 = vmatprep.subr.bf16.mxu0 %v4732_v26  ;;  %v833_v3 = vsel %vm702_vm2, %v5459_v41, %v5463_v63  ;;  %v5479_v19 = vunpack.i.h.bf16 %v7588_v37  ;;  %v5473_v30 = vunpack.i.l.bf16 %v7590_v54  ;;  %v5488_v48 = vunpack.i.l.bf16 %v7631_v43 }
 0x14b   :  { %5761 = vrot.lane.b32.xlu1 %v5760_v23, %s6320_s9  ;;  %5756 = vrot.lane.b32.xlu0 %v5755_v40, %s6320_s9  ;;  %v5264_v23 = vunpack.i.h.bf16 %v7035_v53  ;;  %v9192_v40 = vpack.c.bf16 %v9190_v11, %v9191_v39  ;;  %v590_v53 = vsel %vm451_vm1, %v5214_v58, %v5218_v2  ;;  %v5483_v49 = vunpack.i.l.bf16 %v7633_v38  ;;  %v9194_v2 = vld [vmem:[#allocation27_spill] sm:$0xff] }
 0x14c   :  { %2733 = vmatmul.mubr.f32.gmra.mrb[6].mxu1 %v7620_v55  ;;  %2893 = vmatprep.mubr.f32.mxu0 %v9137_v7  ;;  %v830_v58 = vsel %vm702_vm2, %v5449_v24, %v5453_v59  ;;  %v708_v31 = vsel %vm702_vm2, %v9193_v50, %v5468_v20  ;;  %v9195_v14 = vunpack.i.l.bf16 %v9194_v2  ;;  %v5484_v0 = vunpack.i.h.bf16 %v7633_v38  ;;  %v9197_v59 = vld [vmem:[#allocation25_spill] sm:$0xff] }
 0x14d   :  { %4647 = vmatpush1.bf16.msra.mxu1 %v9192_v40  ;;  %4427 = vmatmul.mubr.msk.f32.gmra.mrb[6].mxu0 %vm1766_vm5, %v2199_v13  ;;  %v7680_v34 = vpop.permute.xlu1 %5496  ;;  %v828_v36 = vsel %vm702_vm2, %v5264_v23, %v5448_v60  ;;  %v5469_v51 = vunpack.i.h.bf16 %v7546_v28  ;;  %v9198_v63 = vpack.c.bf16 %v9196_v9, %v9197_v59  ;;  %v4738_v13 = vpack.c.bf16 %v590_v53, %v587_v62  ;;  %v7730_v28 = vld [vmem:[%s9039_s3 + $0x78] sm:$0xff]  ;;  %v2208_v38 = vld [vmem:[%s9039_s3 + $0xa0] sm:$0xff] }
 0x14e   :  { %4649 = vmatprep.subr.bf16.mxu1 %v4648_v22  ;;  %v7682_v6 = vpop.permute.xlu0 %5491  ;;  %4735 = vmatpush1.bf16.msra.mxu0 %v4734_v25  ;;  %v705_v16 = vsel %vm702_vm2, %v9195_v14, %v5464_v15  ;;  %v4652_v26 = vpack.c.bf16 %v831_v35, %v828_v36  ;;  %v4740_v61 = vpack.c.bf16 %v833_v3, %v830_v58  ;;  %v5478_v22 = vunpack.i.l.bf16 %v7588_v37  ;;  %v7780_v14 = vld [vmem:[%s9039_s3 + $0x90] sm:$0xff]  ;;  %v9202_v59 = vld [vmem:[#allocation29_spill] sm:$0xff] }
 0x14f   :  { %2738 = vmatprep.mubr.f32.mxu1 %v7657_v44  ;;  %4737 = vmatprep.subr.bf16.mxu0 %v4736_v33  ;;  %v5493_v25 = vunpack.i.l.bf16 %v7682_v6  ;;  %v5474_v46 = vunpack.i.h.bf16 %v7590_v54  ;;  %v5489_v23 = vunpack.i.h.bf16 %v7631_v43  ;;  %v837_v11 = vsel %vm702_vm2, %v5479_v19, %v5483_v49  ;;  %v7766_v33 = vld [vmem:[%s9039_s3 + $0x98] sm:$0xff] }
 0x150   :  { %5771 = vrot.lane.b32.xlu1 %v5770_v57, %s6320_s9  ;;  %5766 = vrot.lane.b32.xlu0 %v9137_v7, %s6320_s9  ;;  %v7712_v57 = vld [vmem:[%s9039_s3 + $0x80] sm:$0xff]  ;;  %v5299_v39 = vunpack.i.h.bf16 %v7072_v1  ;;  %v832_v37 = vsel %vm702_vm2, %v5458_v42, %v5459_v41  ;;  %v4654_v54 = vpack.c.bf16 %v708_v31, %v705_v16  ;;  %v5785_v43 = vpack.i.bf16 %v9137_v7, %v7318_v32 }
 0x151   :  { %2739 = vmatmul.mubr.f32.gmra.mrb[8].mxu1 %v7678_v52  ;;  %2899 = vmatprep.mubr.f32.mxu0 %v9137_v7  ;;  %v7719_v20 = vpop.permute.xlu1 %5506  ;;  %v9199_v40 = vunpack.i.h.bf16 %v7000_v56  ;;  %v834_v42 = vsel %vm702_vm2, %v5469_v51, %v5473_v30  ;;  %v839_v41 = vsel %vm702_vm2, %v5484_v0, %v5488_v48  ;;  %v829_v56 = vsel %vm702_vm2, %v5448_v60, %v5449_v24  ;;  %v9200_v60 = vld [vmem:[#allocation28_spill] sm:$0xff] }
 0x152   :  { %4651 = vmatpush1.bf16.msra.mxu1 %v9198_v63  ;;  %v7721_v15 = vpop.permute.xlu0 %5501  ;;  %4428 = vmatmul.mubr.msk.f32.gmra.mrb[8].mxu0 %vm1766_vm5, %v2202_v10  ;;  %v5508_v1 = vunpack.i.l.bf16 %v7719_v20  ;;  %v5498_v62 = vunpack.i.l.bf16 %v7680_v34  ;;  %v5494_v53 = vunpack.i.h.bf16 %v7682_v6  ;;  %v4742_v58 = vpack.c.bf16 %v832_v37, %v829_v56 }
 0x153   :  { %4653 = vmatprep.subr.bf16.mxu1 %v4652_v26  ;;  %4739 = vmatpush1.bf16.msra.mxu0 %v4738_v13  ;;  %v714_v35 = vsel %vm702_vm2, %v9199_v40, %v5493_v25  ;;  %v9201_v24 = vunpack.i.h.bf16 %v9200_v60  ;;  %v5504_v31 = vunpack.i.h.bf16 %v7721_v15  ;;  %v838_v16 = vsel %vm702_vm2, %v5483_v49, %v5484_v0  ;;  %v7800_v49 = vld [vmem:[%s9039_s3 + $0xb0] sm:$0xff]  ;;  %v9207_v60 = vld [vmem:[#allocation48_spill] sm:$0xff] }
 0x154   :  { %2744 = vmatprep.mubr.f32.mxu1 %v7712_v57  ;;  %4741 = vmatprep.subr.bf16.mxu0 %v4740_v61  ;;  %v5503_v19 = vunpack.i.l.bf16 %v7721_v15  ;;  %v1079_v26 = vsel %vm953_vm3, %v5299_v39, %v5508_v1  ;;  %v835_v48 = vsel %vm702_vm2, %v5473_v30, %v5474_v46  ;;  %v5499_v25 = vunpack.i.h.bf16 %v7680_v34  ;;  %v7824_v39 = vld [vmem:[%s9039_s3 + $0xa8] sm:$0xff] }
 0x155   :  { %5781 = vrot.lane.b32.xlu1 %v5780_v17, %s6320_s9  ;;  %5776 = vrot.lane.b32.xlu0 %v7640_v29, %s6320_s9  ;;  %v4656_v17 = vpack.c.bf16 %v837_v11, %v834_v42  ;;  %v7768_v36 = vpop.permute.xlu1 %5516  ;;  %v711_v3 = vsel %vm702_vm2, %v9201_v24, %v5489_v23  ;;  %v836_v29 = vsel %vm702_vm2, %v5474_v46, %v5478_v22  ;;  %v5509_v9 = vunpack.i.h.bf16 %v7719_v20  ;;  %v9204_v46 = vld [vmem:[#allocation30_spill] sm:$0xff]  ;;  %v9210_v20 = vld [vmem:[#allocation31_spill] sm:$0xff] }
 0x156   :  { %2745 = vmatmul.mubr.f32.gmra.mrb[10].mxu1 %v7730_v28  ;;  %v5512_v27 = vpop.permute.xlu0 %5511  ;;  %2905 = vmatprep.mubr.f32.mxu0 %v9137_v7  ;;  %v4658_v50 = vpack.c.bf16 %v714_v35, %v711_v3  ;;  %v4744_v2 = vpack.c.bf16 %v839_v41, %v836_v29  ;;  %v840_v0 = vsel %vm702_vm2, %v5494_v53, %v5498_v62  ;;  %v9203_v63 = vunpack.i.h.bf16 %v9202_v59  ;;  %v9206_v42 = vld [vmem:[#allocation46_spill] sm:$0xff]  ;;  %v2211_v53 = vld [vmem:[%s9039_s3 + $0xb8] sm:$0xff] }
 0x157   :  { %4655 = vmatpush1.bf16.msra.mxu1 %v4654_v54  ;;  %v5514_v6 = vunpack.i.h.bf16 %v5512_v27  ;;  %4429 = vmatmul.mubr.msk.f32.gmra.mrb[10].mxu0 %vm1766_vm5, %v2205_v47  ;;  %v5513_v10 = vunpack.i.l.bf16 %v5512_v27  ;;  %v4746_v22 = vpack.c.bf16 %v838_v16, %v835_v48  ;;  %v9205_v23 = vunpack.i.h.bf16 %v9204_v46  ;;  %v9208_v16 = vld [vmem:[#allocation32_spill] sm:$0xff] }
 0x158   :  { %4657 = vmatprep.subr.bf16.mxu1 %v4656_v17  ;;  %4743 = vmatpush1.bf16.msra.mxu0 %v4742_v58  ;;  %v4660_v37 = vpack.c.bf16 %v1079_v26, %v840_v0  ;;  %v5519_v54 = vunpack.i.h.bf16 %v7768_v36  ;;  %v842_v40 = vsel %vm702_vm2, %v5499_v25, %v5503_v19  ;;  %v7842_v17 = vld [vmem:[%s9039_s3 + $0xc8] sm:$0xff]  ;;  %v9209_v19 = vunpack.i.l.bf16 %v9208_v16  ;;  %v7876_v0 = vld [vmem:[%s9039_s3 + $0xe0] sm:$0xff] }
 0x159   :  { %2750 = vmatprep.mubr.f32.mxu1 %v7766_v33  ;;  %4745 = vmatprep.subr.bf16.mxu0 %v4744_v2  ;;  %v7805_v30 = vpop.permute.xlu1 %5526  ;;  %v956_v13 = vsel %vm953_vm3, %v9203_v63, %v5514_v6  ;;  %v717_v11 = vsel %vm702_vm2, %v9205_v23, %v5504_v31  ;;  %v1081_v35 = vsel %vm953_vm3, %v5509_v9, %v5513_v10  ;;  %v7857_v31 = vld [vmem:[%s9039_s3 + $0xc0] sm:$0xff]  ;;  %v9211_v26 = vunpack.i.l.bf16 %v9210_v20 }
 0x15a   :  { %5791 = vrot.lane.b32.xlu1 %v9137_v7, %s6320_s9  ;;  %v7807_v51 = vpop.permute.xlu0 %5521  ;;  %5786 = vrot.lane.b32.xlu0 %v5785_v43, %s6320_s9  ;;  %v5529_v61 = vunpack.i.h.bf16 %v7805_v30  ;;  %v5528_v15 = vunpack.i.l.bf16 %v7805_v30  ;;  %v5518_v43 = vunpack.i.l.bf16 %v7768_v36  ;;  %v4662_v47 = vpack.c.bf16 %v956_v13, %v717_v11  ;;  %v2507_v30 = vld [vmem:[%s9040_s4 + $0x8] sm:$0xff] }
 0x15b   :  { %2751 = vmatmul.mubr.f32.gmra.mrb[12].mxu1 %v7780_v14  ;;  %2911 = vmatprep.mubr.f32.mxu0 %v9137_v7  ;;  %v5524_v41 = vunpack.i.h.bf16 %v7807_v51  ;;  %v5523_v56 = vunpack.i.l.bf16 %v7807_v51  ;;  %v4748_v2 = vpack.c.bf16 %v1081_v35, %v842_v40  ;;  %v7899_v40 = vld [vmem:[%s9039_s3 + $0xf8] sm:$0xff] }
 0x15c   :  { %4659 = vmatpush1.bf16.msra.mxu1 %v4658_v50  ;;  %4430 = vmatmul.mubr.msk.f32.gmra.mrb[12].mxu0 %vm1766_vm5, %v2208_v38  ;;  %v1085_v58 = vsel %vm953_vm3, %v5528_v15, %v5529_v61  ;;  %v1080_v50 = vsel %vm953_vm3, %v5508_v1, %v5509_v9  ;;  %v1082_v48 = vsel %vm953_vm3, %v5518_v43, %v5519_v54  ;;  %v9212_v15 = vld [vmem:[#allocation47_spill] sm:$0xff] }
 0x15d   :  { %2756 = vmatprep.mubr.f32.mxu1 %v7800_v49  ;;  %4747 = vmatpush1.bf16.msra.mxu0 %v4746_v22  ;;  %v5537_v36 = vpop.permute.xlu1 %5536  ;;  %v841_v38 = vsel %vm702_vm2, %v5498_v62, %v5499_v25  ;;  %v4664_v51 = vpack.c.bf16 %v1085_v58, %v1082_v48  ;;  %v2214_v62 = vld [vmem:[%s9039_s3 + $0xd0] sm:$0xff]  ;;  %v1084_v25 = vsel %vm953_vm3, %v5523_v56, %v5524_v41  ;;  %v7890_v22 = vld [vmem:[%s9039_s3 + $0xd8] sm:$0xff] }
 0x15e   :  { %2137 = vrot.lane.b32.xlu1 %v9206_v42, %s6320_s9  ;;  %v5532_v27 = vpop.permute.xlu0 %5531  ;;  %2135 = vrot.lane.b32.xlu0 %v9207_v60, %s6320_s9  ;;  %v5539_v24 = vunpack.i.h.bf16 %v5537_v36  ;;  %v5538_v3 = vunpack.i.l.bf16 %v5537_v36  ;;  %v4750_v13 = vpack.c.bf16 %v1080_v50, %v841_v38  ;;  %v7918_v60 = vld [vmem:[%s9039_s3 + $0xf0] sm:$0xff] }
 0x15f   :  { %2757 = vmatmul.mubr.f32.gmra.mrb[14].mxu1 %v7824_v39  ;;  %v5534_v29 = vunpack.i.h.bf16 %v5532_v27  ;;  %v5533_v6 = vunpack.i.l.bf16 %v5532_v27  ;;  %4661 = vmatprep.subr.bf16.mxu1 %v4660_v37  ;;  %v2506_v27 = vld [vmem:[%s9040_s4] sm:$0xff] }
 0x160   :  { %2917 = vmatprep.mubr.f32.mxu0 %v9137_v7  ;;  %2762 = vmatprep.mubr.f32.mxu1 %v7842_v17  ;;  %v959_v10 = vsel %vm953_vm3, %v9209_v19, %v5538_v3  ;;  %v962_v1 = vsel %vm953_vm3, %v9211_v26, %v5539_v24 }
 0x161   :  { %4431 = vmatmul.mubr.msk.f32.gmra.mrb[14].mxu0 %vm1766_vm5, %v2211_v53  ;;  %4663 = vmatpush1.bf16.msra.mxu1 %v4662_v47  ;;  %v5547_v9 = vpop.permute.xlu1 %5546  ;;  %v1087_v63 = vsel %vm953_vm3, %v5533_v6, %v5534_v29  ;;  %v4666_v34 = vpack.c.bf16 %v962_v1, %v959_v10  ;;  %v1086_v43 = vsel %vm953_vm3, %v5529_v61, %v5533_v6  ;;  %v2217_v61 = vld [vmem:[%s9039_s3 + $0xe8] sm:$0xff]  ;;  %v7926_v6 = vld [vmem:[%s9039_s3 + $0x110] sm:$0xff]  ;;  %v7939_v1 = vld [vmem:[%s9039_s3 + $0x100] sm:$0xff] }
 0x162   :  { %5796 = vrot.lane.b32.xlu1 %v9137_v7, %s6320_s9  ;;  %v5542_v59 = vpop.permute.xlu0 %5541  ;;  %2139 = vrot.lane.b32.xlu0 %v9212_v15, %s6320_s9  ;;  %v5549_v46 = vunpack.i.h.bf16 %v5547_v9  ;;  %v5548_v23 = vunpack.i.l.bf16 %v5547_v9  ;;  %v4752_v35 = vpack.c.bf16 %v1087_v63, %v1084_v25  ;;  %v1083_v47 = vsel %vm953_vm3, %v5519_v54, %v5523_v56  ;;  %v9213_v63 = vld [vmem:[#allocation33_spill] sm:$0xff] }
 0x163   :  { %2763 = vmatmul.mubr.f32.gmra.mrb[16].mxu1 %v7857_v31  ;;  %4749 = vmatprep.subr.bf16.mxu0 %v4748_v2  ;;  %v5544_v11 = vunpack.i.h.bf16 %v5542_v59  ;;  %v5543_v37 = vunpack.i.l.bf16 %v5542_v59  ;;  %v4754_v58 = vpack.c.bf16 %v1086_v43, %v1083_v47  ;;  %v7948_v59 = vld [vmem:[%s9039_s3 + $0x108] sm:$0xff] }
 0x164   :  { %2923 = vmatprep.mubr.f32.mxu0 %v9137_v7  ;;  %4751 = vmatpush1.bf16.msra.mxu0 %v4750_v13  ;;  %v1090_v3 = vsel %vm953_vm3, %v5548_v23, %v5549_v46  ;;  %v9214_v13 = vunpack.i.l.bf16 %v9213_v63 }
 0x165   :  { %2768 = vmatprep.mubr.f32.mxu1 %v7876_v0  ;;  %4432 = vmatmul.mubr.msk.f32.gmra.mrb[16].mxu0 %vm1766_vm5, %v2214_v62  ;;  %v5557_v42 = vpop.permute.xlu1 %5556  ;;  %v1088_v24 = vsel %vm953_vm3, %v5543_v37, %v5544_v11  ;;  %v1089_v26 = vsel %vm953_vm3, %v5544_v11, %v5548_v23  ;;  %v9215_v62 = vld [vmem:[#allocation34_spill] sm:$0xff]  ;;  %v6209_v37 = vld [vmem:[%s9037_s1 + $0x70] sm:$0xff] }
 0x166   :  { %4665 = vmatprep.subr.bf16.mxu1 %v4664_v51  ;;  %v5552_v41 = vpop.permute.xlu0 %5551  ;;  %2929 = vmatprep.mubr.f32.mxu0 %v9137_v7  ;;  %v5559_v53 = vunpack.i.h.bf16 %v5557_v42  ;;  %v5558_v36 = vunpack.i.l.bf16 %v5557_v42  ;;  %v2508_v51 = vld [vmem:[%s9040_s4 + $0x10] sm:$0xff]  ;;  %v9216_v25 = vunpack.i.l.bf16 %v9215_v62  ;;  %v7959_v23 = vld [vmem:[%s9039_s3 + $0x128] sm:$0xff] }
 0x167   :  { %2769 = vmatmul.mubr.f32.gmra.mrb[18].mxu1 %v7890_v22  ;;  %v5554_v54 = vunpack.i.h.bf16 %v5552_v41  ;;  %v5553_v56 = vunpack.i.l.bf16 %v5552_v41  ;;  %4753 = vmatprep.subr.bf16.mxu0 %v4752_v35  ;;  %v6208_v11 = vld [vmem:[%s9036_s0 + $0x28] sm:$0xff]  ;;  %v6210_v41 = vld [vmem:[%s9037_s1 + $0x60] sm:$0xff] }
 0x168   :  { %2774 = vmatprep.mubr.f32.mxu1 %v7899_v40  ;;  %4667 = vmatpush1.bf16.msra.mxu1 %v4666_v34  ;;  %v1093_v2 = vsel %vm953_vm3, %v5558_v36, %v5559_v53  ;;  %v4760_v43 = vpack.c.bf16 %v6209_v37, %v6208_v11  ;;  %v7980_v53 = vld [vmem:[%s9039_s3 + $0x118] sm:$0xff]  ;;  %v6217_v62 = vld [vmem:[%s9037_s1 + $0x28] sm:$0xff]  ;;  %v9219_v37 = vld [vmem:[#allocation39_spill] sm:$0xff] }
 0x169   :  { %v1092_v29 = vsel %vm953_vm3, %v5554_v54, %v5558_v36  ;;  %v1091_v50 = vsel %vm953_vm3, %v5553_v56, %v5554_v54  ;;  %2529 = vperm.xlu1 %5801, %v2507_v30   ;;  %4433 = vmatmul.mubr.msk.f32.gmra.mrb[18].mxu0 %vm1766_vm5, %v2217_v61  ;;  %v7931_v16 = vpop.permute.xlu1 %5566  ;;  %v4756_v20 = vpack.c.bf16 %v1093_v2, %v1090_v3  ;;  %v9217_v30 = vld [vmem:[#allocation50_spill] sm:$0xff]  ;;  %v6213_v2 = vld [vmem:[%s9037_s1 + $0x10] sm:$0xff] }
 0x16a   :  { %v5562_v19 = vpop.permute.xlu0 %5561  ;;  %v4668_v10 = vpack.c.bf16 %v1091_v50, %v1088_v24  ;;  %2524 = vperm.xlu0 %5800, %v2506_v27   ;;  %2935 = vmatprep.mubr.f32.mxu0 %v9137_v7  ;;  %v4758_v9 = vpack.c.bf16 %v1092_v29, %v1089_v26  ;;  %v4672_v61 = vpack.c.bf16 %v6210_v41, %v9217_v30  ;;  %v5569_v54 = vunpack.i.h.bf16 %v7931_v16  ;;  %v7988_v27 = vld [vmem:[%s9039_s3 + $0x120] sm:$0xff]  ;;  %v6212_v24 = vld [vmem:[%s9037_s1 + $0x68] sm:$0xff] }
 0x16b   :  { %2775 = vmatmul.mubr.f32.gmra.mrb[20].mxu1 %v7918_v60  ;;  %v5564_v48 = vunpack.i.h.bf16 %v5562_v19  ;;  %v5563_v38 = vunpack.i.l.bf16 %v5562_v19  ;;  %4755 = vmatpush1.bf16.msra.mxu0 %v4754_v58  ;;  %v5568_v56 = vunpack.i.l.bf16 %v7931_v16  ;;  %v6211_v58 = vld [vmem:[%s9036_s0 + $0x20] sm:$0xff]  ;;  %v6214_v16 = vld [vmem:[%s9036_s0 + $0x10] sm:$0xff] }
 0x16c   :  { %2780 = vmatprep.mubr.f32.mxu1 %v7926_v6  ;;  %4669 = vmatprep.subr.bf16.mxu1 %v4668_v10  ;;  %v4762_v3 = vpack.c.bf16 %v6212_v24, %v6211_v58  ;;  %v7999_v50 = vld [vmem:[%s9039_s3 + $0x140] sm:$0xff]  ;;  %v4674_v19 = vpack.c.bf16 %v6213_v2, %v6214_v16  ;;  %v4764_v10 = vpack.c.bf16 %v7318_v32, %v7290_v45  ;;  %v8023_v45 = vld [vmem:[%s9039_s3 + $0x130] sm:$0xff] }
 0x16d   :  { %v965_v34 = vsel %vm953_vm3, %v9214_v13, %v5563_v38  ;;  %v968_v46 = vsel %vm953_vm3, %v9216_v25, %v5564_v48  ;;  %4757 = vmatprep.subr.bf16.mxu0 %v4756_v20  ;;  %4434 = vmatmul.mubr.msk.f32.gmra.mrb[20].mxu0 %vm1766_vm5, %v7939_v1  ;;  %v7969_v47 = vpop.permute.xlu1 %5576  ;;  %v6215_v48 = vld [vmem:[%s9037_s1 + $0x78] sm:$0xff]  ;;  %v8027_v63 = vsel %vm1264_vm6, %v5568_v56, %v5569_v54  ;;  %v6216_v13 = vld [vmem:[%s9037_s1 + $0x80] sm:$0xff] }
 0x16e   :  { %v4670_v35 = vpack.c.bf16 %v968_v46, %v965_v34  ;;  %v5572_v42 = vpop.permute.xlu0 %5571  ;;  %2534 = vperm.xlu1 %5801, %v2508_v51   ;;  %2941 = vmatprep.mubr.f32.mxu0 %v9137_v7  ;;  %v4676_v38 = vpack.c.bf16 %v7276_v8, %v6215_v48  ;;  %v9218_v51 = vld [vmem:[#allocation51_spill] sm:$0xff]  ;;  %v8033_v8 = vld [vmem:[%s9039_s3 + $0x138] sm:$0xff]  ;;  %v4766_v34 = vpack.c.bf16 %v7313_v5, %v6216_v13  ;;  %v6218_v25 = vld [vmem:[%s9037_s1 + $0x40] sm:$0xff]  ;;  %v5579_v11 = vunpack.i.h.bf16 %v7969_v47 }
 0x16f   :  { %2781 = vmatmul.mubr.f32.gmra.mrb[22].mxu1 %v7948_v59  ;;  %v5573_v36 = vunpack.i.l.bf16 %v5572_v42  ;;  %4759 = vmatpush1.bf16.msra.mxu0 %v4758_v9  ;;  %v5574_v29 = vunpack.i.h.bf16 %v5572_v42  ;;  %v5414_v9 = vunpack.i.h.bf16 %v9218_v51  ;;  %v4678_v46 = vpack.c.bf16 %v6218_v25, %v6217_v62  ;;  %v8052_v5 = vld [vmem:[%s9039_s3 + $0x158] sm:$0xff] }
 0x170   :  { %2786 = vmatprep.mubr.f32.mxu1 %v7959_v23  ;;  %4671 = vmatpush1.bf16.msra.mxu1 %v4670_v35  ;;  %v5578_v48 = vunpack.i.l.bf16 %v7969_v47 }
 0x171   :  { %4761 = vmatprep.subr.bf16.mxu0 %v4760_v43  ;;  %4435 = vmatmul.mubr.msk.f32.gmra.mrb[22].mxu0 %vm1766_vm5, %v7980_v53  ;;  %v8011_v20 = vpop.permute.xlu1 %5586  ;;  %v1392_v32 = vsel %vm1264_vm6, %v5569_v54, %v5573_v36  ;;  %v9220_v43 = vunpack.i.h.bf16 %v9219_v37  ;;  %v1390_v41 = vsel %vm1264_vm6, %v5414_v9, %v5568_v56  ;;  %v8065_v56 = vld [vmem:[%s9039_s3 + $0x148] sm:$0xff]  ;;  %v2510_v37 = vld [vmem:[%s9040_s4 + $0x20] sm:$0xff] }
 0x172   :  { %v5582_v26 = vpop.permute.xlu0 %5581  ;;  %4673 = vmatprep.subr.bf16.mxu1 %v4672_v61  ;;  %2947 = vmatprep.mubr.f32.mxu0 %v9137_v7  ;;  %v5589_v30 = vunpack.i.h.bf16 %v8011_v20  ;;  %v5588_v61 = vunpack.i.l.bf16 %v8011_v20  ;;  %v4768_v24 = vpack.c.bf16 %v1392_v32, %v9212_v15  ;;  %v6220_v20 = vld [vmem:[%s9037_s1 + $0xa8] sm:$0xff] }
 0x173   :  { %2787 = vmatmul.mubr.f32.gmra.mrb[24].mxu1 %v7988_v27  ;;  %4763 = vmatpush1.bf16.msra.mxu0 %v4762_v3  ;;  %v1267_v35 = vsel %vm1264_vm6, %v9220_v43, %v5574_v29  ;;  %v5583_v42 = vunpack.i.l.bf16 %v5582_v26  ;;  %v5584_v36 = vunpack.i.h.bf16 %v5582_v26  ;;  %v4680_v26 = vpack.c.bf16 %v1390_v41, %v6220_v20  ;;  %v9223_v41 = vld [vmem:[#allocation43_spill] sm:$0xff] }
 0x174   :  { %2792 = vmatprep.mubr.f32.mxu1 %v7999_v50  ;;  %4675 = vmatpush1.bf16.msra.mxu1 %v4674_v19  ;;  %v6219_v19 = vld [vmem:[%s9037_s1 + $0xb0] sm:$0xff]  ;;  %v1396_v25 = vsel %vm1264_vm6, %v5588_v61, %v5589_v30 }
 0x175   :  { %4765 = vmatprep.subr.bf16.mxu0 %v4764_v10  ;;  %4436 = vmatmul.mubr.msk.f32.gmra.mrb[24].mxu0 %vm1766_vm5, %v8023_v45  ;;  %v5597_v54 = vpop.permute.xlu1 %5596  ;;  %v4770_v15 = vpack.c.bf16 %v8027_v63, %v6219_v19  ;;  %v8075_v10 = vld [vmem:[%s9039_s3 + $0x150] sm:$0xff]  ;;  %v1394_v9 = vsel %vm1264_vm6, %v5579_v11, %v5583_v42 }
 0x176   :  { %v5592_v58 = vpop.permute.xlu0 %5591  ;;  %4677 = vmatprep.subr.bf16.mxu1 %v4676_v38  ;;  %2953 = vmatprep.mubr.f32.mxu0 %v9137_v7  ;;  %v5599_v3 = vunpack.i.h.bf16 %v5597_v54  ;;  %v5598_v29 = vunpack.i.l.bf16 %v5597_v54  ;;  %v6221_v38 = vld [vmem:[%s9037_s1 + $0x58] sm:$0xff]  ;;  %v8089_v63 = vld [vmem:[%s9039_s3 + $0x170] sm:$0xff]  ;;  %v9224_v54 = vunpack.i.l.bf16 %v9223_v41 }
 0x177   :  { %2793 = vmatmul.mubr.f32.gmra.mrb[26].mxu1 %v8033_v8  ;;  %v5594_v2 = vunpack.i.h.bf16 %v5592_v58  ;;  %v5593_v16 = vunpack.i.l.bf16 %v5592_v58  ;;  %4767 = vmatpush1.bf16.msra.mxu0 %v4766_v34  ;;  %v4682_v51 = vpack.c.bf16 %v1267_v35, %v6221_v38  ;;  %v1395_v34 = vsel %vm1264_vm6, %v5583_v42, %v5584_v36  ;;  %v8116_v58 = vld [vmem:[%s9039_s3 + $0x168] sm:$0xff] }
 0x178   :  { %2798 = vmatprep.mubr.f32.mxu1 %v8052_v5  ;;  %4769 = vmatprep.subr.bf16.mxu0 %v4768_v24  ;;  %v1273_v42 = vsel %vm1264_vm6, %v9224_v54, %v5599_v3  ;;  %v1393_v3 = vsel %vm1264_vm6, %v5578_v48, %v5579_v11 }
 0x179   :  { %v1397_v32 = vsel %vm1264_vm6, %v5589_v30, %v5593_v16  ;;  %4679 = vmatpush1.bf16.msra.mxu1 %v4678_v46  ;;  %4437 = vmatmul.mubr.msk.f32.gmra.mrb[26].mxu0 %vm1766_vm5, %v8065_v56  ;;  %v5607_v47 = vpop.permute.xlu1 %5606  ;;  %v1398_v62 = vsel %vm1264_vm6, %v5593_v16, %v5594_v2  ;;  %v9221_v46 = vld [vmem:[#allocation42_spill] sm:$0xff]  ;;  %v8110_v30 = vld [vmem:[%s9039_s3 + $0x160] sm:$0xff]  ;;  %v4684_v20 = vpack.c.bf16 %v1396_v25, %v1393_v3 }
 0x17a   :  { %4681 = vmatprep.subr.bf16.mxu1 %v4680_v26  ;;  %v5602_v13 = vpop.permute.xlu0 %5601  ;;  %2959 = vmatprep.mubr.f32.mxu0 %v9137_v7  ;;  %v9222_v43 = vunpack.i.l.bf16 %v9221_v46  ;;  %v4774_v36 = vpack.c.bf16 %v1397_v32, %v1394_v9  ;;  %v5609_v61 = vunpack.i.h.bf16 %v5607_v47  ;;  %v5608_v24 = vunpack.i.l.bf16 %v5607_v47  ;;  %v2509_v32 = vld [vmem:[%s9040_s4 + $0x18] sm:$0xff]  ;;  %v9225_v3 = vld [vmem:[#allocation49_spill] sm:$0xff] }
 0x17b   :  { %2799 = vmatmul.mubr.f32.gmra.mrb[28].mxu1 %v8075_v10  ;;  %4771 = vmatpush1.bf16.msra.mxu0 %v4770_v15  ;;  %v5603_v2 = vunpack.i.l.bf16 %v5602_v13  ;;  %v4772_v16 = vpack.c.bf16 %v1398_v62, %v1395_v34  ;;  %v8126_v15 = vld [vmem:[%s9039_s3 + $0x178] sm:$0xff]  ;;  %v2512_v62 = vld [vmem:[%s9040_s4 + $0x30] sm:$0xff] }
 0x17c   :  { %v1270_v35 = vsel %vm1264_vm6, %v9222_v43, %v5598_v29  ;;  %2804 = vmatprep.mubr.f32.mxu1 %v8089_v63  ;;  %v5604_v29 = vunpack.i.h.bf16 %v5602_v13  ;;  %2544 = vperm.xlu1 %5801, %v2510_v37   ;;  %v1401_v34 = vsel %vm1264_vm6, %v5608_v24, %v5609_v61  ;;  %v6222_v43 = vld [vmem:[%s9039_s3 + $0x8] sm:$0xff] }
 0x17d   :  { %4683 = vmatpush1.bf16.msra.mxu1 %v4682_v51  ;;  %v4686_v19 = vpack.c.bf16 %v1273_v42, %v1270_v35  ;;  %4438 = vmatmul.mubr.msk.f32.gmra.mrb[28].mxu0 %vm1766_vm5, %v8110_v30  ;;  %v5617_v26 = vpop.permute.xlu1 %5616 }
 0x17e   :  { %4773 = vmatprep.subr.bf16.mxu0 %v4772_v16  ;;  %v5612_v38 = vpop.permute.xlu0 %5611  ;;  %2965 = vmatprep.mubr.f32.mxu0 %v9137_v7  ;;  %v5619_v51 = vunpack.i.h.bf16 %v5617_v26  ;;  %v5618_v11 = vunpack.i.l.bf16 %v5617_v26  ;;  %v1400_v47 = vsel %vm1264_vm6, %v5604_v29, %v5608_v24  ;;  %v1399_v13 = vsel %vm1264_vm6, %v5603_v2, %v5604_v29  ;;  %v2511_v29 = vld [vmem:[%s9040_s4 + $0x28] sm:$0xff]  ;;  %v2514_v2 = vld [vmem:[%s9040_s4 + $0x40] sm:$0xff]  ;;  %v9227_v26 = vld [vmem:[#allocation52_spill] sm:$0xff] }
 0x17f   :  { %2805 = vmatmul.mubr.f32.gmra.mrb[30].mxu1 %v8116_v58  ;;  %v5614_v48 = vunpack.i.h.bf16 %v5612_v38  ;;  %v5613_v9 = vunpack.i.l.bf16 %v5612_v38  ;;  %4685 = vmatprep.subr.bf16.mxu1 %v4684_v20  ;;  %v9228_v38 = vunpack.i.l.bf16 %v9227_v26 }
 0x180   :  { %4775 = vmatpush1.bf16.msra.mxu0 %v4774_v36  ;;  %v1404_v46 = vsel %vm1264_vm6, %v5618_v11, %v5619_v51  ;;  %3036 = vmatprep.mubr.f32.mxu1 %v6222_v43 }
 0x181   :  { %v1403_v25 = vsel %vm1264_vm6, %v5614_v48, %v5618_v11  ;;  %4687 = vmatpush1.bf16.msra.mxu1 %v4686_v19  ;;  %v1402_v37 = vsel %vm1264_vm6, %v5613_v9, %v5614_v48  ;;  %4439 = vmatmul.mubr.msk.f32.gmra.mrb[30].mxu0 %vm1766_vm5, %v8126_v15  ;;  %v5627_v41 = vpop.permute.xlu1 %5626  ;;  %v4776_v36 = vpack.c.bf16 %v1404_v46, %v1401_v34  ;;  %v9226_v19 = vunpack.i.l.bf16 %v9225_v3  ;;  %v2515_v3 = vld [vmem:[%s9040_s4 + $0x48] sm:$0xff] }
 0x182   :  { %v4778_v35 = vpack.c.bf16 %v1403_v25, %v1400_v47  ;;  %v5622_v54 = vpop.permute.xlu0 %5621  ;;  %v4688_v42 = vpack.c.bf16 %v1402_v37, %v1399_v13  ;;  %2539 = vperm.xlu0 %5800, %v2509_v32   ;;  %3358 = vmatprep.mubr.f32.mxu0 %v6222_v43  ;;  %v5628_v16 = vunpack.i.l.bf16 %v5627_v41  ;;  %v9229_v32 = vld [vmem:[#allocation56_spill] sm:$0xff]  ;;  %v2516_v37 = vld [vmem:[%s9040_s4 + $0x50] sm:$0xff] }
 0x183   :  { %v5624_v61 = vunpack.i.h.bf16 %v5622_v54  ;;  %v5623_v24 = vunpack.i.l.bf16 %v5622_v54  ;;  %2554 = vperm.xlu1 %5801, %v2512_v62   ;;  %4777 = vmatprep.subr.bf16.mxu0 %v4776_v36  ;;  %v5444_v47 = vunpack.i.h.bf16 %v9229_v32  ;;  %v2513_v62 = vld [vmem:[%s9040_s4 + $0x38] sm:$0xff]  ;;  %v5629_v54 = vunpack.i.h.bf16 %v5627_v41 }
 0x184   :  { %4689 = vmatprep.subr.bf16.mxu1 %v4688_v42  ;;  %4779 = vmatpush1.bf16.msra.mxu0 %v4778_v35  ;;  %v9230_v41 = vunpack.i.l.bf16 %v7453_v18  ;;  %v2517_v18 = vld [vmem:[%s9040_s4 + $0x58] sm:$0xff] }
 0x185   :  { %v1276_v20 = vsel %vm1264_vm6, %v9226_v19, %v5623_v24  ;;  %v1279_v51 = vsel %vm1264_vm6, %v9228_v38, %v5624_v61  ;;  %v5637_v48 = vpop.permute.xlu1 %5636  ;;  %v1641_v43 = vsel %vm1515_vm4, %v5444_v47, %v5628_v16  ;;  %v9231_v38 = vld [vmem:[#allocation55_spill] sm:$0xff]  ;;  %v1642_v32 = vsel %vm1515_vm4, %v5628_v16, %v5629_v54 }
 0x186   :  { %v4690_v11 = vpack.c.bf16 %v1279_v51, %v1276_v20  ;;  %v5632_v9 = vpop.permute.xlu0 %5631  ;;  %2549 = vperm.xlu0 %5800, %v2511_v29   ;;  %v5638_v13 = vunpack.i.l.bf16 %v5637_v48  ;;  %v5639_v25 = vunpack.i.h.bf16 %v5637_v48  ;;  %v2518_v20 = vld [vmem:[%s9040_s4 + $0x60] sm:$0xff]  ;;  %v9232_v51 = vunpack.i.l.bf16 %v9231_v38  ;;  %v2520_v16 = vld [vmem:[%s9040_s4 + $0x70] sm:$0xff] }
 0x187   :  { %v5634_v34 = vunpack.i.h.bf16 %v5632_v9  ;;  %2564 = vperm.xlu1 %5801, %v2514_v2   ;;  %v5633_v46 = vunpack.i.l.bf16 %v5632_v9 }
 0x188   :  { %4691 = vmatpush1.bf16.msra.mxu1 %v4690_v11  ;;  %v1645_v19 = vsel %vm1515_vm4, %v5638_v13, %v5639_v25 }
 0x189   :  { %v1644_v35 = vsel %vm1515_vm4, %v5634_v34, %v5638_v13  ;;  %v5647_v42 = vpop.permute.xlu1 %5646  ;;  %v1643_v48 = vsel %vm1515_vm4, %v5629_v54, %v5633_v46 }
 0x18a   :  { %v5642_v36 = vpop.permute.xlu0 %5641  ;;  %v4692_v61 = vpack.c.bf16 %v1644_v35, %v1641_v43  ;;  %2559 = vperm.xlu0 %5800, %v2513_v62   ;;  %v5648_v24 = vunpack.i.l.bf16 %v5647_v42 }
 0x18b   :  { %v5644_v29 = vunpack.i.h.bf16 %v5642_v36  ;;  %v5643_v2 = vunpack.i.l.bf16 %v5642_v36  ;;  %2574 = vperm.xlu1 %5801, %v2516_v37   ;;  %v4782_v37 = vpack.c.bf16 %v1645_v19, %v1642_v32  ;;  %v2519_v19 = vld [vmem:[%s9040_s4 + $0x68] sm:$0xff] }
 0x18c   :  { %4693 = vmatprep.subr.bf16.mxu1 %v4692_v61  ;;  %v1521_v26 = vsel %vm1515_vm4, %v9230_v41, %v5648_v24 }
 0x18d   :  { %v1518_v11 = vsel %vm1515_vm4, %v9232_v51, %v5644_v29  ;;  %v1646_v9 = vsel %vm1515_vm4, %v5639_v25, %v5643_v2  ;;  %v5657_v13 = vpop.permute.xlu1 %5656  ;;  %v5649_v25 = vunpack.i.h.bf16 %v5647_v42  ;;  %v6224_v42 = vld [vmem:[%s9039_s3 + $0x20] sm:$0xff] }
 0x18e   :  { %v4694_v47 = vpack.c.bf16 %v1521_v26, %v1518_v11  ;;  %v5652_v34 = vpop.permute.xlu0 %5651  ;;  %v4780_v62 = vpack.c.bf16 %v1646_v9, %v1643_v48  ;;  %2569 = vperm.xlu0 %5800, %v2515_v3   ;;  %v5658_v43 = vunpack.i.l.bf16 %v5657_v13  ;;  %v5659_v61 = vunpack.i.h.bf16 %v5657_v13  ;;  %v6223_v3 = vld [vmem:[%s9039_s3] sm:$0xff] }
 0x18f   :  { %2584 = vperm.xlu1 %5801, %v2518_v20   ;;  %v5654_v35 = vunpack.i.h.bf16 %v5652_v34  ;;  %v5653_v36 = vunpack.i.l.bf16 %v5652_v34 }
 0x190   :  { %4695 = vmatpush1.bf16.msra.mxu1 %v4694_v47  ;;  %4781 = vmatprep.subr.bf16.mxu0 %v4780_v62 }
 0x191   :  { %4783 = vmatpush1.bf16.msra.mxu0 %v4782_v37  ;;  %v5667_v46 = vpop.permute.xlu1 %5666  ;;  %v1648_v20 = vsel %vm1515_vm4, %v5653_v36, %v5654_v35  ;;  %v1647_v41 = vsel %vm1515_vm4, %v5649_v25, %v5653_v36  ;;  %v1649_v26 = vsel %vm1515_vm4, %v5654_v35, %v5658_v43  ;;  %v6225_v37 = vld [vmem:[%s9039_s3 + $0x18] sm:$0xff] }
 0x192   :  { %v5662_v54 = vpop.permute.xlu0 %5661  ;;  %2579 = vperm.xlu0 %5800, %v2517_v18   ;;  %v5668_v24 = vunpack.i.l.bf16 %v5667_v46  ;;  %v5669_v38 = vunpack.i.h.bf16 %v5667_v46  ;;  %v2521_v18 = vld [vmem:[%s9040_s4 + $0x78] sm:$0xff]  ;;  %v9235_v46 = vld [vmem:[#allocation35_spill] sm:$0xff] }
 0x193   :  { %v5664_v29 = vunpack.i.h.bf16 %v5662_v54  ;;  %v5663_v2 = vunpack.i.l.bf16 %v5662_v54  ;;  %3037 = vmatmul.mubr.f32.vlgmr.msra.gmra.mrb[32].mxu1 %v6223_v3  ;;  %2594 = vperm.xlu1 %5801, %v2520_v16   ;;  %v9233_v43 = vld [vmem:[#allocation36_spill] sm:$0xff]  ;;  %v9236_v54 = vunpack.i.h.bf16 %v9235_v46 }
 0x194   :  { %3359 = vmatmul.mubr.f32.vlgmr.msra.gmra.mrb[32].mxu0 %v6223_v3  ;;  %3042 = vmatprep.mubr.f32.mxu1 %v6224_v42  ;;  %v9234_v35 = vunpack.i.h.bf16 %v9233_v43  ;;  %v9239_v43 = vld [vmem:[#allocation14_spill] sm:$0xff] }
 0x195   :  { %v1651_v51 = vsel %vm1515_vm4, %v5663_v2, %v5664_v29  ;;  %3364 = vmatprep.mubr.f32.mxu0 %v6224_v42  ;;  %v1650_v11 = vsel %vm1515_vm4, %v5659_v61, %v5663_v2  ;;  %v1652_v48 = vsel %vm1515_vm4, %v5664_v29, %v5668_v24  ;;  %v5677_v32 = vpop.permute.xlu1 %5676  ;;  %v6226_v24 = vld [vmem:[%s9039_s3 + $0x38] sm:$0xff] }
 0x196   :  { %v4786_v9 = vpack.c.bf16 %v1651_v51, %v1648_v20  ;;  %v5672_v47 = vpop.permute.xlu0 %5671  ;;  %v4696_v13 = vpack.c.bf16 %v1650_v11, %v1647_v41  ;;  %v4784_v34 = vpack.c.bf16 %v1652_v48, %v1649_v26  ;;  %2589 = vperm.xlu0 %5800, %v2519_v19   ;;  %v1524_v36 = vsel %vm1515_vm4, %v9234_v35, %v5669_v38  ;;  %v6227_v38 = vld [vmem:[%s9039_s3 + $0x30] sm:$0xff] }
 0x197   :  { %v5673_v62 = vunpack.i.l.bf16 %v5672_v47  ;;  %3043 = vmatmul.mubr.f32.gmra.mrb[34].mxu1 %v6225_v37  ;;  %v5678_v16 = vunpack.i.l.bf16 %v5677_v32  ;;  %v5674_v25 = vunpack.i.h.bf16 %v5672_v47  ;;  %v5679_v42 = vunpack.i.h.bf16 %v5677_v32 }
 0x198   :  { %4697 = vmatprep.subr.bf16.mxu1 %v4696_v13  ;;  %3365 = vmatmul.mubr.f32.gmra.mrb[34].mxu0 %v6225_v37  ;;  %v9240_v35 = vunpack.i.h.bf16 %v9239_v43 }
 0x199   :  { %v1527_v61 = vsel %vm1515_vm4, %v9236_v54, %v5673_v62  ;;  %4785 = vmatprep.subr.bf16.mxu0 %v4784_v34  ;;  %3048 = vmatprep.mubr.f32.mxu1 %v6226_v24  ;;  %v5687_v2 = vpop.permute.xlu1 %5686  ;;  %v1653_v51 = vsel %vm1515_vm4, %v5674_v25, %v5678_v16  ;;  %v1654_v34 = vsel %vm1515_vm4, %v5678_v16, %v5679_v42  ;;  %v9237_v62 = vld [vmem:[#allocation13_spill] sm:$0xff] }
 0x19a   :  { %v4698_v29 = vpack.c.bf16 %v1527_v61, %v1524_v36  ;;  %4787 = vmatpush1.bf16.msra.mxu0 %v4786_v9  ;;  %v5682_v3 = vpop.permute.xlu0 %5681  ;;  %3370 = vmatprep.mubr.f32.mxu0 %v6226_v24  ;;  %v5689_v19 = vunpack.i.h.bf16 %v5687_v2  ;;  %v5688_v20 = vunpack.i.l.bf16 %v5687_v2  ;;  %v9238_v37 = vunpack.i.h.bf16 %v9237_v62 }
 0x19b   :  { %3049 = vmatmul.mubr.f32.gmra.mrb[36].mxu1 %v7569_v12  ;;  %2599 = vperm.xlu0 %5800, %v2521_v18   ;;  %v5684_v41 = vunpack.i.h.bf16 %v5682_v3  ;;  %v5683_v26 = vunpack.i.l.bf16 %v5682_v3 }
 0x19c   :  { %4699 = vmatpush1.bf16.msra.mxu1 %v4698_v29  ;;  %3371 = vmatmul.mubr.f32.gmra.mrb[36].mxu0 %v6227_v38  ;;  %v1892_v11 = vsel %vm1766_vm5, %v5688_v20, %v5689_v19 }
 0x19d   :  { %3054 = vmatprep.mubr.f32.mxu1 %v7604_v4  ;;  %3376 = vmatprep.mubr.f32.mxu0 %v7604_v4  ;;  %v5697_v48 = vpop.permute.xlu1 %5696  ;;  %v4700_v9 = vpack.c.bf16 %v1892_v11, %v1653_v51  ;;  %v1530_v18 = vsel %vm1515_vm4, %v9238_v37, %v5684_v41  ;;  %v1655_v4 = vsel %vm1515_vm4, %v5679_v42, %v5683_v26  ;;  %v9241_v37 = vld [vmem:[#allocation37_spill] sm:$0xff] }
 0x19e   :  { %v5692_v12 = vpop.permute.xlu0 %5691  ;;  %v5698_v32 = vunpack.i.l.bf16 %v5697_v48 }
 0x19f   :  { %v5694_v47 = vunpack.i.h.bf16 %v5692_v12  ;;  %v5693_v13 = vunpack.i.l.bf16 %v5692_v12  ;;  %3055 = vmatmul.mubr.f32.gmra.mrb[38].mxu1 %v7620_v55  ;;  %4701 = vmatprep.subr.bf16.mxu1 %v4700_v9 }
 0x1a0   :  { %3377 = vmatmul.mubr.f32.gmra.mrb[38].mxu0 %v7620_v55  ;;  %v1769_v36 = vsel %vm1766_vm5, %v9240_v35, %v5698_v32  ;;  %3060 = vmatprep.mubr.f32.mxu1 %v7657_v44  ;;  %v9243_v35 = vld [vmem:[#allocation38_spill] sm:$0xff] }
 0x1a1   :  { %v1893_v25 = vsel %vm1766_vm5, %v5689_v19, %v5693_v13  ;;  %3382 = vmatprep.mubr.f32.mxu0 %v7657_v44  ;;  %v1894_v16 = vsel %vm1766_vm5, %v5693_v13, %v5694_v47  ;;  %v4702_v46 = vpack.c.bf16 %v1769_v36, %v1530_v18  ;;  %v5707_v61 = vpop.permute.xlu1 %5706  ;;  %v5699_v19 = vunpack.i.h.bf16 %v5697_v48 }
 0x1a2   :  { %v4790_v54 = vpack.c.bf16 %v1893_v25, %v1654_v34  ;;  %v5702_v24 = vpop.permute.xlu0 %5701  ;;  %v4788_v29 = vpack.c.bf16 %v1894_v16, %v1655_v4  ;;  %v5708_v55 = vunpack.i.l.bf16 %v5707_v61  ;;  %v5709_v42 = vunpack.i.h.bf16 %v5707_v61 }
 0x1a3   :  { %3061 = vmatmul.mubr.f32.gmra.mrb[40].mxu1 %v7678_v52  ;;  %v5704_v2 = vunpack.i.h.bf16 %v5702_v24  ;;  %v5703_v3 = vunpack.i.l.bf16 %v5702_v24  ;;  %v9242_v18 = vunpack.i.l.bf16 %v9241_v37  ;;  %v9244_v36 = vunpack.i.l.bf16 %v9243_v35 }
 0x1a4   :  { %4703 = vmatpush1.bf16.msra.mxu1 %v4702_v46  ;;  %3383 = vmatmul.mubr.f32.gmra.mrb[40].mxu0 %v7678_v52 }
 0x1a5   :  { %4789 = vmatprep.subr.bf16.mxu0 %v4788_v29  ;;  %3066 = vmatprep.mubr.f32.mxu1 %v7712_v57  ;;  %v5717_v44 = vpop.permute.xlu1 %5716  ;;  %v1896_v51 = vsel %vm1766_vm5, %v5703_v3, %v5704_v2  ;;  %v1895_v52 = vsel %vm1766_vm5, %v5699_v19, %v5703_v3  ;;  %v1897_v11 = vsel %vm1766_vm5, %v5704_v2, %v5708_v55 }
 0x1a6   :  { %4791 = vmatpush1.bf16.msra.mxu0 %v4790_v54  ;;  %v5712_v20 = vpop.permute.xlu0 %5711  ;;  %3388 = vmatprep.mubr.f32.mxu0 %v7712_v57  ;;  %v5718_v41 = vunpack.i.l.bf16 %v5717_v44  ;;  %v5719_v48 = vunpack.i.h.bf16 %v5717_v44 }
 0x1a7   :  { %v5714_v26 = vunpack.i.h.bf16 %v5712_v20  ;;  %v5713_v38 = vunpack.i.l.bf16 %v5712_v20  ;;  %3067 = vmatmul.mubr.f32.gmra.mrb[42].mxu1 %v7730_v28 }
 0x1a8   :  { %3389 = vmatmul.mubr.f32.gmra.mrb[42].mxu0 %v7730_v28  ;;  %3072 = vmatprep.mubr.f32.mxu1 %v7766_v33  ;;  %v1772_v4 = vsel %vm1766_vm5, %v9242_v18, %v5719_v48 }
 0x1a9   :  { %v1899_v12 = vsel %vm1766_vm5, %v5713_v38, %v5714_v26  ;;  %3394 = vmatprep.mubr.f32.mxu0 %v7766_v33  ;;  %v1898_v57 = vsel %vm1766_vm5, %v5709_v42, %v5713_v38  ;;  %v1900_v9 = vsel %vm1766_vm5, %v5714_v26, %v5718_v41  ;;  %v5727_v47 = vpop.permute.xlu1 %5726  ;;  %v9245_v42 = vld [vmem:[#allocation40_spill] sm:$0xff]  ;;  %v9247_v38 = vld [vmem:[#allocation41_spill] sm:$0xff] }
 0x1aa   :  { %v4794_v32 = vpack.c.bf16 %v1899_v12, %v1896_v51  ;;  %v5722_v13 = vpop.permute.xlu0 %5721  ;;  %v4704_v34 = vpack.c.bf16 %v1898_v57, %v1895_v52  ;;  %v4792_v28 = vpack.c.bf16 %v1900_v9, %v1897_v11  ;;  %v5728_v33 = vunpack.i.l.bf16 %v5727_v47 }
 0x1ab   :  { %v5723_v62 = vunpack.i.l.bf16 %v5722_v13  ;;  %3073 = vmatmul.mubr.f32.gmra.mrb[44].mxu1 %v7780_v14  ;;  %v5724_v43 = vunpack.i.h.bf16 %v5722_v13  ;;  %v9246_v41 = vunpack.i.l.bf16 %v9245_v42  ;;  %v9248_v51 = vunpack.i.l.bf16 %v9247_v38 }
 0x1ac   :  { %4705 = vmatprep.subr.bf16.mxu1 %v4704_v34  ;;  %3395 = vmatmul.mubr.f32.gmra.mrb[44].mxu0 %v7780_v14 }
 0x1ad   :  { %v1775_v25 = vsel %vm1766_vm5, %v9244_v36, %v5723_v62  ;;  %4793 = vmatprep.subr.bf16.mxu0 %v4792_v28  ;;  %3078 = vmatprep.mubr.f32.mxu1 %v7800_v49  ;;  %v5737_v46 = vpop.permute.xlu1 %5736  ;;  %v1901_v24 = vsel %vm1766_vm5, %v5724_v43, %v5728_v33 }
 0x1ae   :  { %v4706_v16 = vpack.c.bf16 %v1775_v25, %v1772_v4  ;;  %4795 = vmatpush1.bf16.msra.mxu0 %v4794_v32  ;;  %v5732_v54 = vpop.permute.xlu0 %5731  ;;  %3400 = vmatprep.mubr.f32.mxu0 %v7800_v49  ;;  %v5738_v14 = vunpack.i.l.bf16 %v5737_v46  ;;  %v5739_v55 = vunpack.i.h.bf16 %v5737_v46  ;;  %v5729_v49 = vunpack.i.h.bf16 %v5727_v47 }
 0x1af   :  { %v5734_v61 = vunpack.i.h.bf16 %v5732_v54  ;;  %3079 = vmatmul.mubr.f32.gmra.mrb[46].mxu1 %v7824_v39  ;;  %v5733_v3 = vunpack.i.l.bf16 %v5732_v54 }
 0x1b0   :  { %4707 = vmatpush1.bf16.msra.mxu1 %v4706_v16  ;;  %3401 = vmatmul.mubr.f32.gmra.mrb[46].mxu0 %v7824_v39  ;;  %v1902_v48 = vsel %vm1766_vm5, %v5728_v33, %v5729_v49 }
 0x1b1   :  { %3084 = vmatprep.mubr.f32.mxu1 %v7842_v17  ;;  %3406 = vmatprep.mubr.f32.mxu0 %v7842_v17  ;;  %v1904_v29 = vsel %vm1766_vm5, %v5734_v61, %v5738_v14  ;;  %v1905_v17 = vsel %vm1766_vm5, %v5738_v14, %v5739_v55 }
 0x1b2   :  { %v4708_v2 = vpack.c.bf16 %v1904_v29, %v1901_v24  ;;  %v4798_v9 = vpack.c.bf16 %v1905_v17, %v1902_v48 }
 0x1b3   :  { %v1765_v19 = vpop.permute.xlu1 %1764  ;;  %3085 = vmatmul.mubr.f32.gmra.mrb[48].mxu1 %v7857_v31  ;;  %v5742_v44 = vpop.permute.xlu0 %5741 }
 0x1b4   :  { %4709 = vmatprep.subr.bf16.mxu1 %v4708_v2  ;;  %3407 = vmatmul.mubr.f32.gmra.mrb[48].mxu0 %v7857_v31  ;;  %v5744_v39 = vunpack.i.h.bf16 %v5742_v44  ;;  %v5743_v20 = vunpack.i.l.bf16 %v5742_v44  ;;  %v1781_v26 = vsel %vm1766_vm5, %v9246_v41, %v1765_v19  ;;  %v1903_v31 = vsel %vm1766_vm5, %v5729_v49, %v5733_v3  ;;  %v9251_v3 = vld [vmem:[#allocation45_spill] sm:$0xff] }
 0x1b5   :  { %3090 = vmatprep.mubr.f32.mxu1 %v7876_v0  ;;  %3412 = vmatprep.mubr.f32.mxu0 %v7876_v0  ;;  %v9252_v19 = vunpack.i.h.bf16 %v9251_v3 }
 0x1b6   :  { %v1778_v52 = vsel %vm1766_vm5, %v9248_v51, %v5744_v39  ;;  %v1906_v11 = vsel %vm1766_vm5, %v5739_v55, %v5743_v20  ;;  %v9249_v55 = vld [vmem:[#allocation44_spill] sm:$0xff] }
 0x1b7   :  { %3091 = vmatmul.mubr.f32.gmra.mrb[50].mxu1 %v7890_v22  ;;  %v4710_v12 = vpack.c.bf16 %v1781_v26, %v1778_v52  ;;  %v4796_v57 = vpack.c.bf16 %v1906_v11, %v1903_v31  ;;  %v9250_v2 = vunpack.i.h.bf16 %v9249_v55 }
 0x1b8   :  { %v5752_v0 = vpop.permute.xlu1 %5751  ;;  %3413 = vmatmul.mubr.f32.gmra.mrb[50].mxu0 %v7890_v22  ;;  %3096 = vmatprep.mubr.f32.mxu1 %v7899_v40  ;;  %v5747_v32 = vpop.permute.xlu0 %5746 }
 0x1b9   :  { %3418 = vmatprep.mubr.f32.mxu0 %v7899_v40  ;;  %4711 = vmatpush1.bf16.msra.mxu1 %v4710_v12  ;;  %v5754_v47 = vunpack.i.h.bf16 %v5752_v0  ;;  %v5753_v13 = vunpack.i.l.bf16 %v5752_v0  ;;  %v5749_v34 = vunpack.i.h.bf16 %v5747_v32  ;;  %v5748_v22 = vunpack.i.l.bf16 %v5747_v32  ;;  %v9253_v12 = vld [vmem:[#allocation54_spill] sm:$0xff] }
 0x1ba   :  { %4797 = vmatprep.subr.bf16.mxu0 %v4796_v57  ;;  %v9254_v0 = vunpack.i.h.bf16 %v9253_v12 }
 0x1bb   :  { %4799 = vmatpush1.bf16.msra.mxu0 %v4798_v9  ;;  %3097 = vmatmul.mubr.f32.gmra.mrb[52].mxu1 %v7918_v60  ;;  %v2144_v33 = vsel %vm2017_vm7, %v5749_v34, %v5753_v13  ;;  %v2145_v43 = vsel %vm2017_vm7, %v5753_v13, %v5754_v47  ;;  %v9255_v9 = vld [vmem:[#allocation53_spill] sm:$0xff] }
 0x1bc   :  { %3419 = vmatmul.mubr.f32.gmra.mrb[52].mxu0 %v7918_v60  ;;  %3102 = vmatprep.mubr.f32.mxu1 %v7926_v6  ;;  %v9256_v32 = vunpack.i.h.bf16 %v9255_v9 }
 0x1bd   :  { %v5762_v28 = vpop.permute.xlu1 %5761  ;;  %3424 = vmatprep.mubr.f32.mxu0 %v7926_v6  ;;  %v5757_v18 = vpop.permute.xlu0 %5756  ;;  %v2143_v6 = vsel %vm2017_vm7, %v5748_v22, %v5749_v34 }
 0x1be   :  { %v5764_v62 = vunpack.i.h.bf16 %v5762_v28  ;;  %v5763_v37 = vunpack.i.l.bf16 %v5762_v28  ;;  %v5759_v40 = vunpack.i.h.bf16 %v5757_v18  ;;  %v5758_v4 = vunpack.i.l.bf16 %v5757_v18 }
 0x1bf   :  { %3103 = vmatmul.mubr.f32.gmra.mrb[54].mxu1 %v7948_v59 }
 0x1c0   :  { %3425 = vmatmul.mubr.f32.gmra.mrb[54].mxu0 %v7948_v59  ;;  %v2148_v60 = vsel %vm2017_vm7, %v5763_v37, %v5764_v62  ;;  %3108 = vmatprep.mubr.f32.mxu1 %v7959_v23  ;;  %v2147_v35 = vsel %vm2017_vm7, %v5759_v40, %v5763_v37  ;;  %v2146_v36 = vsel %vm2017_vm7, %v5758_v4, %v5759_v40 }
 0x1c1   :  { %v4800_v25 = vpack.c.bf16 %v2148_v60, %v2145_v43  ;;  %3430 = vmatprep.mubr.f32.mxu0 %v7959_v23  ;;  %v4802_v16 = vpack.c.bf16 %v2147_v35, %v2144_v33  ;;  %v4712_v54 = vpack.c.bf16 %v2146_v36, %v2143_v6  ;;  %v6230_v36 = vld [vmem:[%s9039_s3 + $0x40] sm:$0xff] }
 0x1c2   :  { %v5772_v46 = vpop.permute.xlu1 %5771  ;;  %v5767_v14 = vpop.permute.xlu0 %5766 }
 0x1c3   :  { %4801 = vmatprep.subr.bf16.mxu0 %v4800_v25  ;;  %3109 = vmatmul.mubr.f32.gmra.mrb[56].mxu1 %v7988_v27  ;;  %v5769_v59 = vunpack.i.h.bf16 %v5767_v14  ;;  %v5768_v61 = vunpack.i.l.bf16 %v5767_v14  ;;  %v5774_v24 = vunpack.i.h.bf16 %v5772_v46  ;;  %v5773_v29 = vunpack.i.l.bf16 %v5772_v46  ;;  %v6231_v25 = vld [vmem:[%s9039_s3 + $0x58] sm:$0xff]  ;;  %v6233_v46 = vld [vmem:[%s9039_s3 + $0x88] sm:$0xff] }
 0x1c4   :  { %4713 = vmatprep.subr.bf16.mxu1 %v4712_v54  ;;  %4803 = vmatpush1.bf16.msra.mxu0 %v4802_v16  ;;  %v6232_v16 = vld [vmem:[%s9039_s3 + $0x70] sm:$0xff]  ;;  %v6234_v54 = vld [vmem:[%s9039_s3 + $0xa0] sm:$0xff]  ;;  %v6235_v14 = vld [vmem:[%s9039_s3 + $0xb8] sm:$0xff] }
 0x1c5   :  { %3431 = vmatmul.mubr.f32.gmra.mrb[56].mxu0 %v7988_v27  ;;  %3114 = vmatprep.mubr.f32.mxu1 %v7999_v50  ;;  %v2023_v23 = vsel %vm2017_vm7, %v9250_v2, %v5769_v59  ;;  %v2020_v49 = vsel %vm2017_vm7, %v9252_v19, %v5768_v61  ;;  %v2149_v42 = vsel %vm2017_vm7, %v5773_v29, %v5774_v24  ;;  %v6236_v59 = vld [vmem:[%s9039_s3 + $0xd0] sm:$0xff]  ;;  %v6237_v61 = vld [vmem:[%s9039_s3 + $0xe8] sm:$0xff] }
 0x1c6   :  { %3436 = vmatprep.mubr.f32.mxu0 %v7999_v50  ;;  %v4714_v44 = vpack.c.bf16 %v2023_v23, %v2020_v49 }
 0x1c7   :  { %v5782_v39 = vpop.permute.xlu1 %5781  ;;  %3115 = vmatmul.mubr.f32.gmra.mrb[58].mxu1 %v8033_v8  ;;  %v5777_v17 = vpop.permute.xlu0 %5776 }
 0x1c8   :  { %v5784_v20 = vunpack.i.h.bf16 %v5782_v39  ;;  %v5783_v27 = vunpack.i.l.bf16 %v5782_v39  ;;  %3120 = vmatprep.mubr.f32.mxu1 %v8052_v5  ;;  %4715 = vmatpush1.bf16.msra.mxu1 %v4714_v44  ;;  %v5778_v26 = vunpack.i.l.bf16 %v5777_v17  ;;  %v5779_v38 = vunpack.i.h.bf16 %v5777_v17 }
 0x1c9   :  { %3437 = vmatmul.mubr.f32.gmra.mrb[58].mxu0 %v8033_v8 }
 0x1ca   :  { %v2152_v41 = vsel %vm2017_vm7, %v5783_v27, %v5784_v20  ;;  %3442 = vmatprep.mubr.f32.mxu0 %v8052_v5  ;;  %v2150_v5 = vsel %vm2017_vm7, %v5774_v24, %v5778_v26  ;;  %v2151_v22 = vsel %vm2017_vm7, %v5778_v26, %v5779_v38 }
 0x1cb   :  { %v4716_v50 = vpack.c.bf16 %v2152_v41, %v2149_v42  ;;  %3121 = vmatmul.mubr.f32.gmra.mrb[60].mxu1 %v8075_v10 }
 0x1cc   :  { %v5792_v51 = vpop.permute.xlu1 %5791  ;;  %3126 = vmatprep.mubr.f32.mxu1 %v8089_v63  ;;  %v5787_v11 = vpop.permute.xlu0 %5786 }
 0x1cd   :  { %v5794_v52 = vunpack.i.h.bf16 %v5792_v51  ;;  %v5793_v31 = vunpack.i.l.bf16 %v5792_v51  ;;  %4717 = vmatprep.subr.bf16.mxu1 %v4716_v50  ;;  %3443 = vmatmul.mubr.f32.gmra.mrb[60].mxu0 %v8075_v10  ;;  %v5789_v8 = vunpack.i.h.bf16 %v5787_v11  ;;  %v5788_v48 = vunpack.i.l.bf16 %v5787_v11 }
 0x1ce   :  { %3448 = vmatprep.mubr.f32.mxu0 %v8089_v63 }
 0x1cf   :  { %v2026_v57 = vsel %vm2017_vm7, %v9254_v0, %v5793_v31  ;;  %v2029_v47 = vsel %vm2017_vm7, %v9256_v32, %v5794_v52  ;;  %3127 = vmatmul.mubr.f32.gmra.mrb[62].mxu1 %v8116_v58  ;;  %v2153_v34 = vsel %vm2017_vm7, %v5784_v20, %v5788_v48  ;;  %v2154_v63 = vsel %vm2017_vm7, %v5788_v48, %v5789_v8 }
 0x1d0   :  { %v4718_v13 = vpack.c.bf16 %v2029_v47, %v2026_v57  ;;  %v2138_v10 = vpop.permute.xlu1 %2137  ;;  %3197 = vmatprep.mubr.f32.mxu1 %v9137_v7  ;;  %v4806_v28 = vpack.c.bf16 %v2153_v34, %v2150_v5  ;;  %v2136_v62 = vpop.permute.xlu0 %2135  ;;  %v4804_v37 = vpack.c.bf16 %v2154_v63, %v2151_v22  ;;  %v3616_v48 = vlaneseq }
 0x1d1   :  { %3449 = vmatmul.mubr.f32.gmra.mrb[62].mxu0 %v8116_v58  ;;  %v2155_v18 = vsel %vm2017_vm7, %v2136_v62, %v2138_v10  ;;  %v6228_v58 = vld [vmem:[%s9039_s3 + $0x10] sm:$0xff] }
 0x1d2   :  { %4719 = vmatpush1.bf16.msra.mxu1 %v4718_v13  ;;  %3519 = vmatprep.mubr.f32.mxu0 %v9137_v7 }
 0x1d3   :  { %4805 = vmatprep.subr.bf16.mxu0 %v4804_v37  ;;  %3157 = vmatprep.subr.mxu1 %v2155_v18 }
 0x1d4   :  { %4807 = vmatpush1.bf16.msra.mxu0 %v4806_v28  ;;  %v5797_v40 = vpop.permute.xlu1 %5796  ;;  %v2140_v43 = vpop.permute.xlu0 %2139 }
 0x1d5   :  { %v5799_v4 = vunpack.i.h.bf16 %v5797_v40  ;;  %v5798_v33 = vunpack.i.l.bf16 %v5797_v40  ;;  %v2156_v6 = vsel %vm2017_vm7, %v2138_v10, %v2140_v43  ;;  %v8461_v10 = vand.u32 127, %v3616_v48 }
 0x1d7   :  { %v2032_v60 = vsel %vm2017_vm7, %v7475_v21, %v5799_v4  ;;  %v2157_v35 = vsel %vm2017_vm7, %v2140_v43, %v5798_v33  ;;  %v6229_v21 = vld [vmem:[%s9039_s3 + $0x28] sm:$0xff]  ;;  %s6322_s3 = smov [#allocation8]  }
 0x1d8   :  { %3158 = vmatpush1.msra.mxu1 %v2032_v60  ;;  %3479 = vmatprep.subr.mxu0 %v2157_v35  ;;  %v8467_v43 = vmul.u32.u64.low 2863311531, %v8461_v10  ;;  %v8468_v60 = vmul.u32.u64.high 2863311531, %v8461_v10, %v8467_v43  ;;  %v8471_v35 = vadd.s32 128, %v8461_v10  ;;  %s4393_s30 = sshll.u32 %s6322_s3, 4  ;;  %s8920_s30 = int_to_ptr.vmem [resolvable:$true] %s4393_s30 }
 0x1d9   :  { %4440 = vmatmul.mubr.msk.f32.vlgmr.msra.gmra.mrb[32].mxu1 %vm1766_vm5, %v6228_v58  ;;  %3480 = vmatpush1.msra.mxu0 %v2156_v6  ;;  %s6260_s13 = scalar_lea.vmem %s8920_s30, 3072  ;;  %p6265_p9 = scmp.lt.s32.totalorder %s8920_s30, %s8920_s30 }
 0x1da   :  { %4456 = vmatmul.mubr.msk.f32.vlgmr.msra.gmra.mrb[32].mxu0 %vm1766_vm5, %v6228_v58  ;;  %3203 = vmatprep.mubr.f32.mxu1 %v9137_v7  ;;  %p6261_p8 = scmp.ne.s32.totalorder %s8920_s30, %s6260_s13  ;;  %p6266_p10 = scmp.lt.s32.totalorder %s6260_s13, %s6260_s13 }
 0x1db   :  { %3525 = vmatprep.mubr.f32.mxu0 %v9137_v7 }
 0x1dc   :  { %p6267_p11 = por %p6266_p10, %p6265_p9 }
 0x1dd   :  { %4441 = vmatmul.mubr.msk.f32.gmra.mrb[34].mxu1 %vm1766_vm5, %v6229_v21 }
 0x1de   :  { %4457 = vmatmul.mubr.msk.f32.gmra.mrb[34].mxu0 %vm1766_vm5, %v6229_v21  ;;  %3209 = vmatprep.mubr.f32.mxu1 %v9137_v7  ;;  %p6268_p12 = pnand %p6267_p11, %p6261_p8 }
 0x1df   :  { %3531 = vmatprep.mubr.f32.mxu0 %v9137_v7 }
 0x1e1   :  { %4442 = vmatmul.mubr.msk.f32.gmra.mrb[36].mxu1 %vm1766_vm5, %v6230_v36 }
 0x1e2   :  { %4458 = vmatmul.mubr.msk.f32.gmra.mrb[36].mxu0 %vm1766_vm5, %v6230_v36  ;;  %3215 = vmatprep.mubr.f32.mxu1 %v9137_v7 }
 0x1e3   :  { %3537 = vmatprep.mubr.f32.mxu0 %v9137_v7 }
 0x1e5   :  { %4443 = vmatmul.mubr.msk.f32.gmra.mrb[38].mxu1 %vm1766_vm5, %v6231_v25 }
 0x1e6   :  { %4459 = vmatmul.mubr.msk.f32.gmra.mrb[38].mxu0 %vm1766_vm5, %v6231_v25  ;;  %3221 = vmatprep.mubr.f32.mxu1 %v9137_v7 }
 0x1e7   :  { %3543 = vmatprep.mubr.f32.mxu0 %v9137_v7 }
 0x1e8   :  { %v8445_v23 = vpop.permute.xlu1 %2529 }
 0x1e9   :  { %4444 = vmatmul.mubr.msk.f32.gmra.mrb[40].mxu1 %vm1766_vm5, %v6232_v16 }
 0x1ea   :  { %4460 = vmatmul.mubr.msk.f32.gmra.mrb[40].mxu0 %vm1766_vm5, %v6232_v16  ;;  %3227 = vmatprep.mubr.f32.mxu1 %v9137_v7 }
 0x1eb   :  { %3549 = vmatprep.mubr.f32.mxu0 %v9137_v7 }
 0x1ed   :  { %4445 = vmatmul.mubr.msk.f32.gmra.mrb[42].mxu1 %vm1766_vm5, %v6233_v46  ;;  %v8453_v41 = vpop.permute.xlu1 %2534 }
 0x1ee   :  { %4461 = vmatmul.mubr.msk.f32.gmra.mrb[42].mxu0 %vm1766_vm5, %v6233_v46  ;;  %3233 = vmatprep.mubr.f32.mxu1 %v9137_v7 }
 0x1ef   :  { %3555 = vmatprep.mubr.f32.mxu0 %v9137_v7 }
 0x1f1   :  { %4446 = vmatmul.mubr.msk.f32.gmra.mrb[44].mxu1 %vm1766_vm5, %v6234_v54 }
 0x1f2   :  { %4462 = vmatmul.mubr.msk.f32.gmra.mrb[44].mxu0 %vm1766_vm5, %v6234_v54  ;;  %3239 = vmatprep.mubr.f32.mxu1 %v9137_v7 }
 0x1f3   :  { %3561 = vmatprep.mubr.f32.mxu0 %v9137_v7 }
 0x1f5   :  { %4447 = vmatmul.mubr.msk.f32.gmra.mrb[46].mxu1 %vm1766_vm5, %v6235_v14 }
 0x1f6   :  { %4463 = vmatmul.mubr.msk.f32.gmra.mrb[46].mxu0 %vm1766_vm5, %v6235_v14  ;;  %3245 = vmatprep.mubr.f32.mxu1 %v9137_v7 }
 0x1f7   :  { %3567 = vmatprep.mubr.f32.mxu0 %v9137_v7 }
 0x1f9   :  { %4448 = vmatmul.mubr.msk.f32.gmra.mrb[48].mxu1 %vm1766_vm5, %v6236_v59 }
 0x1fa   :  { %4464 = vmatmul.mubr.msk.f32.gmra.mrb[48].mxu0 %vm1766_vm5, %v6236_v59  ;;  %3251 = vmatprep.mubr.f32.mxu1 %v9137_v7 }
 0x1fb   :  { %3573 = vmatprep.mubr.f32.mxu0 %v9137_v7  ;;  %v8463_v22 = vpop.permute.xlu1 %2544 }
 0x1fd   :  { %4449 = vmatmul.mubr.msk.f32.gmra.mrb[50].mxu1 %vm1766_vm5, %v6237_v61 }
 0x1fe   :  { %4465 = vmatmul.mubr.msk.f32.gmra.mrb[50].mxu0 %vm1766_vm5, %v6237_v61  ;;  %3257 = vmatprep.mubr.f32.mxu1 %v9137_v7 }
 0x1ff   :  { %3579 = vmatprep.mubr.f32.mxu0 %v9137_v7 }
 0x201   :  { %4450 = vmatmul.mubr.msk.f32.gmra.mrb[52].mxu1 %vm1766_vm5, %v7939_v1 }
 0x202   :  { %4466 = vmatmul.mubr.msk.f32.gmra.mrb[52].mxu0 %vm1766_vm5, %v7939_v1  ;;  %3263 = vmatprep.mubr.f32.mxu1 %v9137_v7 }
 0x203   :  { %3585 = vmatprep.mubr.f32.mxu0 %v9137_v7 }
 0x205   :  { %4451 = vmatmul.mubr.msk.f32.gmra.mrb[54].mxu1 %vm1766_vm5, %v7980_v53 }
 0x206   :  { %4467 = vmatmul.mubr.msk.f32.gmra.mrb[54].mxu0 %vm1766_vm5, %v7980_v53  ;;  %3269 = vmatprep.mubr.f32.mxu1 %v9137_v7  ;;  %v8435_v53 = vpop.permute.xlu0 %2524 }
 0x207   :  { %3591 = vmatprep.mubr.f32.mxu0 %v9137_v7 }
 0x209   :  { %4452 = vmatmul.mubr.msk.f32.gmra.mrb[56].mxu1 %vm1766_vm5, %v8023_v45 }
 0x20a   :  { %4468 = vmatmul.mubr.msk.f32.gmra.mrb[56].mxu0 %vm1766_vm5, %v8023_v45  ;;  %3275 = vmatprep.mubr.f32.mxu1 %v9137_v7  ;;  %v8457_v57 = vpop.permute.xlu0 %2539 }
 0x20b   :  { %3597 = vmatprep.mubr.f32.mxu0 %v9137_v7 }
 0x20d   :  { %4453 = vmatmul.mubr.msk.f32.gmra.mrb[58].mxu1 %vm1766_vm5, %v8065_v56 }
 0x20e   :  { %4469 = vmatmul.mubr.msk.f32.gmra.mrb[58].mxu0 %vm1766_vm5, %v8065_v56  ;;  %3281 = vmatprep.mubr.f32.mxu1 %v9137_v7  ;;  %v8474_v46 = vpop.permute.xlu0 %2549 }
 0x20f   :  { %3603 = vmatprep.mubr.f32.mxu0 %v9137_v7  ;;  %v2716_v1 = vpop.f32.mrb[0].mxu1 }
 0x210   :  { %v2718_v45 = vpop.f32.mrb[1].mxu1  ;;  %v2717_v24 = vadd.f32 %v2716_v1, %v8435_v53 }
 0x211   :  { %4454 = vmatmul.mubr.msk.f32.gmra.mrb[60].mxu1 %vm1766_vm5, %v8110_v30  ;;  %v2877_v29 = vpop.f32.mrb[0].mxu0  ;;  %v2719_v56 = vadd.f32 %v2718_v45, %v8435_v53 }
 0x212   :  { %4470 = vmatmul.mubr.msk.f32.gmra.mrb[60].mxu0 %vm1766_vm5, %v8110_v30  ;;  %3287 = vmatprep.mubr.f32.mxu1 %v9137_v7  ;;  %v2879_v55 = vpop.f32.mrb[1].mxu0  ;;  %v2878_v2 = vadd.f32 %v2877_v29, %v2717_v24  ;;  %v8477_v45 = vmul.u32.u64.low 2863311531, %v8471_v35  ;;  %v8478_v24 = vmul.u32.u64.high 2863311531, %v8471_v35, %v8477_v45 }
 0x213   :  { %3609 = vmatprep.mubr.f32.mxu0 %v9137_v7  ;;  %v2880_v3 = vadd.f32 %v2879_v55, %v2719_v56 }
 0x214   :  { %v4472_v49 = vmul.f32 -1.442695, %v2878_v2 }
 0x215   :  { %4455 = vmatmul.mubr.msk.f32.gmra.mrb[62].mxu1 %vm1766_vm5, %v8126_v15  ;;  %v2722_v19 = vpop.f32.mrb[2].mxu1  ;;  %v4473_v7 = vmul.f32 -1.442695, %v2880_v3 }
 0x216   :  { %4471 = vmatmul.mubr.msk.f32.gmra.mrb[62].mxu0 %vm1766_vm5, %v8126_v15  ;;  %v2723_v30 = vadd.f32 %v2722_v19, %v8445_v23  ;;  %v2724_v44 = vpop.f32.mrb[3].mxu1  ;;  %v2883_v20 = vpop.f32.mrb[2].mxu0  ;;  %5802 = vpow2.f32 %v4472_v49 }
 0x217   :  { %v2725_v39 = vadd.f32 %v2724_v44, %v8445_v23  ;;  %v2885_v17 = vpop.f32.mrb[3].mxu0  ;;  %5804 = vpow2.f32 %v4473_v7 }
 0x218   :  { %v2884_v27 = vadd.f32 %v2883_v20, %v2723_v30 }
 0x219   :  { %v2886_v42 = vadd.f32 %v2885_v17, %v2725_v39  ;;  %v8482_v39 = vpop.permute.xlu1 %2554 }
 0x21a   :  { %v2728_v26 = vpop.f32.mrb[4].mxu1  ;;  %v4475_v50 = vmul.f32 -1.442695, %v2884_v27 }
 0x21b   :  { %v2729_v38 = vadd.f32 %v2728_v26, %v8453_v41  ;;  %v2730_v51 = vpop.f32.mrb[5].mxu1  ;;  %v2889_v52 = vpop.f32.mrb[4].mxu0  ;;  %v4476_v31 = vmul.f32 -1.442695, %v2886_v42 }
 0x21c   :  { %v2731_v15 = vadd.f32 %v2730_v51, %v8453_v41  ;;  %v2891_v8 = vpop.f32.mrb[5].mxu0  ;;  %5806 = vpow2.f32 %v4475_v50 }
 0x21d   :  { %v2890_v11 = vadd.f32 %v2889_v52, %v2729_v38  ;;  %5808 = vpow2.f32 %v4476_v31  ;;  %v3626_v38 = vshrl.u32 %v8468_v60, 4 }
 0x21e   :  { %v2892_v5 = vadd.f32 %v2891_v8, %v2731_v15 }
 0x21f   :  { %v2734_v12 = vpop.f32.mrb[6].mxu1  ;;  %v4478_v0 = vmul.f32 -1.442695, %v2890_v11 }
 0x220   :  { %v2736_v9 = vpop.f32.mrb[7].mxu1  ;;  %v4479_v32 = vmul.f32 -1.442695, %v2892_v5  ;;  %v2735_v47 = vadd.f32 %v2734_v12, %v8457_v57  ;;  %v2895_v13 = vpop.f32.mrb[6].mxu0 }
 0x221   :  { %v2737_v34 = vadd.f32 %v2736_v9, %v8457_v57  ;;  %5810 = vpow2.f32 %v4478_v0  ;;  %v2897_v28 = vpop.f32.mrb[7].mxu0  ;;  %v5803_v62 = vpop.eup %5802 }
 0x222   :  { %v2896_v63 = vadd.f32 %v2895_v13, %v2735_v47  ;;  %5812 = vpow2.f32 %v4479_v32  ;;  %v5805_v6 = vpop.eup %5804  ;;  %v3713_v58 = vadd.f32 1.0, %v5803_v62  ;;  %v8487_v12 = vpop.permute.xlu0 %2559  ;;  %v3637_v32 = vshrl.u32 %v8478_v24, 4 }
 0x223   :  { %v2898_v37 = vadd.f32 %v2897_v28, %v2737_v34  ;;  %v3714_v59 = vadd.f32 1.0, %v5805_v6  ;;  %v3627_v34 = vmul.u32 24, %v3626_v38 }
 0x224   :  { %v2740_v18 = vpop.f32.mrb[8].mxu1  ;;  %v4481_v40 = vmul.f32 -1.442695, %v2896_v63 }
 0x225   :  { %v2741_v4 = vadd.f32 %v2740_v18, %v8463_v22  ;;  %v2742_v33 = vpop.f32.mrb[9].mxu1  ;;  %v2901_v36 = vpop.f32.mrb[8].mxu0  ;;  %v4482_v29 = vmul.f32 -1.442695, %v2898_v37 }
 0x226   :  { %5814 = vpow2.f32 %v4481_v40  ;;  %v2743_v21 = vadd.f32 %v2742_v33, %v8463_v22  ;;  %v2903_v16 = vpop.f32.mrb[9].mxu0  ;;  %v5807_v54 = vpop.eup %5806 }
 0x227   :  { %v2902_v25 = vadd.f32 %v2901_v36, %v2741_v4  ;;  %5816 = vrcp.f32 %v3713_v58  ;;  %v5809_v3 = vpop.eup %5808  ;;  %v3716_v19 = vadd.f32 1.0, %v5807_v54  ;;  %v8493_v4 = vpop.permute.xlu1 %2564 }
 0x228   :  { %v2904_v14 = vadd.f32 %v2903_v16, %v2743_v21  ;;  %v3717_v42 = vadd.f32 1.0, %v5809_v3  ;;  %v3638_v21 = vmul.u32 24, %v3637_v32 }
 0x229   :  { %v2746_v61 = vpop.f32.mrb[10].mxu1  ;;  %v4484_v1 = vmul.f32 -1.442695, %v2902_v25 }
 0x22a   :  { %v2748_v56 = vpop.f32.mrb[11].mxu1  ;;  %v4485_v55 = vmul.f32 -1.442695, %v2904_v14  ;;  %v2747_v2 = vadd.f32 %v2746_v61, %v8474_v46  ;;  %v2907_v49 = vpop.f32.mrb[10].mxu0  ;;  %v3628_v14 = vsub.s32 %v8461_v10, %v3627_v34 }
 0x22b   :  { %5818 = vpow2.f32 %v4484_v1  ;;  %v2749_v30 = vadd.f32 %v2748_v56, %v8474_v46  ;;  %v5811_v44 = vpop.eup %5810  ;;  %v2909_v7 = vpop.f32.mrb[11].mxu0 }
 0x22c   :  { %5820 = vpow2.f32 %v4485_v55  ;;  %v2908_v20 = vadd.f32 %v2907_v49, %v2747_v2  ;;  %v5813_v27 = vpop.eup %5812  ;;  %v3719_v51 = vadd.f32 1.0, %v5811_v44  ;;  %v8501_v2 = vpop.permute.xlu0 %2569  ;;  %v3639_v49 = vsub.s32 %v8471_v35, %v3638_v21 }
 0x22d   :  { %5822 = vrcp.f32 %v3714_v59  ;;  %v2910_v17 = vadd.f32 %v2909_v7, %v2749_v30  ;;  %v3720_v8 = vadd.f32 1.0, %v5813_v27  ;;  %vm3653_vm8 = vcmp.ne.s32.totalorder %v3628_v14, 0 }
 0x22e   :  { %5824 = vpow2.f32 %v4482_v29  ;;  %v2752_v26 = vpop.f32.mrb[12].mxu1  ;;  %v4487_v50 = vmul.f32 -1.442695, %v2908_v20  ;;  %vm3656_vm9 = vcmp.lt.s32.totalorder %v3628_v14, 0  ;;  %vm3654_vm10 = vcmp.ne.s32.totalorder %v3639_v49, 0 }
 0x22f   :  { %5826 = vrcp.f32 %v3716_v19  ;;  %v2753_v15 = vadd.f32 %v2752_v26, %v8482_v39  ;;  %v2754_v52 = vpop.f32.mrb[13].mxu1  ;;  %v4488_v31 = vmul.f32 -1.442695, %v2910_v17  ;;  %v2913_v5 = vpop.f32.mrb[12].mxu0  ;;  %vm3657_vm11 = vcmp.lt.s32.totalorder %v3639_v49, 0  ;;  %vm8518_vm12 = vmand %vm3656_vm9, %vm3653_vm8 }
 0x230   :  { %v5815_v11 = vpop.eup %5814  ;;  %5828 = vpow2.f32 %v4487_v50  ;;  %v2755_v48 = vadd.f32 %v2754_v52, %v8482_v39  ;;  %v2915_v9 = vpop.f32.mrb[13].mxu0  ;;  %vm8525_vm13 = vmand %vm3657_vm11, %vm3654_vm10 }
 0x231   :  { %5830 = vpow2.f32 %v4488_v31  ;;  %v2914_v0 = vadd.f32 %v2913_v5, %v2753_v15  ;;  %v3722_v63 = vadd.f32 1.0, %v5815_v11  ;;  %v8491_v18 = vpop.eup %5816  ;;  %v8509_v15 = vpop.permute.xlu1 %2574  ;;  %v3662_v31 = vadd.s32 24, %v3628_v14 }
 0x232   :  { %5832 = vrcp.f32 %v3717_v42  ;;  %v2758_v47 = vpop.f32.mrb[14].mxu1  ;;  %v2916_v13 = vadd.f32 %v2915_v9, %v2755_v48 }
 0x233   :  { %5834 = vrcp.f32 %v3719_v51  ;;  %v4490_v28 = vmul.f32 -1.442695, %v2914_v0  ;;  %v2760_v62 = vpop.f32.mrb[15].mxu1  ;;  %v2759_v37 = vadd.f32 %v2758_v47, %v8487_v12  ;;  %v3663_v47 = vadd.s32 24, %v3639_v49 }
 0x234   :  { %5836 = vrcp.f32 %v3720_v8  ;;  %v4491_v40 = vmul.f32 -1.442695, %v2916_v13  ;;  %v2919_v33 = vpop.f32.mrb[14].mxu0  ;;  %v2761_v43 = vadd.f32 %v2760_v62, %v8487_v12 }
 0x235   :  { %v5819_v60 = vpop.eup %5818  ;;  %5838 = vpow2.f32 %v4490_v28  ;;  %v2920_v6 = vadd.f32 %v2919_v33, %v2759_v37  ;;  %v2921_v58 = vpop.f32.mrb[15].mxu0 }
 0x236   :  { %v5821_v36 = vpop.eup %5820  ;;  %v3785_v25 = vadd.f32 1.0, %v5819_v60  ;;  %5840 = vpow2.f32 %v4491_v40  ;;  %v2764_v16 = vpop.f32.mrb[16].mxu1  ;;  %v2922_v54 = vadd.f32 %v2921_v58, %v2761_v43 }
 0x237   :  { %v8497_v59 = vpop.eup %5822  ;;  %5842 = vrcp.f32 %v3722_v63  ;;  %v3786_v61 = vadd.f32 1.0, %v5821_v36  ;;  %v2765_v1 = vadd.f32 %v2764_v16, %v8493_v4  ;;  %v4493_v45 = vmul.f32 -1.442695, %v2920_v6  ;;  %v2766_v24 = vpop.f32.mrb[17].mxu1 }
 0x238   :  { %v5825_v29 = vpop.eup %5824  ;;  %5844 = vrcp.f32 %v3785_v25  ;;  %v2767_v56 = vadd.f32 %v2766_v24, %v8493_v4  ;;  %v4494_v55 = vmul.f32 -1.442695, %v2922_v54  ;;  %v2925_v19 = vpop.f32.mrb[16].mxu0  ;;  %v3665_v6 = vsel %vm8518_vm12, %v3662_v31, %v3628_v14  ;;  %v3905_v25 = vld [vmem:[#allocation4] sm:$0xff] }
 0x239   :  { %v8503_v3 = vpop.eup %5826  ;;  %5846 = vrcp.f32 %v3786_v61  ;;  %v2926_v20 = vadd.f32 %v2925_v19, %v2765_v1  ;;  %v2927_v7 = vpop.f32.mrb[17].mxu0  ;;  %v3723_v36 = vadd.f32 1.0, %v5825_v29  ;;  %vm3668_vm14 = vcmp.ge.s32.totalorder %v3665_v6, 1  ;;  %v3909_v31 = vld [vmem:[#allocation4 + $0x20] sm:$0xff] }
 0x23a   :  { %v5829_v30 = vpop.eup %5828  ;;  %5848 = vpow2.f32 %v4493_v45  ;;  %v2770_v44 = vpop.f32.mrb[18].mxu1  ;;  %v2928_v26 = vadd.f32 %v2927_v7, %v2767_v56  ;;  %v3666_v45 = vsel %vm8525_vm13, %v3663_v47, %v3639_v49  ;;  %vm3671_vm15 = vcmp.lt.s32.totalorder %v3665_v6, 17  ;;  %v3908_v49 = vld [vmem:[#allocation4 + $0x18] sm:$0xff] }
 0x23b   :  { %v5831_v27 = vpop.eup %5830  ;;  %v3788_v17 = vadd.f32 1.0, %v5829_v30  ;;  %5850 = vpow2.f32 %v4494_v55  ;;  %v2772_v42 = vpop.f32.mrb[19].mxu1  ;;  %v2771_v50 = vadd.f32 %v2770_v44, %v8501_v2  ;;  %vm3669_vm0 = vcmp.ge.s32.totalorder %v3666_v45, 1  ;;  %vm8546_vm1 = vmand %vm3668_vm14, %vm3671_vm15 }
 0x23c   :  { %v8507_v38 = vpop.eup %5832  ;;  %v3789_v51 = vadd.f32 1.0, %v5831_v27  ;;  %5852 = vtanh.f32 %v2926_v20  ;;  %v2773_v35 = vadd.f32 %v2772_v42, %v8501_v2  ;;  %v2931_v11 = vpop.f32.mrb[18].mxu0  ;;  %v3906_v20 = vld [vmem:[#allocation4 + $0x8] sm:$0xff]  ;;  %vm3672_vm2 = vcmp.lt.s32.totalorder %v3666_v45, 17 }
 0x23d   :  { %v8512_v52 = vpop.eup %5834  ;;  %5854 = vrcp.f32 %v3788_v17  ;;  %v2932_v0 = vadd.f32 %v2931_v11, %v2771_v50  ;;  %v2933_v9 = vpop.f32.mrb[19].mxu0  ;;  %vm8561_vm3 = vmand %vm3669_vm0, %vm3672_vm2 }
 0x23e   :  { %v8514_v8 = vpop.eup %5836  ;;  %5856 = vrcp.f32 %v3789_v51  ;;  %v2776_v5 = vpop.f32.mrb[20].mxu1  ;;  %v2934_v63 = vadd.f32 %v2933_v9, %v2773_v35 }
 0x23f   :  { %v5839_v32 = vpop.eup %5838  ;;  %5858 = vtanh.f32 %v2928_v26  ;;  %v2777_v13 = vadd.f32 %v2776_v5, %v8509_v15  ;;  %v2778_v34 = vpop.f32.mrb[21].mxu1 }
 0x240   :  { %v5841_v28 = vpop.eup %5840  ;;  %v3791_v62 = vadd.f32 1.0, %v5839_v32  ;;  %5860 = vtanh.f32 %v2932_v0  ;;  %v2779_v40 = vadd.f32 %v2778_v34, %v8509_v15  ;;  %v8530_v33 = vpop.permute.xlu0 %2579 }
 0x241   :  { %v8532_v43 = vpop.eup %5842  ;;  %v3792_v60 = vadd.f32 1.0, %v5841_v28  ;;  %5862 = vtanh.f32 %v2934_v63  ;;  %v2937_v58 = vpop.f32.mrb[20].mxu0 }
 0x242   :  { %v5845_v21 = vpop.eup %5844  ;;  %5864 = vrcp.f32 %v3791_v62  ;;  %v2782_v16 = vpop.f32.mrb[22].mxu1  ;;  %v2938_v54 = vadd.f32 %v2937_v58, %v2777_v13 }
 0x243   :  { %v2939_v61 = vpop.f32.mrb[21].mxu0  ;;  %v5847_v1 = vpop.eup %5846  ;;  %5866 = vrcp.f32 %v3792_v60  ;;  %v2783_v55 = vadd.f32 %v2782_v16, %v8530_v33  ;;  %v3917_v44 = vmul.f32 %v5845_v21, %v3905_v25  ;;  %v3911_v60 = vld [vmem:[#allocation4 + $0x30] sm:$0xff]  ;;  %v3912_v16 = vld [vmem:[#allocation4 + $0x38] sm:$0xff] }
 0x244   :  { %v2784_v24 = vpop.f32.mrb[23].mxu1  ;;  %v2940_v56 = vadd.f32 %v2939_v61, %v2779_v40  ;;  %v5849_v19 = vpop.eup %5848  ;;  %5868 = vtanh.f32 %v2938_v54  ;;  %v3918_v32 = vmul.f32 %v5847_v1, %v3906_v20 }
 0x245   :  { %v8539_v14 = vpop.permute.xlu1 %2584  ;;  %v2785_v29 = vadd.f32 %v2784_v24, %v8530_v33  ;;  %v5851_v30 = vpop.eup %5850  ;;  %v3794_v7 = vadd.f32 1.0, %v5849_v19 }
 0x246   :  { %5870 = vtanh.f32 %v2940_v56  ;;  %v2943_v27 = vpop.f32.mrb[22].mxu0  ;;  %v5853_v17 = vpop.eup %5852  ;;  %v3795_v42 = vadd.f32 1.0, %v5851_v30 }
 0x247   :  { %5872 = vrcp.f32 %v3723_v36  ;;  %v2788_v26 = vpop.f32.mrb[24].mxu1  ;;  %v2944_v50 = vadd.f32 %v2943_v27, %v2783_v55  ;;  %v2945_v51 = vpop.f32.mrb[23].mxu0  ;;  %v3929_v11 = vmul.f32 %v5853_v17, %v8491_v18 }
 0x248   :  { %v5855_v35 = vpop.eup %5854  ;;  %5874 = vrcp.f32 %v3794_v7  ;;  %v2789_v48 = vadd.f32 %v2788_v26, %v8539_v14  ;;  %v2790_v5 = vpop.f32.mrb[25].mxu1  ;;  %v2946_v0 = vadd.f32 %v2945_v51, %v2785_v29 }
 0x249   :  { %v5857_v9 = vpop.eup %5856  ;;  %5876 = vrcp.f32 %v3795_v42  ;;  %v2791_v13 = vadd.f32 %v2790_v5, %v8539_v14  ;;  %v3920_v63 = vmul.f32 %v5855_v35, %v3908_v49  ;;  %v8551_v28 = vadd.f32 %v3929_v11, %v3917_v44  ;;  %v2949_v18 = vpop.f32.mrb[24].mxu0 }
 0x24a   :  { %v5859_v34 = vpop.eup %5858  ;;  %5878 = vtanh.f32 %v2944_v50  ;;  %v8553_v62 = vpop.permute.xlu0 %2589  ;;  %v3921_v40 = vmul.f32 %v5857_v9, %v3909_v31  ;;  %v2950_v58 = vadd.f32 %v2949_v18, %v2789_v48  ;;  %v3914_v31 = vld [vmem:[#allocation4 + $0x48] sm:$0xff] }
 0x24b   :  { %v5861_v37 = vpop.eup %5860  ;;  %v3930_v6 = vmul.f32 %v5859_v34, %v8497_v59  ;;  %5880 = vtanh.f32 %v2946_v0  ;;  %v2951_v21 = vpop.f32.mrb[25].mxu0  ;;  %v3977_v54 = vsel %vm8546_vm1, %v8551_v28, 0.0 }
 0x24c   :  { %v2794_v36 = vpop.f32.mrb[26].mxu1  ;;  %v5863_v25 = vpop.eup %5862  ;;  %v3932_v1 = vmul.f32 %v5861_v37, %v8503_v3  ;;  %v2952_v24 = vadd.f32 %v2951_v21, %v2791_v13  ;;  %4001 = vst [vmem:[#allocation8] sm:$0xff] %v3977_v54  ;;  %v4496_v45 = vmul.f32 -1.442695, %v2950_v58 }
 0x24d   :  { %v2796_v59 = vpop.f32.mrb[27].mxu1  ;;  %v5865_v56 = vpop.eup %5864  ;;  %v8566_v55 = vadd.f32 %v3930_v6, %v3918_v32  ;;  %v3933_v19 = vmul.f32 %v5863_v25, %v8507_v38  ;;  %v2795_v29 = vadd.f32 %v2794_v36, %v8553_v62  ;;  %v3915_v32 = vld [vmem:[#allocation4 + $0x50] sm:$0xff] }
 0x24e   :  { %v5867_v30 = vpop.eup %5866  ;;  %v3923_v44 = vmul.f32 %v5865_v56, %v3911_v60  ;;  %v8570_v20 = vadd.f32 %v3932_v1, %v3920_v63  ;;  %v2797_v7 = vadd.f32 %v2796_v59, %v8553_v62  ;;  %v2955_v27 = vpop.f32.mrb[26].mxu0  ;;  %v4497_v38 = vmul.f32 -1.442695, %v2952_v24 }
 0x24f   :  { %v8573_v17 = vpop.permute.xlu1 %2594  ;;  %v5869_v3 = vpop.eup %5868  ;;  %v3924_v49 = vmul.f32 %v5867_v30, %v3912_v16  ;;  %v3978_v42 = vsel %vm8561_vm3, %v8566_v55, 0.0  ;;  %v8578_v26 = vadd.f32 %v3933_v19, %v3921_v40  ;;  %v2956_v5 = vadd.f32 %v2955_v27, %v2795_v29 }
 0x250   :  { %9265 = vst [vmem:[#allocation22_spill] sm:$0xff] %v8573_v17  ;;  %v2957_v50 = vpop.f32.mrb[27].mxu0  ;;  %v2800_v51 = vpop.f32.mrb[28].mxu1  ;;  %4002 = vst [vmem:[#allocation8 + $0x8] sm:$0xff] %v3978_v42  ;;  %v3980_v11 = vsel %vm8546_vm1, %v8570_v20, 0.0  ;;  %v3935_v48 = vmul.f32 %v5869_v3, %v8512_v52  ;;  %5882 = vpow2.f32 %v4496_v45 }
 0x251   :  { %v5871_v35 = vpop.eup %5870  ;;  %v2802_v0 = vpop.f32.mrb[29].mxu1  ;;  %4004 = vst [vmem:[#allocation8 + $0x18] sm:$0xff] %v3980_v11  ;;  %v3981_v13 = vsel %vm8561_vm3, %v8578_v26, 0.0  ;;  %v2958_v63 = vadd.f32 %v2957_v50, %v2797_v7  ;;  %v4499_v40 = vmul.f32 -1.442695, %v2956_v5  ;;  %v2801_v60 = vadd.f32 %v2800_v51, %v8573_v17 }
 0x252   :  { %v5873_v9 = vpop.eup %5872  ;;  %v3936_v34 = vmul.f32 %v5871_v35, %v8514_v8  ;;  %4005 = vst [vmem:[#allocation8 + $0x20] sm:$0xff] %v3981_v13  ;;  %v3947_v37 = vadd.f32 %v3935_v48, %v3923_v44  ;;  %v2961_v52 = vpop.f32.mrb[28].mxu0  ;;  %5884 = vpow2.f32 %v4497_v38  ;;  %v2803_v59 = vadd.f32 %v2802_v0, %v8573_v17 }
 0x253   :  { %v5875_v18 = vpop.eup %5874  ;;  %v8589_v6 = vpop.permute.xlu0 %2599  ;;  %v4500_v25 = vmul.f32 -1.442695, %v2958_v63  ;;  %v2962_v44 = vadd.f32 %v2961_v52, %v2801_v60  ;;  %5886 = vpow2.f32 %v4499_v40 }
 0x254   :  { %9266 = vst [vmem:[#allocation20_spill] sm:$0xff] %v8589_v6  ;;  %v5877_v58 = vpop.eup %5876  ;;  %v3926_v21 = vmul.f32 %v5875_v18, %v3914_v31  ;;  %v3948_v36 = vadd.f32 %v3936_v34, %v3924_v49  ;;  %v2963_v16 = vpop.f32.mrb[29].mxu0  ;;  %v3983_v24 = vsel %vm8546_vm1, %v3947_v37, 0.0 }
 0x255   :  { %v2806_v54 = vpop.f32.mrb[30].mxu1  ;;  %v5879_v1 = vpop.eup %5878  ;;  %v3927_v8 = vmul.f32 %v5877_v58, %v3915_v32  ;;  %4007 = vst [vmem:[#allocation8 + $0x30] sm:$0xff] %v3983_v24  ;;  %v2964_v7 = vadd.f32 %v2963_v16, %v2803_v59  ;;  %5888 = vpow2.f32 %v4500_v25  ;;  %v4502_v42 = vmul.f32 -1.442695, %v2962_v44 }
 0x256   :  { %v2808_v56 = vpop.f32.mrb[31].mxu1  ;;  %v5881_v19 = vpop.eup %5880  ;;  %v3984_v29 = vsel %vm8561_vm3, %v3948_v36, 0.0  ;;  %v3938_v30 = vmul.f32 %v5879_v1, %v8532_v43  ;;  %v2807_v27 = vadd.f32 %v2806_v54, %v8589_v6  ;;  %5890 = vtanh.f32 %v8551_v28 }
 0x257   :  { %4008 = vst [vmem:[#allocation8 + $0x38] sm:$0xff] %v3984_v29  ;;  %v3939_v45 = vmul.f32 %v5881_v19, %v5873_v9  ;;  %v2967_v3 = vpop.f32.mrb[30].mxu0  ;;  %v2809_v38 = vadd.f32 %v2808_v56, %v8589_v6  ;;  %v4503_v35 = vmul.f32 -1.442695, %v2964_v7  ;;  %5892 = vtanh.f32 %v8566_v55 }
 0x258   :  { %v3950_v49 = vadd.f32 %v3938_v30, %v3926_v21  ;;  %v2969_v50 = vpop.f32.mrb[31].mxu0  ;;  %v2968_v31 = vadd.f32 %v2967_v3, %v2807_v27  ;;  %5894 = vtanh.f32 %v8570_v20 }
 0x259   :  { %v3951_v51 = vadd.f32 %v3939_v45, %v3927_v8  ;;  %v2970_v11 = vadd.f32 %v2969_v50, %v2809_v38  ;;  %5896 = vpow2.f32 %v4502_v42 }
 0x25a   :  { %v3986_v43 = vsel %vm8546_vm1, %v3950_v49, 0.0  ;;  %v4505_v5 = vmul.f32 -1.442695, %v2968_v31  ;;  %v5883_v28 = vpop.eup %5882  ;;  %5898 = vpow2.f32 %v4503_v35 }
 0x25b   :  { %4010 = vst [vmem:[#allocation8 + $0x48] sm:$0xff] %v3986_v43  ;;  %v3987_v48 = vsel %vm8561_vm3, %v3951_v51, 0.0  ;;  %v4506_v0 = vmul.f32 -1.442695, %v2970_v11  ;;  %v3869_v32 = vadd.f32 1.0, %v5883_v28 }
 0x25c   :  { %4011 = vst [vmem:[#allocation8 + $0x50] sm:$0xff] %v3987_v48  ;;  %v5885_v9 = vpop.eup %5884  ;;  %5900 = vpow2.f32 %v4505_v5 }
 0x25d   :  { %v3870_v55 = vadd.f32 1.0, %v5885_v9  ;;  %5902 = vpow2.f32 %v4506_v0  ;;  %v5887_v13 = vpop.eup %5886 }
 0x25e   :  { %5904 = vrcp.f32 %v3869_v32  ;;  %v3872_v20 = vadd.f32 1.0, %v5887_v13 }
 0x25f   :  { %5906 = vrcp.f32 %v3870_v55  ;;  %v5889_v34 = vpop.eup %5888 }
 0x260   :  { %5908 = vtanh.f32 %v8578_v26  ;;  %v5891_v63 = vpop.eup %5890  ;;  %v3873_v18 = vadd.f32 1.0, %v5889_v34 }
 0x261   :  { %5910 = vtanh.f32 %v3947_v37  ;;  %v5893_v40 = vpop.eup %5892 }
 0x262   :  { %5912 = vrcp.f32 %v3872_v20  ;;  %v5895_v60 = vpop.eup %5894 }
 0x263   :  { %5914 = vrcp.f32 %v3873_v18  ;;  %v5897_v52 = vpop.eup %5896 }
 0x264   :  { %5916 = vtanh.f32 %v3948_v36  ;;  %v5899_v58 = vpop.eup %5898  ;;  %v3875_v21 = vadd.f32 1.0, %v5897_v52 }
 0x265   :  { %5918 = vtanh.f32 %v3950_v49  ;;  %v3876_v16 = vadd.f32 1.0, %v5899_v58 }
 0x266   :  { %v5901_v25 = vpop.eup %5900  ;;  %5920 = vtanh.f32 %v3951_v51 }
 0x267   :  { %v5903_v54 = vpop.eup %5902  ;;  %5922 = vrcp.f32 %v3875_v21  ;;  %v3878_v1 = vadd.f32 1.0, %v5901_v25 }
 0x268   :  { %v5905_v26 = vpop.eup %5904  ;;  %5924 = vrcp.f32 %v3876_v16  ;;  %v3879_v8 = vadd.f32 1.0, %v5903_v54 }
 0x269   :  { %v5907_v37 = vpop.eup %5906  ;;  %v3965_v24 = vmul.f32 %v5905_v26, %v5891_v63  ;;  %5926 = vrcp.f32 %v3878_v1 }
 0x26a   :  { %v5909_v59 = vpop.eup %5908  ;;  %v3966_v56 = vmul.f32 %v5907_v37, %v5893_v40  ;;  %5928 = vrcp.f32 %v3879_v8 }
 0x26b   :  { %v5911_v19 = vpop.eup %5910  ;;  %v3989_v36 = vsel %vm8546_vm1, %v3965_v24, 0.0 }
 0x26c   :  { %v5913_v29 = vpop.eup %5912  ;;  %4013 = vst [vmem:[#allocation7] sm:$0xff] %v3989_v36  ;;  %v3990_v30 = vsel %vm8561_vm3, %v3966_v56, 0.0 }
 0x26d   :  { %v5915_v44 = vpop.eup %5914  ;;  %4014 = vst [vmem:[#allocation7 + $0x8] sm:$0xff] %v3990_v30  ;;  %v3968_v45 = vmul.f32 %v5913_v29, %v5895_v60 }
 0x26e   :  { %v5917_v7 = vpop.eup %5916  ;;  %v3969_v27 = vmul.f32 %v5915_v44, %v5909_v59 }
 0x26f   :  { %v5919_v3 = vpop.eup %5918  ;;  %v3992_v49 = vsel %vm8546_vm1, %v3968_v45, 0.0 }
 0x270   :  { %v5921_v42 = vpop.eup %5920  ;;  %4016 = vst [vmem:[#allocation7 + $0x18] sm:$0xff] %v3992_v49  ;;  %v3993_v38 = vsel %vm8561_vm3, %v3969_v27, 0.0 }
 0x271   :  { %v5923_v50 = vpop.eup %5922  ;;  %4017 = vst [vmem:[#allocation7 + $0x20] sm:$0xff] %v3993_v38 }
 0x272   :  { %v5925_v51 = vpop.eup %5924  ;;  %v3971_v35 = vmul.f32 %v5923_v50, %v5911_v19 }
 0x273   :  { %v5927_v31 = vpop.eup %5926  ;;  %v3972_v43 = vmul.f32 %v5925_v51, %v5917_v7 }
 0x274   :  { %v5929_v11 = vpop.eup %5928  ;;  %v3995_v48 = vsel %vm8546_vm1, %v3971_v35, 0.0  ;;  %v3974_v5 = vmul.f32 %v5927_v31, %v5919_v3 }
 0x275   :  { %4019 = vst [vmem:[#allocation7 + $0x30] sm:$0xff] %v3995_v48  ;;  %v3996_v0 = vsel %vm8561_vm3, %v3972_v43, 0.0  ;;  %v3975_v28 = vmul.f32 %v5929_v11, %v5921_v42 }
 0x276   :  { %4020 = vst [vmem:[#allocation7 + $0x38] sm:$0xff] %v3996_v0  ;;  %v3998_v9 = vsel %vm8546_vm1, %v3974_v5, 0.0 }
 0x277   :  { %4022 = vst [vmem:[#allocation7 + $0x48] sm:$0xff] %v3998_v9  ;;  %v3999_v32 = vsel %vm8561_vm3, %v3975_v28, 0.0 }
 0x278   :  { %4023 = vst [vmem:[#allocation7 + $0x50] sm:$0xff] %v3999_v32 }
 0x2ac   :  { %v3199_v55 = vpop.f32.mrb[32].mxu1 }
 0x2ad   :  { %v4872_v13 = vadd.f32 %v3199_v55, %v8435_v53  ;;  %v3201_v34 = vpop.f32.mrb[33].mxu1  ;;  %v3521_v20 = vpop.f32.mrb[32].mxu0 }
 0x2ae   :  { %v4873_v63 = vadd.f32 %v3201_v34, %v8435_v53  ;;  %v4904_v18 = vadd.f32 %v3521_v20, %v8435_v53  ;;  %v3523_v40 = vpop.f32.mrb[33].mxu0 }
 0x2af   :  { %v4474_v60 = vmul.f32 -1.442695, %v4872_v13  ;;  %v4905_v52 = vadd.f32 %v3523_v40, %v8435_v53 }
 0x2b0   :  { %v4508_v58 = vmul.f32 -1.442695, %v4873_v63  ;;  %v4509_v21 = vmul.f32 -1.442695, %v4904_v18  ;;  %v3205_v25 = vpop.f32.mrb[34].mxu1 }
 0x2b1   :  { %5930 = vpow2.f32 %v4474_v60  ;;  %v4510_v16 = vmul.f32 -1.442695, %v4905_v52  ;;  %v4874_v54 = vadd.f32 %v3205_v25, %v8445_v23  ;;  %v3207_v1 = vpop.f32.mrb[35].mxu1  ;;  %v3527_v26 = vpop.f32.mrb[34].mxu0 }
 0x2b2   :  { %5932 = vpow2.f32 %v4508_v58  ;;  %v4875_v8 = vadd.f32 %v3207_v1, %v8445_v23  ;;  %v4906_v37 = vadd.f32 %v3527_v26, %v8445_v23  ;;  %v3529_v24 = vpop.f32.mrb[35].mxu0 }
 0x2b3   :  { %5934 = vpow2.f32 %v4509_v21  ;;  %v4477_v59 = vmul.f32 -1.442695, %v4874_v54  ;;  %v4907_v56 = vadd.f32 %v3529_v24, %v8445_v23 }
 0x2b4   :  { %5936 = vpow2.f32 %v4510_v16  ;;  %v4511_v53 = vmul.f32 -1.442695, %v4875_v8  ;;  %v4512_v19 = vmul.f32 -1.442695, %v4906_v37  ;;  %v3211_v36 = vpop.f32.mrb[36].mxu1 }
 0x2b5   :  { %5938 = vpow2.f32 %v4477_v59  ;;  %v4513_v29 = vmul.f32 -1.442695, %v4907_v56  ;;  %v4876_v30 = vadd.f32 %v3211_v36, %v8453_v41  ;;  %v3213_v44 = vpop.f32.mrb[37].mxu1  ;;  %v3533_v45 = vpop.f32.mrb[36].mxu0 }
 0x2b6   :  { %5940 = vpow2.f32 %v4511_v53  ;;  %v4877_v7 = vadd.f32 %v3213_v44, %v8453_v41  ;;  %v4908_v27 = vadd.f32 %v3533_v45, %v8453_v41  ;;  %v3535_v3 = vpop.f32.mrb[37].mxu0 }
 0x2b7   :  { %5942 = vpow2.f32 %v4512_v19  ;;  %v4480_v49 = vmul.f32 -1.442695, %v4876_v30  ;;  %v4909_v23 = vadd.f32 %v3535_v3, %v8453_v41 }
 0x2b8   :  { %5944 = vpow2.f32 %v4513_v29  ;;  %v4514_v42 = vmul.f32 -1.442695, %v4877_v7  ;;  %v3217_v38 = vpop.f32.mrb[38].mxu1  ;;  %v4515_v31 = vmul.f32 -1.442695, %v4908_v27 }
 0x2b9   :  { %5946 = vpow2.f32 %v4480_v49  ;;  %v4878_v50 = vadd.f32 %v3217_v38, %v8457_v57  ;;  %v3219_v51 = vpop.f32.mrb[39].mxu1  ;;  %v3539_v35 = vpop.f32.mrb[38].mxu0  ;;  %v4516_v48 = vmul.f32 -1.442695, %v4909_v23 }
 0x2ba   :  { %5948 = vpow2.f32 %v4514_v42  ;;  %v3541_v43 = vpop.f32.mrb[39].mxu0  ;;  %v4879_v24 = vadd.f32 %v3219_v51, %v8457_v57  ;;  %v4910_v53 = vadd.f32 %v3539_v35, %v8457_v57 }
 0x2bb   :  { %v5931_v11 = vpop.eup %5930  ;;  %v4483_v0 = vmul.f32 -1.442695, %v4878_v50  ;;  %5950 = vpow2.f32 %v4515_v31  ;;  %v4911_v29 = vadd.f32 %v3541_v43, %v8457_v57 }
 0x2bc   :  { %v5933_v5 = vpop.eup %5932  ;;  %v3223_v28 = vpop.f32.mrb[40].mxu1  ;;  %v3715_v32 = vadd.f32 1.0, %v5931_v11  ;;  %5952 = vpow2.f32 %v4516_v48  ;;  %v4517_v3 = vmul.f32 -1.442695, %v4879_v24  ;;  %v4518_v42 = vmul.f32 -1.442695, %v4910_v53 }
 0x2bd   :  { %v5935_v9 = vpop.eup %5934  ;;  %v3225_v55 = vpop.f32.mrb[41].mxu1  ;;  %v4061_v34 = vadd.f32 1.0, %v5933_v5  ;;  %5954 = vpow2.f32 %v4483_v0  ;;  %v4880_v7 = vadd.f32 %v3223_v28, %v8463_v22  ;;  %v4519_v51 = vmul.f32 -1.442695, %v4911_v29 }
 0x2be   :  { %v3545_v41 = vpop.f32.mrb[40].mxu0  ;;  %v5937_v13 = vpop.eup %5936  ;;  %v4062_v18 = vadd.f32 1.0, %v5935_v9  ;;  %5956 = vrcp.f32 %v3715_v32  ;;  %v4881_v49 = vadd.f32 %v3225_v55, %v8463_v22 }
 0x2bf   :  { %v3547_v20 = vpop.f32.mrb[41].mxu0  ;;  %v5939_v63 = vpop.eup %5938  ;;  %v4063_v60 = vadd.f32 1.0, %v5937_v13  ;;  %5958 = vrcp.f32 %v4061_v34  ;;  %v4912_v38 = vadd.f32 %v3545_v41, %v8463_v22  ;;  %v4486_v48 = vmul.f32 -1.442695, %v4880_v7 }
 0x2c0   :  { %v5941_v40 = vpop.eup %5940  ;;  %v3229_v52 = vpop.f32.mrb[42].mxu1  ;;  %v3718_v21 = vadd.f32 1.0, %v5939_v63  ;;  %5960 = vrcp.f32 %v4062_v18  ;;  %v4913_v35 = vadd.f32 %v3547_v20, %v8463_v22  ;;  %v4520_v9 = vmul.f32 -1.442695, %v4881_v49 }
 0x2c1   :  { %v5943_v58 = vpop.eup %5942  ;;  %v3231_v25 = vpop.f32.mrb[43].mxu1  ;;  %v4064_v1 = vadd.f32 1.0, %v5941_v40  ;;  %5962 = vrcp.f32 %v4063_v60  ;;  %v4882_v5 = vadd.f32 %v3229_v52, %v8474_v46  ;;  %v4521_v22 = vmul.f32 -1.442695, %v4912_v38 }
 0x2c2   :  { %v3551_v16 = vpop.f32.mrb[42].mxu0  ;;  %v5945_v54 = vpop.eup %5944  ;;  %v4065_v37 = vadd.f32 1.0, %v5943_v58  ;;  %5964 = vrcp.f32 %v3718_v21  ;;  %v4883_v32 = vadd.f32 %v3231_v25, %v8474_v46  ;;  %v4522_v20 = vmul.f32 -1.442695, %v4913_v35 }
 0x2c3   :  { %v3553_v26 = vpop.f32.mrb[43].mxu0  ;;  %v5947_v8 = vpop.eup %5946  ;;  %v4066_v56 = vadd.f32 1.0, %v5945_v54  ;;  %5966 = vrcp.f32 %v4064_v1  ;;  %v4914_v41 = vadd.f32 %v3551_v16, %v8474_v46  ;;  %v4489_v60 = vmul.f32 -1.442695, %v4882_v5 }
 0x2c4   :  { %v5949_v59 = vpop.eup %5948  ;;  %v3235_v19 = vpop.f32.mrb[44].mxu1  ;;  %v3721_v36 = vadd.f32 1.0, %v5947_v8  ;;  %5968 = vrcp.f32 %v4065_v37  ;;  %v4523_v21 = vmul.f32 -1.442695, %v4883_v32  ;;  %v4915_v54 = vadd.f32 %v3553_v26, %v8474_v46 }
 0x2c5   :  { %v3237_v30 = vpop.f32.mrb[45].mxu1  ;;  %v8639_v44 = vpop.f32.mrb[44].mxu0  ;;  %v4067_v45 = vadd.f32 1.0, %v5949_v59  ;;  %5970 = vrcp.f32 %v4066_v56  ;;  %v4524_v16 = vmul.f32 -1.442695, %v4914_v41  ;;  %v4884_v24 = vadd.f32 %v3235_v19, %v8482_v39 }
 0x2c6   :  { %v8642_v27 = vpop.f32.mrb[45].mxu0  ;;  %v5951_v23 = vpop.eup %5950  ;;  %5972 = vrcp.f32 %v3721_v36  ;;  %v4885_v29 = vadd.f32 %v3237_v30, %v8482_v39  ;;  %v8692_v46 = vadd.s32 256, %v8461_v10 }
 0x2c7   :  { %v5953_v57 = vpop.eup %5952  ;;  %5974 = vrcp.f32 %v4067_v45  ;;  %v4068_v37 = vadd.f32 1.0, %v5951_v23 }
 0x2c8   :  { %v8646_v50 = vpop.f32.mrb[46].mxu1  ;;  %v5955_v11 = vpop.eup %5954  ;;  %5976 = vpow2.f32 %v4517_v3  ;;  %v4069_v36 = vadd.f32 1.0, %v5953_v57  ;;  %v4525_v3 = vmul.f32 -1.442695, %v4915_v54  ;;  %v4526_v57 = vmul.f32 -1.442695, %v4885_v29 }
 0x2c9   :  { %v8649_v31 = vpop.f32.mrb[47].mxu1  ;;  %v8651_v43 = vpop.f32.mrb[46].mxu0  ;;  %5978 = vpow2.f32 %v4518_v42  ;;  %v3724_v7 = vadd.f32 1.0, %v5955_v11  ;;  %v4492_v42 = vmul.f32 -1.442695, %v4884_v24 }
 0x2ca   :  { %v8654_v0 = vpop.f32.mrb[47].mxu0  ;;  %v8656_v28 = vpop.eup %5956  ;;  %5980 = vpow2.f32 %v4519_v51  ;;  %v8707_v51 = vmul.u32.u64.low 2863311531, %v8692_v46  ;;  %v8708_v35 = vmul.u32.u64.high 2863311531, %v8692_v46, %v8707_v51 }
 0x2cb   :  { %v8659_v55 = vpop.eup %5958  ;;  %5982 = vpow2.f32 %v4486_v48 }
 0x2cc   :  { %v8662_v13 = vpop.f32.mrb[48].mxu1  ;;  %v8664_v34 = vpop.eup %5960  ;;  %5984 = vpow2.f32 %v4520_v9 }
 0x2cd   :  { %v8666_v63 = vpop.f32.mrb[49].mxu1  ;;  %v8668_v18 = vpop.f32.mrb[48].mxu0  ;;  %5986 = vpow2.f32 %v4521_v22 }
 0x2ce   :  { %v8670_v40 = vpop.eup %5962  ;;  %v8672_v52 = vpop.f32.mrb[49].mxu0  ;;  %5988 = vpow2.f32 %v4522_v20 }
 0x2cf   :  { %v8674_v58 = vpop.eup %5964  ;;  %5990 = vpow2.f32 %v4489_v60 }
 0x2d0   :  { %v8676_v25 = vpop.eup %5966  ;;  %v8679_v1 = vpop.f32.mrb[50].mxu1  ;;  %5992 = vpow2.f32 %v4523_v21 }
 0x2d1   :  { %v8681_v8 = vpop.eup %5968  ;;  %v8684_v59 = vpop.f32.mrb[51].mxu1  ;;  %5994 = vpow2.f32 %v4524_v16 }
 0x2d2   :  { %v8686_v56 = vpop.f32.mrb[50].mxu0  ;;  %v8688_v53 = vpop.eup %5970  ;;  %5996 = vrcp.f32 %v4068_v37 }
 0x2d3   :  { %v8694_v26 = vpop.f32.mrb[51].mxu0  ;;  %v8696_v45 = vpop.eup %5972  ;;  %5998 = vrcp.f32 %v4069_v36 }
 0x2d4   :  { %v8698_v19 = vpop.eup %5974  ;;  %v8700_v49 = vpop.f32.mrb[52].mxu1  ;;  %6000 = vrcp.f32 %v3724_v7 }
 0x2d5   :  { %9267 = vst [vmem:[#allocation21_spill] sm:$0xff] %v8698_v19  ;;  %v5977_v23 = vpop.eup %5976  ;;  %v8702_v38 = vpop.f32.mrb[53].mxu1  ;;  %6002 = vpow2.f32 %v4525_v3 }
 0x2d6   :  { %v8704_v30 = vpop.f32.mrb[52].mxu0  ;;  %v5979_v10 = vpop.eup %5978  ;;  %v4070_v5 = vadd.f32 1.0, %v5977_v23  ;;  %6004 = vpow2.f32 %v4492_v42 }
 0x2d7   :  { %v8710_v11 = vpop.f32.mrb[53].mxu0  ;;  %v5981_v48 = vpop.eup %5980  ;;  %v4071_v32 = vadd.f32 1.0, %v5979_v10  ;;  %6006 = vpow2.f32 %v4526_v57  ;;  %v4916_v10 = vadd.f32 %v8639_v44, %v8482_v39  ;;  %v4886_v44 = vadd.f32 %v8646_v50, %v8487_v12 }
 0x2d8   :  { %v5983_v9 = vpop.eup %5982  ;;  %v8712_v22 = vpop.f32.mrb[54].mxu1  ;;  %v4072_v20 = vadd.f32 1.0, %v5981_v48  ;;  %6008 = vrcp.f32 %v4070_v5  ;;  %v4917_v5 = vadd.f32 %v8642_v27, %v8482_v39 }
 0x2d9   :  { %v5985_v41 = vpop.eup %5984  ;;  %v8714_v60 = vpop.f32.mrb[55].mxu1  ;;  %v3787_v54 = vadd.f32 1.0, %v5983_v9  ;;  %6010 = vrcp.f32 %v4071_v32  ;;  %v3648_v32 = vshrl.u32 %v8708_v35, 4  ;;  %v4527_v27 = vmul.f32 -1.442695, %v4916_v10 }
 0x2da   :  { %v8716_v21 = vpop.f32.mrb[54].mxu0  ;;  %v5987_v16 = vpop.eup %5986  ;;  %v4133_v36 = vadd.f32 1.0, %v5985_v41  ;;  %6012 = vrcp.f32 %v4072_v20  ;;  %v4918_v35 = vadd.f32 %v8651_v43, %v8487_v12 }
 0x2db   :  { %v8718_v37 = vpop.f32.mrb[55].mxu0  ;;  %v5989_v24 = vpop.eup %5988  ;;  %v4134_v7 = vadd.f32 1.0, %v5987_v16  ;;  %6014 = vrcp.f32 %v3787_v54  ;;  %v4887_v54 = vadd.f32 %v8649_v31, %v8487_v12  ;;  %v3649_v31 = vmul.u32 24, %v3648_v32 }
 0x2dc   :  { %v5991_v29 = vpop.eup %5990  ;;  %v8720_v3 = vpop.f32.mrb[56].mxu1  ;;  %v4135_v42 = vadd.f32 1.0, %v5989_v24  ;;  %6016 = vrcp.f32 %v4133_v36  ;;  %v4530_v19 = vmul.f32 -1.442695, %v4918_v35 }
 0x2dd   :  { %v5993_v23 = vpop.eup %5992  ;;  %v8724_v51 = vpop.f32.mrb[57].mxu1  ;;  %v3790_v9 = vadd.f32 1.0, %v5991_v29  ;;  %6018 = vrcp.f32 %v4134_v7  ;;  %v4528_v7 = vmul.f32 -1.442695, %v4917_v5  ;;  %v3650_v32 = vsub.s32 %v8692_v46, %v3649_v31 }
 0x2de   :  { %v8726_v48 = vpop.f32.mrb[56].mxu0  ;;  %v5995_v57 = vpop.eup %5994  ;;  %v4136_v20 = vadd.f32 1.0, %v5993_v23  ;;  %6020 = vrcp.f32 %v4135_v42  ;;  %v4495_v42 = vmul.f32 -1.442695, %v4886_v44  ;;  %v4888_v44 = vadd.f32 %v8662_v13, %v8493_v4 }
 0x2df   :  { %v8731_v41 = vpop.f32.mrb[57].mxu0  ;;  %v8733_v16 = vpop.eup %5996  ;;  %v4137_v6 = vadd.f32 1.0, %v5995_v57  ;;  %6022 = vrcp.f32 %v3790_v9  ;;  %v4919_v57 = vadd.f32 %v8654_v0, %v8487_v12  ;;  %v4920_v46 = vadd.f32 %v8668_v18, %v8493_v4 }
 0x2e0   :  { %9268 = vst [vmem:[#allocation19_spill] sm:$0xff] %v8733_v16  ;;  %v8737_v24 = vpop.eup %5998  ;;  %v8741_v29 = vpop.f32.mrb[58].mxu1  ;;  %6024 = vrcp.f32 %v4136_v20  ;;  %vm3655_vm4 = vcmp.ne.s32.totalorder %v3650_v32, 0  ;;  %vm3658_vm5 = vcmp.lt.s32.totalorder %v3650_v32, 0  ;;  %v4921_v13 = vadd.f32 %v8672_v52, %v8493_v4 }
 0x2e1   :  { %9269 = vst [vmem:[#allocation15_spill] sm:$0xff] %v8737_v24  ;;  %v8743_v39 = vpop.eup %6000  ;;  %v8747_v36 = vpop.f32.mrb[59].mxu1  ;;  %6026 = vrcp.f32 %v4137_v6  ;;  %v4531_v0 = vmul.f32 -1.442695, %v4919_v57  ;;  %v3664_v18 = vadd.s32 24, %v3650_v32  ;;  %vm3661_vm6 = vmand %vm3658_vm5, %vm3655_vm4 }
 0x2e2   :  { %9270 = vst [vmem:[#allocation16_spill] sm:$0xff] %v8743_v39  ;;  %9271 = vst [vmem:[#allocation18_spill] sm:$0xff] %v8747_v36  ;;  %v8749_v23 = vpop.f32.mrb[58].mxu0  ;;  %v6003_v50 = vpop.eup %6002  ;;  %v4529_v39 = vmul.f32 -1.442695, %v4887_v54  ;;  %6028 = vpow2.f32 %v4527_v27  ;;  %v4889_v27 = vadd.f32 %v8666_v63, %v8493_v4 }
 0x2e3   :  { %9272 = vst [vmem:[#allocation17_spill] sm:$0xff] %v8749_v23  ;;  %v8753_v17 = vpop.f32.mrb[59].mxu0  ;;  %v6005_v24 = vpop.eup %6004  ;;  %6030 = vpow2.f32 %v4528_v7  ;;  %v4138_v52 = vadd.f32 1.0, %v6003_v50  ;;  %v4257_v50 = vld [vmem:[#allocation4 + $0x78] sm:$0xff] }
 0x2e4   :  { %9273 = vst [vmem:[#allocation24_spill] sm:$0xff] %v8753_v17  ;;  %v6007_v10 = vpop.eup %6006  ;;  %v8755_v43 = vpop.f32.mrb[60].mxu1  ;;  %6032 = vpow2.f32 %v4495_v42  ;;  %v4255_v17 = vld [vmem:[#allocation4 + $0x68] sm:$0xff] }
 0x2e5   :  { %9274 = vst [vmem:[#allocation23_spill] sm:$0xff] %v8755_v43  ;;  %v8757_v16 = vpop.eup %6008  ;;  %v8759_v9 = vpop.f32.mrb[61].mxu1  ;;  %6034 = vpow2.f32 %v4529_v39  ;;  %v4254_v43 = vld [vmem:[#allocation4 + $0x60] sm:$0xff] }
 0x2e6   :  { %9275 = vst [vmem:[#allocation27_spill] sm:$0xff] %v8757_v16  ;;  %9276 = vst [vmem:[#allocation26_spill] sm:$0xff] %v8759_v9  ;;  %v8761_v5 = vpop.f32.mrb[60].mxu0  ;;  %v8763_v12 = vpop.eup %6010  ;;  %6036 = vpow2.f32 %v4530_v19  ;;  %v4890_v19 = vadd.f32 %v8679_v1, %v8501_v2  ;;  %v4139_v1 = vadd.f32 1.0, %v6007_v10  ;;  %v3907_v9 = vld [vmem:[#allocation4 + $0x10] sm:$0xff] }
 0x2e7   :  { %9277 = vst [vmem:[#allocation25_spill] sm:$0xff] %v8761_v5  ;;  %9278 = vst [vmem:[#allocation28_spill] sm:$0xff] %v8763_v12  ;;  %v8766_v20 = vpop.f32.mrb[61].mxu0  ;;  %v8768_v6 = vpop.eup %6012  ;;  %6038 = vpow2.f32 %v4531_v0  ;;  %v4922_v0 = vadd.f32 %v8686_v56, %v8501_v2 }
 0x2e8   :  { %9279 = vst [vmem:[#allocation29_spill] sm:$0xff] %v8766_v20  ;;  %9280 = vst [vmem:[#allocation30_spill] sm:$0xff] %v8768_v6  ;;  %v6015_v54 = vpop.eup %6014  ;;  %v8774_v35 = vpop.f32.mrb[62].mxu1  ;;  %6040 = vtanh.f32 %v4888_v44  ;;  %v3793_v44 = vadd.f32 1.0, %v6005_v24  ;;  %v3667_v20 = vsel %vm3661_vm6, %v3664_v18, %v3650_v32  ;;  %v3910_v6 = vld [vmem:[#allocation4 + $0x28] sm:$0xff]  ;;  %v4258_v32 = vld [vmem:[#allocation4 + $0x80] sm:$0xff] }
 0x2e9   :  { %9281 = vst [vmem:[#allocation46_spill] sm:$0xff] %v8774_v35  ;;  %v6017_v5 = vpop.eup %6016  ;;  %v8778_v7 = vpop.f32.mrb[63].mxu1  ;;  %6042 = vtanh.f32 %v4889_v27  ;;  %vm3670_vm7 = vcmp.ge.s32.totalorder %v3667_v20, 1  ;;  %vm3673_vm8 = vcmp.lt.s32.totalorder %v3667_v20, 17  ;;  %v3919_v10 = vmul.f32 %v6015_v54, %v3907_v9 }
 0x2ea   :  { %9282 = vst [vmem:[#allocation48_spill] sm:$0xff] %v8778_v7  ;;  %v8780_v57 = vpop.f32.mrb[62].mxu0  ;;  %v6019_v31 = vpop.eup %6018  ;;  %6044 = vtanh.f32 %v4920_v46  ;;  %v4256_v46 = vld [vmem:[#allocation4 + $0x70] sm:$0xff]  ;;  %vm8799_vm9 = vmand %vm3670_vm7, %vm3673_vm8 }
 0x2eb   :  { %9283 = vst [vmem:[#allocation32_spill] sm:$0xff] %v8780_v57  ;;  %v8784_v39 = vpop.f32.mrb[63].mxu0  ;;  %v6021_v63 = vpop.eup %6020  ;;  %v4891_v57 = vadd.f32 %v8684_v59, %v8501_v2  ;;  %6046 = vtanh.f32 %v4921_v13 }
 0x2ec   :  { %9284 = vst [vmem:[#allocation31_spill] sm:$0xff] %v8784_v39  ;;  %v6023_v42 = vpop.eup %6022  ;;  %6048 = vtanh.f32 %v4890_v19  ;;  %v4892_v19 = vadd.f32 %v8700_v49, %v8509_v15 }
 0x2ed   :  { %v6025_v7 = vpop.eup %6024  ;;  %6050 = vtanh.f32 %v4891_v57  ;;  %v4923_v57 = vadd.f32 %v8694_v26, %v8501_v2  ;;  %v3922_v16 = vmul.f32 %v6023_v42, %v3910_v6 }
 0x2ee   :  { %v6027_v4 = vpop.eup %6026  ;;  %6052 = vtanh.f32 %v4922_v0  ;;  %v4266_v0 = vmul.f32 %v6017_v5, %v4254_v43 }
 0x2ef   :  { %v6029_v39 = vpop.eup %6028  ;;  %6054 = vrcp.f32 %v4138_v52  ;;  %v4267_v52 = vmul.f32 %v6019_v31, %v4255_v17  ;;  %v4270_v54 = vmul.f32 %v6027_v4, %v4258_v32  ;;  %v4925_v32 = vadd.f32 %v8710_v11, %v8509_v15 }
 0x2f0   :  { %v6031_v35 = vpop.eup %6030  ;;  %v4140_v56 = vadd.f32 1.0, %v6029_v39  ;;  %6056 = vrcp.f32 %v3793_v44  ;;  %v4268_v39 = vmul.f32 %v6021_v63, %v4256_v46  ;;  %v4269_v44 = vmul.f32 %v6025_v7, %v4257_v50 }
 0x2f1   :  { %v6033_v27 = vpop.eup %6032  ;;  %v4141_v13 = vadd.f32 1.0, %v6031_v35  ;;  %6058 = vrcp.f32 %v4139_v1  ;;  %v4896_v11 = vadd.f32 %v8720_v3, %v8539_v14 }
 0x2f2   :  { %v6035_v59 = vpop.eup %6034  ;;  %6060 = vrcp.f32 %v4140_v56  ;;  %v3796_v35 = vadd.f32 1.0, %v6033_v27 }
 0x2f3   :  { %v6037_v12 = vpop.eup %6036  ;;  %6062 = vrcp.f32 %v4141_v13  ;;  %v4142_v1 = vadd.f32 1.0, %v6035_v59  ;;  %v4259_v13 = vld [vmem:[#allocation4 + $0x88] sm:$0xff] }
 0x2f4   :  { %v6039_v24 = vpop.eup %6038  ;;  %v4143_v49 = vadd.f32 1.0, %v6037_v12  ;;  %6064 = vtanh.f32 %v4923_v57 }
 0x2f5   :  { %v6041_v18 = vpop.eup %6040  ;;  %6066 = vtanh.f32 %v4892_v19 }
 0x2f6   :  { %v6043_v23 = vpop.eup %6042  ;;  %v3931_v36 = vmul.f32 %v6041_v18, %v8656_v28  ;;  %v4144_v28 = vadd.f32 1.0, %v6039_v24  ;;  %6068 = vrcp.f32 %v3796_v35  ;;  %v4924_v24 = vadd.f32 %v8704_v30, %v8509_v15 }
 0x2f7   :  { %v6045_v9 = vpop.eup %6044  ;;  %v4278_v17 = vmul.f32 %v6043_v23, %v8659_v55  ;;  %6070 = vrcp.f32 %v4142_v1  ;;  %v4894_v30 = vadd.f32 %v8712_v22, %v8530_v33  ;;  %v4897_v22 = vadd.f32 %v8724_v51, %v8539_v14 }
 0x2f8   :  { %v6047_v26 = vpop.eup %6046  ;;  %v3943_v43 = vadd.f32 %v3931_v36, %v3919_v10  ;;  %v4279_v5 = vmul.f32 %v6045_v9, %v8664_v34  ;;  %6072 = vrcp.f32 %v4143_v49  ;;  %v3913_v10 = vld [vmem:[#allocation4 + $0x40] sm:$0xff]  ;;  %v4498_v51 = vmul.f32 -1.442695, %v4896_v11 }
 0x2f9   :  { %v6049_v6 = vpop.eup %6048  ;;  %v4290_v7 = vadd.f32 %v4278_v17, %v4266_v0  ;;  %v4280_v31 = vmul.f32 %v6047_v26, %v8670_v40  ;;  %6074 = vrcp.f32 %v4144_v28 }
 0x2fa   :  { %v6051_v63 = vpop.eup %6050  ;;  %v3979_v20 = vsel %vm8799_vm9, %v3943_v43, 0.0  ;;  %v4291_v42 = vadd.f32 %v4279_v5, %v4267_v52  ;;  %v3934_v55 = vmul.f32 %v6049_v6, %v8674_v58  ;;  %6076 = vtanh.f32 %v3943_v43 }
 0x2fb   :  { %v6053_v23 = vpop.eup %6052  ;;  %4003 = vst [vmem:[#allocation8 + $0x10] sm:$0xff] %v3979_v20  ;;  %v4326_v34 = vsel %vm8546_vm1, %v4290_v7, 0.0  ;;  %v4292_v36 = vadd.f32 %v4280_v31, %v4268_v39  ;;  %v4281_v12 = vmul.f32 %v6051_v63, %v8676_v25  ;;  %v4893_v25 = vadd.f32 %v8702_v38, %v8509_v15  ;;  %v4262_v31 = vld [vmem:[#allocation4 + $0xa0] sm:$0xff] }
 0x2fc   :  { %v6055_v4 = vpop.eup %6054  ;;  %4351 = vst [vmem:[#allocation8 + $0x60] sm:$0xff] %v4326_v34  ;;  %v4327_v40 = vsel %vm8561_vm3, %v4291_v42, 0.0  ;;  %v3946_v27 = vadd.f32 %v3934_v55, %v3922_v16  ;;  %v4282_v59 = vmul.f32 %v6053_v23, %v8681_v8  ;;  %6078 = vtanh.f32 %v4290_v7  ;;  %v9288_v20 = vld [vmem:[#allocation17_spill] sm:$0xff]  ;;  %v3916_v34 = vld [vmem:[#allocation4 + $0x58] sm:$0xff] }
 0x2fd   :  { %v6057_v46 = vpop.eup %6056  ;;  %4352 = vst [vmem:[#allocation8 + $0x68] sm:$0xff] %v4327_v40  ;;  %v4328_v58 = vsel %vm8799_vm9, %v4292_v36, 0.0  ;;  %v8817_v56 = vadd.f32 %v4281_v12, %v4269_v44  ;;  %6080 = vtanh.f32 %v4291_v42  ;;  %v4271_v0 = vmul.f32 %v6055_v4, %v4259_v13  ;;  %v4263_v40 = vld [vmem:[#allocation4 + $0xa8] sm:$0xff] }
 0x2fe   :  { %v8821_v50 = vpop.eup %6058  ;;  %4353 = vst [vmem:[#allocation8 + $0x70] sm:$0xff] %v4328_v58  ;;  %v3982_v16 = vsel %vm8799_vm9, %v3946_v27, 0.0  ;;  %v8825_v8 = vadd.f32 %v4282_v59, %v4270_v54  ;;  %6082 = vtanh.f32 %v4893_v25  ;;  %v4895_v52 = vadd.f32 %v8714_v60, %v8530_v33  ;;  %v4264_v58 = vld [vmem:[#allocation4 + $0xb0] sm:$0xff]  ;;  %v9289_v25 = vld [vmem:[#allocation21_spill] sm:$0xff] }
 0x2ff   :  { %4006 = vst [vmem:[#allocation8 + $0x28] sm:$0xff] %v3982_v16  ;;  %v4329_v38 = vsel %vm8546_vm1, %v8817_v56, 0.0  ;;  %v6061_v57 = vpop.eup %6060  ;;  %v3925_v44 = vmul.f32 %v6057_v46, %v3913_v10  ;;  %6084 = vtanh.f32 %v4924_v24  ;;  %v4926_v15 = vadd.f32 %v8716_v21, %v8530_v33  ;;  %v9290_v10 = vld [vmem:[#allocation19_spill] sm:$0xff] }
 0x300   :  { %4354 = vst [vmem:[#allocation8 + $0x78] sm:$0xff] %v4329_v38  ;;  %v4330_v19 = vsel %vm8561_vm3, %v8825_v8, 0.0  ;;  %v6063_v18 = vpop.eup %6062  ;;  %6086 = vtanh.f32 %v4925_v32  ;;  %v4928_v60 = vadd.f32 %v8726_v48, %v8539_v14  ;;  %v4927_v21 = vadd.f32 %v8718_v37, %v8530_v33  ;;  %v4260_v48 = vld [vmem:[#allocation4 + $0x90] sm:$0xff]  ;;  %v9287_v33 = vld [vmem:[#allocation18_spill] sm:$0xff] }
 0x301   :  { %4355 = vst [vmem:[#allocation8 + $0x80] sm:$0xff] %v4330_v19  ;;  %v6065_v39 = vpop.eup %6064  ;;  %6088 = vtanh.f32 %v4894_v30  ;;  %v4532_v6 = vmul.f32 -1.442695, %v4897_v22  ;;  %v4899_v37 = vadd.f32 %v9287_v33, %v8553_v62  ;;  %v4930_v42 = vadd.f32 %v9288_v20, %v8553_v62  ;;  %v9296_v20 = vld [vmem:[#allocation24_spill] sm:$0xff] }
 0x302   :  { %v6067_v35 = vpop.eup %6066  ;;  %v4283_v9 = vmul.f32 %v6065_v39, %v8688_v53  ;;  %6090 = vtanh.f32 %v4895_v52  ;;  %v4929_v53 = vadd.f32 %v8731_v41, %v8539_v14  ;;  %v4261_v41 = vld [vmem:[#allocation4 + $0x98] sm:$0xff]  ;;  %v4533_v28 = vmul.f32 -1.442695, %v4928_v60 }
 0x303   :  { %v6069_v54 = vpop.eup %6068  ;;  %v3937_v1 = vmul.f32 %v6067_v35, %v8696_v45  ;;  %6092 = vtanh.f32 %v4926_v15  ;;  %v4898_v45 = vadd.f32 %v8741_v29, %v8553_v62  ;;  %v4272_v23 = vmul.f32 %v8821_v50, %v4260_v48  ;;  %v9292_v15 = vld [vmem:[#allocation16_spill] sm:$0xff] }
 0x304   :  { %v6071_v17 = vpop.eup %6070  ;;  %v8851_v26 = vadd.f32 %v4283_v9, %v4271_v0  ;;  %6094 = vtanh.f32 %v4292_v36  ;;  %v4534_v63 = vmul.f32 -1.442695, %v4929_v53  ;;  %v4273_v4 = vmul.f32 %v6061_v57, %v4261_v41  ;;  %v9291_v0 = vld [vmem:[#allocation15_spill] sm:$0xff]  ;;  %v9294_v53 = vld [vmem:[#allocation28_spill] sm:$0xff] }
 0x305   :  { %v6073_v3 = vpop.eup %6072  ;;  %v8857_v49 = vadd.f32 %v3937_v1, %v3925_v44  ;;  %6096 = vtanh.f32 %v3946_v27  ;;  %v4501_v36 = vmul.f32 -1.442695, %v4898_v45  ;;  %v4535_v27 = vmul.f32 -1.442695, %v4899_v37  ;;  %v4265_v44 = vld [vmem:[#allocation4 + $0xb8] sm:$0xff] }
 0x306   :  { %v6075_v43 = vpop.eup %6074  ;;  %v4331_v5 = vsel %vm8799_vm9, %v8851_v26, 0.0  ;;  %6098 = vtanh.f32 %v4927_v21  ;;  %v4274_v46 = vmul.f32 %v6063_v18, %v4262_v31  ;;  %v3928_v24 = vmul.f32 %v6069_v54, %v3916_v34  ;;  %v9293_v54 = vld [vmem:[#allocation27_spill] sm:$0xff] }
 0x307   :  { %v8866_v14 = vpop.eup %6076  ;;  %4356 = vst [vmem:[#allocation8 + $0x88] sm:$0xff] %v4331_v5  ;;  %v3985_v29 = vsel %vm8799_vm9, %v8857_v49, 0.0  ;;  %6100 = vpow2.f32 %v4498_v51  ;;  %v4536_v50 = vmul.f32 -1.442695, %v4930_v42  ;;  %v4275_v19 = vmul.f32 %v6071_v17, %v4263_v40 }
 0x308   :  { %v8871_v7 = vpop.eup %6078  ;;  %4009 = vst [vmem:[#allocation8 + $0x40] sm:$0xff] %v3985_v29  ;;  %6102 = vpow2.f32 %v4532_v6  ;;  %v4276_v39 = vmul.f32 %v6073_v3, %v4264_v58  ;;  %v4931_v42 = vadd.f32 %v9296_v20, %v8553_v62  ;;  %v9299_v62 = vld [vmem:[#allocation26_spill] sm:$0xff] }
 0x309   :  { %v8875_v55 = vpop.eup %6080  ;;  %6104 = vpow2.f32 %v4533_v28 }
 0x30a   :  { %v6083_v12 = vpop.eup %6082  ;;  %6106 = vpow2.f32 %v4534_v63 }
 0x30b   :  { %v6085_v59 = vpop.eup %6084  ;;  %v4284_v13 = vmul.f32 %v6083_v12, %v9289_v25  ;;  %6108 = vpow2.f32 %v4501_v36  ;;  %v9297_v36 = vld [vmem:[#allocation22_spill] sm:$0xff]  ;;  %v9298_v12 = vld [vmem:[#allocation23_spill] sm:$0xff] }
 0x30c   :  { %v6087_v16 = vpop.eup %6086  ;;  %v4285_v38 = vmul.f32 %v6085_v59, %v9290_v10  ;;  %6110 = vpow2.f32 %v4535_v27 }
 0x30d   :  { %v6089_v32 = vpop.eup %6088  ;;  %v4296_v30 = vadd.f32 %v4284_v13, %v4272_v23  ;;  %v4286_v57 = vmul.f32 %v6087_v16, %v9291_v0  ;;  %6112 = vtanh.f32 %v8817_v56  ;;  %v4277_v56 = vmul.f32 %v6075_v43, %v4265_v44  ;;  %v9295_v43 = vld [vmem:[#allocation30_spill] sm:$0xff]  ;;  %v9300_v13 = vld [vmem:[#allocation25_spill] sm:$0xff] }
 0x30e   :  { %v6091_v52 = vpop.eup %6090  ;;  %v4297_v18 = vadd.f32 %v4285_v38, %v4273_v4  ;;  %v3940_v11 = vmul.f32 %v6089_v32, %v9292_v15  ;;  %6114 = vtanh.f32 %v8825_v8  ;;  %v4900_v4 = vadd.f32 %v9298_v12, %v9297_v36 }
 0x30f   :  { %v6093_v35 = vpop.eup %6092  ;;  %v4332_v9 = vsel %vm8546_vm1, %v4296_v30, 0.0  ;;  %v4298_v22 = vadd.f32 %v4286_v57, %v4274_v46  ;;  %v4287_v1 = vmul.f32 %v6091_v52, %v9293_v54  ;;  %6116 = vtanh.f32 %v8851_v26 }
 0x310   :  { %v8886_v60 = vpop.eup %6094  ;;  %4357 = vst [vmem:[#allocation8 + $0x90] sm:$0xff] %v4332_v9  ;;  %v4333_v17 = vsel %vm8561_vm3, %v4297_v18, 0.0  ;;  %v8891_v21 = vadd.f32 %v3940_v11, %v3928_v24  ;;  %v4288_v3 = vmul.f32 %v6093_v35, %v9294_v53  ;;  %6118 = vtanh.f32 %v8857_v49 }
 0x311   :  { %v8894_v51 = vpop.eup %6096  ;;  %4358 = vst [vmem:[#allocation8 + $0x98] sm:$0xff] %v4333_v17  ;;  %v4334_v45 = vsel %vm8799_vm9, %v4298_v22, 0.0  ;;  %v8899_v48 = vadd.f32 %v4287_v1, %v4275_v19  ;;  %6120 = vtanh.f32 %v4296_v30  ;;  %v4901_v46 = vadd.f32 %v9299_v62, %v9297_v36 }
 0x312   :  { %v6099_v8 = vpop.eup %6098  ;;  %4359 = vst [vmem:[#allocation8 + $0xa0] sm:$0xff] %v4334_v45  ;;  %v3988_v5 = vsel %vm8799_vm9, %v8891_v21, 0.0  ;;  %v8905_v6 = vadd.f32 %v4288_v3, %v4276_v39  ;;  %6122 = vtanh.f32 %v4297_v18  ;;  %v4932_v16 = vadd.f32 %v9300_v13, %v9297_v36 }
 0x313   :  { %v6101_v33 = vpop.eup %6100  ;;  %4012 = vst [vmem:[#allocation8 + $0x58] sm:$0xff] %v3988_v5  ;;  %v4335_v26 = vsel %vm8546_vm1, %v8899_v48, 0.0  ;;  %v4289_v37 = vmul.f32 %v6099_v8, %v9295_v43  ;;  %6124 = vpow2.f32 %v4536_v50  ;;  %v4537_v38 = vmul.f32 -1.442695, %v4931_v42  ;;  %v9301_v50 = vld [vmem:[#allocation29_spill] sm:$0xff] }
 0x314   :  { %v6103_v41 = vpop.eup %6102  ;;  %4360 = vst [vmem:[#allocation8 + $0xa8] sm:$0xff] %v4335_v26  ;;  %v4336_v49 = vsel %vm8561_vm3, %v8905_v6, 0.0  ;;  %v3871_v29 = vadd.f32 1.0, %v6101_v33  ;;  %v4933_v32 = vadd.f32 %v9301_v50, %v9297_v36 }
 0x315   :  { %v6105_v28 = vpop.eup %6104  ;;  %4361 = vst [vmem:[#allocation8 + $0xb0] sm:$0xff] %v4336_v49  ;;  %v8914_v31 = vadd.f32 %v4289_v37, %v4277_v56  ;;  %v4217_v63 = vadd.f32 1.0, %v6103_v41 }
 0x316   :  { %v6107_v23 = vpop.eup %6106  ;;  %6126 = vrcp.f32 %v3871_v29  ;;  %v4218_v34 = vadd.f32 1.0, %v6105_v28 }
 0x317   :  { %v6109_v40 = vpop.eup %6108  ;;  %6128 = vtanh.f32 %v4298_v22  ;;  %v4337_v27 = vsel %vm8799_vm9, %v8914_v31, 0.0  ;;  %v4219_v59 = vadd.f32 1.0, %v6107_v23 }
 0x318   :  { %v6111_v58 = vpop.eup %6110  ;;  %4362 = vst [vmem:[#allocation8 + $0xb8] sm:$0xff] %v4337_v27  ;;  %6130 = vrcp.f32 %v4217_v63  ;;  %v3874_v25 = vadd.f32 1.0, %v6109_v40 }
 0x319   :  { %v8929_v24 = vpop.eup %6112  ;;  %6132 = vrcp.f32 %v4218_v34  ;;  %v4220_v10 = vadd.f32 1.0, %v6111_v58 }
 0x31a   :  { %6271 = shalt.err (!%p6268_p12)
}
 0x31b   :  { %s6272_s4 = scalar_lea.hbm %s9042_s6, 3072 }
 0x31c   :  { %p6273_p13 = scmp.ne.s32.totalorder %s9042_s6, %s6272_s4  ;;  %p6276_p0 = scmp.lt.u32.totalorder %s6272_s4, %s9042_s6 }
 0x31e   :  { %p6278_p1 = pnand %p6276_p0, %p6273_p13 }
 0x320   :  { %6281 = shalt.err (!%p6278_p1)
}
 0x321   :  { %4399 = dma.vmem_to_hbm [thread:$0]  %s8920_s30, 3072, %s9042_s6, [#allocation9], %s6311_s7, %s6311_s7, %s6312_s8   ;;  %v8953_v19 = vpop.eup %6114  ;;  %6134 = vrcp.f32 %v4219_v59  ;;  %v4504_v30 = vmul.f32 -1.442695, %v4900_v4  ;;  %v4538_v57 = vmul.f32 -1.442695, %v4901_v46 }
 0x322   :  { %v8955_v0 = vpop.eup %6116  ;;  %6136 = vrcp.f32 %v3874_v25  ;;  %v9302_v52 = vld [vmem:[#allocation20_spill] sm:$0xff]  ;;  %v9303_v39 = vld [vmem:[#allocation46_spill] sm:$0xff]  ;;  %v4539_v15 = vmul.f32 -1.442695, %v4932_v16  ;;  %v4540_v22 = vmul.f32 -1.442695, %v4933_v32 }
 0x323   :  { %v4902_v44 = vadd.f32 %v9303_v39, %v9302_v52  ;;  %v8959_v18 = vpop.eup %6118  ;;  %6138 = vrcp.f32 %v4220_v10  ;;  %v9304_v11 = vld [vmem:[#allocation48_spill] sm:$0xff]  ;;  %v9306_v53 = vld [vmem:[#allocation31_spill] sm:$0xff]  ;;  %s6323_s6 = smov [#allocation7]  }
 0x324   :  { %v4903_v35 = vadd.f32 %v9304_v11, %v9302_v52  ;;  %v8963_v9 = vpop.eup %6120  ;;  %6140 = vpow2.f32 %v4537_v38  ;;  %v9305_v54 = vld [vmem:[#allocation32_spill] sm:$0xff]  ;;  %v4935_v3 = vadd.f32 %v9306_v53, %v9302_v52  ;;  %s4381_s20 = sshll.u32 %s6323_s6, 4  ;;  %s4382_s20 = int_to_ptr.vmem [resolvable:$true] %s4381_s20 }
 0x325   :  { %v4934_v1 = vadd.f32 %v9305_v54, %v9302_v52  ;;  %v8967_v17 = vpop.eup %6122  ;;  %6142 = vpow2.f32 %v4504_v30  ;;  %v4507_v45 = vmul.f32 -1.442695, %v4902_v44  ;;  %s6282_s21 = scalar_lea.vmem %s4382_s20, 3072  ;;  %p6287_p3 = scmp.lt.s32.totalorder %s4382_s20, %s4382_s20 }
 0x326   :  { %v6125_v56 = vpop.eup %6124  ;;  %6144 = vpow2.f32 %v4538_v57  ;;  %v4541_v33 = vmul.f32 -1.442695, %v4903_v35  ;;  %v4543_v49 = vmul.f32 -1.442695, %v4935_v3  ;;  %p6283_p2 = scmp.ne.s32.totalorder %s4382_s20, %s6282_s21  ;;  %p6288_p4 = scmp.lt.s32.totalorder %s6282_s21, %s6282_s21 }
 0x327   :  { %v6127_v8 = vpop.eup %6126  ;;  %v4221_v5 = vadd.f32 1.0, %v6125_v56  ;;  %6146 = vpow2.f32 %v4539_v15  ;;  %v4542_v37 = vmul.f32 -1.442695, %v4934_v1 }
 0x328   :  { %v8971_v26 = vpop.eup %6128  ;;  %v3967_v43 = vmul.f32 %v6127_v8, %v8866_v14  ;;  %6148 = vpow2.f32 %v4540_v22  ;;  %p6289_p5 = por %p6288_p4, %p6287_p3 }
 0x329   :  { %v6131_v41 = vpop.eup %6130  ;;  %6150 = vrcp.f32 %v4221_v5 }
 0x32a   :  { %v6133_v29 = vpop.eup %6132  ;;  %v3991_v28 = vsel %vm8799_vm9, %v3967_v43, 0.0  ;;  %v4314_v63 = vmul.f32 %v6131_v41, %v8871_v7  ;;  %6152 = vpow2.f32 %v4507_v45  ;;  %p6290_p6 = pnand %p6289_p5, %p6283_p2 }
 0x32b   :  { %v6135_v20 = vpop.eup %6134  ;;  %4015 = vst [vmem:[#allocation7 + $0x10] sm:$0xff] %v3991_v28  ;;  %v4315_v42 = vmul.f32 %v6133_v29, %v8875_v55  ;;  %6154 = vpow2.f32 %v4541_v33 }
 0x32c   :  { %v6137_v23 = vpop.eup %6136  ;;  %v4338_v14 = vsel %vm8546_vm1, %v4314_v63, 0.0  ;;  %v4316_v34 = vmul.f32 %v6135_v20, %v8886_v60  ;;  %6156 = vpow2.f32 %v4542_v37 }
 0x32d   :  { %v6139_v36 = vpop.eup %6138  ;;  %4364 = vst [vmem:[#allocation7 + $0x60] sm:$0xff] %v4338_v14  ;;  %v4339_v12 = vsel %vm8561_vm3, %v4315_v42, 0.0  ;;  %v3970_v7 = vmul.f32 %v6137_v23, %v8894_v51  ;;  %6158 = vpow2.f32 %v4543_v49 }
 0x32e   :  { %v6141_v4 = vpop.eup %6140  ;;  %6160 = vtanh.f32 %v8891_v21  ;;  %4365 = vst [vmem:[#allocation7 + $0x68] sm:$0xff] %v4339_v12  ;;  %v4340_v55 = vsel %vm8799_vm9, %v4316_v34, 0.0  ;;  %v4317_v40 = vmul.f32 %v6139_v36, %v8929_v24 }
 0x32f   :  { %v6143_v27 = vpop.eup %6142  ;;  %6162 = vtanh.f32 %v8899_v48  ;;  %4366 = vst [vmem:[#allocation7 + $0x70] sm:$0xff] %v4340_v55  ;;  %v3994_v60 = vsel %vm8799_vm9, %v3970_v7, 0.0  ;;  %v4222_v59 = vadd.f32 1.0, %v6141_v4 }
 0x330   :  { %v6145_v62 = vpop.eup %6144  ;;  %6164 = vtanh.f32 %v8905_v6  ;;  %4018 = vst [vmem:[#allocation7 + $0x28] sm:$0xff] %v3994_v60  ;;  %v4341_v21 = vsel %vm8546_vm1, %v4317_v40, 0.0  ;;  %v3877_v51 = vadd.f32 1.0, %v6143_v27 }
 0x331   :  { %v6147_v46 = vpop.eup %6146  ;;  %4367 = vst [vmem:[#allocation7 + $0x78] sm:$0xff] %v4341_v21  ;;  %6166 = vrcp.f32 %v4222_v59  ;;  %v4223_v58 = vadd.f32 1.0, %v6145_v62 }
 0x332   :  { %v6149_v25 = vpop.eup %6148  ;;  %6168 = vrcp.f32 %v3877_v51  ;;  %v4224_v48 = vadd.f32 1.0, %v6147_v46 }
 0x333   :  { %v6151_v13 = vpop.eup %6150  ;;  %6170 = vrcp.f32 %v4223_v58  ;;  %v4225_v16 = vadd.f32 1.0, %v6149_v25 }
 0x334   :  { %v6153_v24 = vpop.eup %6152  ;;  %v4318_v10 = vmul.f32 %v6151_v13, %v8953_v19  ;;  %6172 = vrcp.f32 %v4224_v48 }
 0x335   :  { %v6155_v6 = vpop.eup %6154  ;;  %6174 = vrcp.f32 %v4225_v16  ;;  %v3880_v38 = vadd.f32 1.0, %v6153_v24 }
 0x336   :  { %v6157_v50 = vpop.eup %6156  ;;  %6176 = vtanh.f32 %v8914_v31  ;;  %v4342_v32 = vsel %vm8561_vm3, %v4318_v10, 0.0  ;;  %v4226_v30 = vadd.f32 1.0, %v6155_v6 }
 0x337   :  { %v6159_v57 = vpop.eup %6158  ;;  %4368 = vst [vmem:[#allocation7 + $0x80] sm:$0xff] %v4342_v32  ;;  %6178 = vrcp.f32 %v3880_v38  ;;  %v4227_v52 = vadd.f32 1.0, %v6157_v50 }
 0x338   :  { %v6161_v39 = vpop.eup %6160  ;;  %6180 = vrcp.f32 %v4226_v30  ;;  %v4228_v44 = vadd.f32 1.0, %v6159_v57 }
 0x339   :  { %v6163_v15 = vpop.eup %6162  ;;  %6182 = vrcp.f32 %v4227_v52 }
 0x33a   :  { %v6165_v19 = vpop.eup %6164  ;;  %6184 = vrcp.f32 %v4228_v44 }
 0x33b   :  { %v6167_v11 = vpop.eup %6166 }
 0x33c   :  { %v6169_v35 = vpop.eup %6168  ;;  %v4319_v22 = vmul.f32 %v6167_v11, %v8955_v0 }
 0x33d   :  { %v6171_v31 = vpop.eup %6170  ;;  %v3973_v54 = vmul.f32 %v6169_v35, %v8959_v18 }
 0x33e   :  { %v6173_v1 = vpop.eup %6172  ;;  %v4343_v53 = vsel %vm8799_vm9, %v4319_v22, 0.0  ;;  %v4320_v3 = vmul.f32 %v6171_v31, %v8963_v9 }
 0x33f   :  { %v6175_v56 = vpop.eup %6174  ;;  %4369 = vst [vmem:[#allocation7 + $0x88] sm:$0xff] %v4343_v53  ;;  %v3997_v45 = vsel %vm8799_vm9, %v3973_v54, 0.0  ;;  %v4321_v8 = vmul.f32 %v6173_v1, %v8967_v17 }
 0x340   :  { %v6177_v5 = vpop.eup %6176  ;;  %4021 = vst [vmem:[#allocation7 + $0x40] sm:$0xff] %v3997_v45  ;;  %v4344_v0 = vsel %vm8546_vm1, %v4320_v3, 0.0  ;;  %v4322_v18 = vmul.f32 %v6175_v56, %v8971_v26 }
 0x341   :  { %v6179_v33 = vpop.eup %6178  ;;  %4370 = vst [vmem:[#allocation7 + $0x90] sm:$0xff] %v4344_v0  ;;  %v4345_v43 = vsel %vm8561_vm3, %v4321_v8, 0.0 }
 0x342   :  { %v6181_v9 = vpop.eup %6180  ;;  %4371 = vst [vmem:[#allocation7 + $0x98] sm:$0xff] %v4345_v43  ;;  %v4346_v37 = vsel %vm8799_vm9, %v4322_v18, 0.0  ;;  %v3976_v41 = vmul.f32 %v6179_v33, %v6161_v39 }
 0x343   :  { %v6183_v49 = vpop.eup %6182  ;;  %4372 = vst [vmem:[#allocation7 + $0xa0] sm:$0xff] %v4346_v37  ;;  %v4323_v17 = vmul.f32 %v6181_v9, %v6163_v15 }
 0x344   :  { %v6185_v29 = vpop.eup %6184  ;;  %v4000_v26 = vsel %vm8799_vm9, %v3976_v41, 0.0  ;;  %v4324_v28 = vmul.f32 %v6183_v49, %v6165_v19 }
 0x345   :  { %4024 = vst [vmem:[#allocation7 + $0x58] sm:$0xff] %v4000_v26  ;;  %v4347_v63 = vsel %vm8546_vm1, %v4323_v17, 0.0  ;;  %v4325_v20 = vmul.f32 %v6185_v29, %v6177_v5 }
 0x346   :  { %4373 = vst [vmem:[#allocation7 + $0xa8] sm:$0xff] %v4347_v63  ;;  %v4348_v42 = vsel %vm8561_vm3, %v4324_v28, 0.0 }
 0x347   :  { %4374 = vst [vmem:[#allocation7 + $0xb0] sm:$0xff] %v4348_v42  ;;  %v4349_v23 = vsel %vm8799_vm9, %v4325_v20, 0.0 }
 0x348   :  { %4375 = vst [vmem:[#allocation7 + $0xb8] sm:$0xff] %v4349_v23 }
 0x349   :  { %6293 = shalt.err (!%p6290_p6)
}
 0x34a   :  { %s6294_s23 = scalar_lea.hbm %s9041_s5, 3072 }
 0x34b   :  { %p6295_p7 = scmp.ne.s32.totalorder %s9041_s5, %s6294_s23  ;;  %p6298_p8 = scmp.lt.u32.totalorder %s6294_s23, %s9041_s5 }
 0x34d   :  { %p6300_p9 = pnand %p6298_p8, %p6295_p7 }
 0x34f   :  { %6303 = shalt.err (!%p6300_p9)
}
 0x350   :  { %4387 = dma.vmem_to_hbm [thread:$0]  %s4382_s20, 3072, %s9041_s5, [#allocation6], %s6311_s7, %s6311_s7, %s6312_s8  }
 0x351   :  { %6306 = dma.done.wait [#allocation6], 3072  }
 0x352   :  { %6307 = vsyncadd [#allocation6], 4294964224 }
 0x353   :  { %6308 = dma.done.wait [#allocation9], 3072  }
 0x354   :  { %6309 = vsyncadd [#allocation9], 4294964224 }
 0x355   :  { %4406 = vsyncpa [#allocation5], 1 }
 0x356   :  { %4407 = vsyncpa [#allocation6], 1 }
 0x357   :  { %4408 = vsyncpa [#allocation9], 1 }

</bundles_post_ra>
